<compile_context>
chip_gen: v5e
topology: v5e:2x2
jax: 0.10.0
libtpu: 0.0.40
codegen_flags: <defaults>
</compile_context>

<pallas_src>
import jax
import jax.numpy as jnp
from jax.experimental import pallas as pl
from jax.experimental.pallas import tpu as pltpu


# ----------------------------------------------------------------------------
# helpers
# ----------------------------------------------------------------------------
def _round_up(x, m):
    return ((x + m - 1) // m) * m


def _row_tiling(M, target=1024):
    """Row tiling for the pointwise kernels.

    Prefers a multiple-of-8 divisor of M (no pad/slice HBM round trips) that gives at
    least two grid steps (both v7x TensorCores get work).  Falls back to one full-height
    block for small M, and to padding only as a last resort."""
    hi = min(target, max(M // 2, 8))
    tm = hi - hi % 8
    while tm >= 8:
        if M % tm == 0:
            return M, tm
        tm -= 8
    if M <= 2 * target:
        return M, M                       # single block; full dim -> no (8,128) constraint
    return _round_up(M, target), target   # rare fallback: pad + slice


def _pick_th(H, W):
    """H-band height for the bottleneck kernel: H % th == 0, >=2 bands when possible
    (megacore even at batch 1), and th*W small enough that the band's live values
    (slab + accumulator) stay at a few MiB for large feature maps (v7x VMEM)."""
    for th in range(H // 2, 0, -1):
        if H % th == 0 and th * W <= 4096:
            return th
    return H


_PARALLEL_1D = pltpu.CompilerParams(dimension_semantics=("parallel",))
_PARALLEL_2D = pltpu.CompilerParams(dimension_semantics=("parallel", "parallel"))


# ----------------------------------------------------------------------------
# Kernel 1: fused C3 head — cv1 and cv2 (1x1 conv + folded-BN bias + SiLU) share one
# read of x and ONE MXU dot per row tile (weights fused to (C1, 2*c_)).
# ----------------------------------------------------------------------------
def _head_kernel(x_ref, w_ref, b_ref, y1_ref, y2_ref):
    c = y1_ref.shape[-1]
    t = jnp.dot(x_ref[...], w_ref[...], preferred_element_type=jnp.float32) + b_ref[...]
    t = t * jax.nn.sigmoid(t)
    y1_ref[...] = t[:, :c].astype(y1_ref.dtype)
    y2_ref[...] = t[:, c:].astype(y2_ref.dtype)


def c3_head(x2d, w12, b12, c_):
    M, C1 = x2d.shape
    Mp, tm = _row_tiling(M)
    if Mp != M:
        x2d = jnp.pad(x2d, ((0, Mp - M), (0, 0)))
    y1, y2 = pl.pallas_call(
        _head_kernel,
        out_shape=(jax.ShapeDtypeStruct((Mp, c_), jnp.bfloat16),
                   jax.ShapeDtypeStruct((Mp, c_), jnp.bfloat16)),
        grid=(Mp // tm,),
        in_specs=[
            pl.BlockSpec((tm, C1), lambda i: (i, 0)),
            pl.BlockSpec((C1, 2 * c_), lambda i: (0, 0)),
            pl.BlockSpec((1, 2 * c_), lambda i: (0, 0)),
        ],
        out_specs=(pl.BlockSpec((tm, c_), lambda i: (i, 0)),
                   pl.BlockSpec((tm, c_), lambda i: (i, 0))),
        compiler_params=_PARALLEL_1D,
    )(x2d, w12, b12)
    if Mp != M:
        y1, y2 = y1[:M], y2[:M]
    return y1, y2


# ----------------------------------------------------------------------------
# Kernel 2: fused concat + cv3 — out = SiLU(y1 @ W3_top + y2 @ W3_bot + b3).
# The (M, 2*c_) concatenated tensor never exists in HBM; bf16 writeback.
# ----------------------------------------------------------------------------
def _tail_kernel(y1_ref, y2_ref, wa_ref, wb_ref, b_ref, o_ref):
    acc = jnp.dot(y1_ref[...], wa_ref[...], preferred_element_type=jnp.float32)
    acc = acc + jnp.dot(y2_ref[...], wb_ref[...], preferred_element_type=jnp.float32)
    y = acc + b_ref[...]
    o_ref[...] = (y * jax.nn.sigmoid(y)).astype(o_ref.dtype)


def c3_tail(y1_2d, y2_2d, wa, wb, b):
    M, c_ = y1_2d.shape
    C2 = wa.shape[1]
    Mp, tm = _row_tiling(M)
    if Mp != M:
        y1_2d = jnp.pad(y1_2d, ((0, Mp - M), (0, 0)))
        y2_2d = jnp.pad(y2_2d, ((0, Mp - M), (0, 0)))
    out = pl.pallas_call(
        _tail_kernel,
        out_shape=jax.ShapeDtypeStruct((Mp, C2), jnp.bfloat16),
        grid=(Mp // tm,),
        in_specs=[
            pl.BlockSpec((tm, c_), lambda i: (i, 0)),
            pl.BlockSpec((tm, c_), lambda i: (i, 0)),
            pl.BlockSpec((c_, C2), lambda i: (0, 0)),
            pl.BlockSpec((c_, C2), lambda i: (0, 0)),
            pl.BlockSpec((1, C2), lambda i: (0, 0)),
        ],
        out_specs=pl.BlockSpec((tm, C2), lambda i: (i, 0)),
        compiler_params=_PARALLEL_1D,
    )(y1_2d, y2_2d, wa, wb, b)
    return out[:M] if Mp != M else out


# ----------------------------------------------------------------------------
# Kernel 3: one fused Bottleneck per (image, H-band):
#   t = SiLU(x @ W1 + b1)                 (1x1 conv, stays on-chip)
#   y = SiLU(conv3x3(t) + b2) + x         (3x3 conv via aligned column-im2col, 3 dots K=3C)
# The full image x is resident in VMEM across the H-band grid axis (DMA'd once per image).
# ----------------------------------------------------------------------------
def _bottleneck_kernel(x_ref, w1_ref, b1_ref, w2_ref, b2_ref, o_ref):
    H, W, C = x_ref.shape
    th = o_ref.shape[0]
    R = th + 2                                   # band + 1 halo row on each side
    start = pl.program_id(1) * th

    # --- gather x rows for this band plus the 1-row halos (clamped at the border) ---
    x_top = x_ref[pl.ds(jnp.maximum(start - 1, 0), 1)]          # (1, W, C)
    x_mid = x_ref[pl.ds(start, th)]                             # (th, W, C)
    x_bot = x_ref[pl.ds(jnp.minimum(start + th, H - 1), 1)]     # (1, W, C)
    x_win = jnp.concatenate([x_top, x_mid, x_bot], axis=0)      # (R, W, C) bf16

    # --- 1x1 conv + folded-BN bias + SiLU; t never touches HBM ---
    t = jnp.dot(x_win.reshape(R * W, C), w1_ref[...],
                preferred_element_type=jnp.float32) + b1_ref[...]
    t = t * jax.nn.sigmoid(t)
    t3 = t.reshape(R, W, C)

    # zero the halo rows at the image boundary (= vertical SAME padding of the 3x3 conv)
    row = jax.lax.broadcasted_iota(jnp.int32, (R, 1, 1), 0)
    keep = ((row != 0) | (start > 0)) & ((row != R - 1) | (start + th < H))
    t3 = jnp.where(keep, t3, 0.0)

    # --- horizontal taps: build the +-1 column shifts once, concat along lanes, cast once ---
    zcol = jnp.zeros((R, 1, C), jnp.float32)
    tl = jnp.concatenate([zcol, t3[:, :W - 1, :]], axis=1)      # t[.., w-1] (zero at w=0)
    tr = jnp.concatenate([t3[:, 1:, :], zcol], axis=1)          # t[.., w+1] (zero at w=W-1)
    slab = jnp.concatenate([tl, t3, tr], axis=2).astype(jnp.bfloat16)   # (R, W, 3C)

    # --- 3x3 conv: 3 MXU dots (K = 3C); vertical taps are aligned leading-dim slices ---
    acc = None
    for ky in range(3):
        lhs = slab[ky:ky + th].reshape(th * W, 3 * C)
        d = jnp.dot(lhs, w2_ref[ky], preferred_element_type=jnp.float32)
        acc = d if acc is None else acc + d

    y = acc + b2_ref[...]
    y = y * jax.nn.sigmoid(y)
    y = y + x_mid.reshape(th * W, C).astype(jnp.float32)        # shortcut: reuse loaded x band
    o_ref[...] = y.reshape(th, W, C).astype(o_ref.dtype)


def bottleneck(y_nhwc, w1, b1, w2g, b2):
    N, H, W, C = y_nhwc.shape
    th = _pick_th(H, W)
    return pl.pallas_call(
        _bottleneck_kernel,
        out_shape=jax.ShapeDtypeStruct((N, H, W, C), jnp.bfloat16),
        grid=(N, H // th),
        in_specs=[
            pl.BlockSpec((None, H, W, C), lambda n, h: (n, 0, 0, 0)),   # resident per image
            pl.BlockSpec((C, C), lambda n, h: (0, 0)),
            pl.BlockSpec((1, C), lambda n, h: (0, 0)),
            pl.BlockSpec((3, 3 * C, C), lambda n, h: (0, 0, 0)),
            pl.BlockSpec((1, C), lambda n, h: (0, 0)),
        ],
        out_specs=pl.BlockSpec((None, th, W, C), lambda n, h: (n, h, 0, 0)),
        compiler_params=_PARALLEL_2D,
    )(y_nhwc, w1, b1, w2g, b2)


# ----------------------------------------------------------------------------
# Parameter construction (deterministic) + BN folding into weights
# ----------------------------------------------------------------------------
def init_conv_bn(key, cin, cout, k):
    kw, kg, kb, km, kv = jax.random.split(key, 5)
    w = 0.1 * jax.random.normal(kw, (cout, cin, k, k), jnp.float32)   # OIHW (torch layout)
    gamma = 1.0 + 0.1 * jax.random.normal(kg, (cout,), jnp.float32)
    beta = 0.1 * jax.random.normal(kb, (cout,), jnp.float32)
    mean = 0.1 * jax.random.normal(km, (cout,), jnp.float32)
    var = jax.random.uniform(kv, (cout,), jnp.float32, minval=0.5, maxval=1.5)
    eps = 1e-5                                                        # nn.BatchNorm2d default
    scale = gamma / jnp.sqrt(var + eps)
    bias = beta - mean * scale
    return w, scale.reshape(1, cout), bias.reshape(1, cout)


def _fold_pw(p):
    """1x1 conv: OIHW -> (Cin, Cout) with the BN scale folded into the weight."""
    w, s, b = p
    cout, cin = w.shape[0], w.shape[1]
    w2 = (w.reshape(cout, cin).T * s).astype(jnp.bfloat16)
    return w2, b.astype(jnp.float32)


def _fold_3x3_grouped(p):
    """3x3 conv: OIHW -> (3, 3*Cin, Cout), grouped as [ky][kx*Cin + cin], BN scale folded."""
    w, s, b = p
    cout, cin = w.shape[0], w.shape[1]
    w2 = jnp.transpose(w, (2, 3, 1, 0))                   # (ky, kx, cin, cout)
    w2 = w2 * s.reshape(1, 1, 1, cout)
    w2 = w2.reshape(3, 3 * cin, cout).astype(jnp.bfloat16)
    return w2, b.astype(jnp.float32)


def fuse_c3_params(params):
    w1, b1 = _fold_pw(params["cv1"])
    w2, b2 = _fold_pw(params["cv2"])
    w3, b3 = _fold_pw(params["cv3"])                      # (2*c_, C2)
    c_ = w1.shape[1]
    w12 = jnp.concatenate([w1, w2], axis=1)               # (C1, 2*c_): cv1 | cv2 fused
    b12 = jnp.concatenate([b1, b2], axis=1)               # (1, 2*c_)
    return {
        "head": (w12, b12),
        "tail": (w3[:c_, :], w3[c_:, :], b3),             # split cv3 weight: y1-half / y2-half
        "m": [(_fold_pw(bp["cv1"]), _fold_3x3_grouped(bp["cv2"])) for bp in params["m"]],
    }


# ----------------------------------------------------------------------------
# C3 forward, built from the fused Pallas kernels
# ----------------------------------------------------------------------------
def c3_forward(x_nchw, fused):
    N, C1, H, W = x_nchw.shape
    x = jnp.transpose(x_nchw, (0, 2, 3, 1)).astype(jnp.bfloat16)      # NCHW -> NHWC bf16
    M = N * H * W

    w12, b12 = fused["head"]
    c_ = w12.shape[1] // 2
    y1_2d, y2_2d = c3_head(x.reshape(M, C1), w12, b12, c_)

    y1 = y1_2d.reshape(N, H, W, c_)
    for (bw1, bb1), (bw2, bb2) in fused["m"]:                          # Bottleneck(c_, c_)
        y1 = bottleneck(y1, bw1, bb1, bw2, bb2)

    wa, wb, b3 = fused["tail"]
    C2 = wa.shape[1]
    out2d = c3_tail(y1.reshape(M, c_), y2_2d, wa, wb, b3)              # concat + cv3 fused
    out = out2d.reshape(N, H, W, C2)
    # NHWC(bf16) -> NCHW(f32): the transpose now reads bf16 (half the traffic of before).
    return jnp.transpose(out, (0, 3, 1, 2)).astype(jnp.float32)


# ----------------------------------------------------------------------------
# Pure-JAX f32 reference (verification only)
# ----------------------------------------------------------------------------
def _ref_conv_bn_silu(x, p, k):
    w, s, b = p
    pad = k // 2
    y = jax.lax.conv_general_dilated(
        x, w, (1, 1), [(pad, pad), (pad, pad)],
        dimension_numbers=("NCHW", "OIHW", "NCHW"))
    y = y * s.reshape(1, -1, 1, 1) + b.reshape(1, -1, 1, 1)
    return y * jax.nn.sigmoid(y)


def ref_c3(x, params):
    y1 = _ref_conv_bn_silu(x, params["cv1"], 1)
    for bp in params["m"]:
        t = _ref_conv_bn_silu(y1, bp["cv1"], 1)
        y1 = y1 + _ref_conv_bn_silu(t, bp["cv2"], 3)
    y2 = _ref_conv_bn_silu(x, params["cv2"], 1)
    return _ref_conv_bn_silu(jnp.concatenate([y1, y2], axis=1), params["cv3"], 1)


# ----------------------------------------------------------------------------
if __name__ == "__main__":
    key = jax.random.PRNGKey(0)
    N, C1, C2, H, W, n_bottleneck = 2, 8, 8, 16, 16, 1
    c_ = int(C2 * 0.5)

    keys = jax.random.split(key, 4 + 2 * n_bottleneck)
    kx, k_cv1, k_cv2, k_cv3 = keys[:4]
    bkeys = keys[4:]

    params = {
        "cv1": init_conv_bn(k_cv1, C1, c_, 1),
        "cv2": init_conv_bn(k_cv2, C1, c_, 1),
        "cv3": init_conv_bn(k_cv3, 2 * c_, C2, 1),
        "m": [
            {
                "cv1": init_conv_bn(bkeys[2 * i], c_, c_, 1),
                "cv2": init_conv_bn(bkeys[2 * i + 1], c_, c_, 3),
            }
            for i in range(n_bottleneck)
        ],
    }
    fused = fuse_c3_params(params)

    x = jax.random.normal(kx, (N, C1, H, W), jnp.float32)

    out = jax.jit(c3_forward)(x, fused)
    out = jax.block_until_ready(out)

    assert out.shape == (N, C2, H, W), out.shape
    ref = ref_c3(x, params)
    max_err = float(jnp.max(jnp.abs(out - ref)))
    # bf16 matmul operands / bf16 writeback -> loosened tolerance vs the f32 reference.
    assert jnp.allclose(out, ref, atol=4e-2, rtol=4e-2), f"max_err={max_err}"

    print("KERNEL_OK")
</pallas_src>

<mosaic_0001>
module attributes {stable_mosaic.version = 11 : i64} {
  func.func @_head_kernel(%arg0: i32, %arg1: memref<256x8xbf16, #tpu.memory_space<vmem>>, %arg2: memref<8x8xbf16, #tpu.memory_space<vmem>>, %arg3: memref<1x8xf32, #tpu.memory_space<vmem>>, %arg4: memref<256x4xbf16, #tpu.memory_space<vmem>>, %arg5: memref<256x4xbf16, #tpu.memory_space<vmem>>) attributes {dimension_semantics = [#tpu.dimension_semantics<parallel>], iteration_bounds = array<i64: 2>, scalar_prefetch = 0 : i64, scratch_operands = 0 : i64, tpu.core_type = #tpu.core_type<tc>, window_params = [{transform_indices = @transform_0, window_bounds = array<i64: 256, 8>}, {pipeline_mode = #tpu.pipeline_mode<synchronous>, transform_indices = @transform_1, window_bounds = array<i64: 8, 8>}, {pipeline_mode = #tpu.pipeline_mode<synchronous>, transform_indices = @transform_2, window_bounds = array<i64: 1, 8>}, {transform_indices = @transform_3, window_bounds = array<i64: 256, 4>}, {transform_indices = @transform_4, window_bounds = array<i64: 256, 4>}]} {
    %c0 = arith.constant 0 : index
    %c0_0 = arith.constant 0 : index
    %0 = vector.load %arg1[%c0, %c0_0] : memref<256x8xbf16, #tpu.memory_space<vmem>>, vector<256x8xbf16>
    %c0_1 = arith.constant 0 : index
    %c0_2 = arith.constant 0 : index
    %1 = vector.load %arg2[%c0_1, %c0_2] : memref<8x8xbf16, #tpu.memory_space<vmem>>, vector<8x8xbf16>
    %cst = arith.constant dense<0.000000e+00> : vector<256x8xf32>
    %2 = tpu.matmul %0, %1, %cst {dimension_numbers = #tpu.dot_dimension_numbers<[1], [0], [0], [1], [0, 0, 1, 1], [], []>} : vector<256x8xbf16>, vector<8x8xbf16>, vector<256x8xf32> -> vector<256x8xf32>
    %c0_3 = arith.constant 0 : index
    %c0_4 = arith.constant 0 : index
    %3 = vector.load %arg3[%c0_3, %c0_4] : memref<1x8xf32, #tpu.memory_space<vmem>>, vector<1x8xf32>
    %4 = vector.broadcast %3 : vector<1x8xf32> to vector<256x8xf32>
    %5 = arith.addf %2, %4 : vector<256x8xf32>
    %6 = arith.negf %5 : vector<256x8xf32>
    %7 = math.exp %6 : vector<256x8xf32>
    %cst_5 = arith.constant 1.000000e+00 : f32
    %8 = vector.broadcast %cst_5 : f32 to vector<256x8xf32>
    %9 = arith.addf %8, %7 : vector<256x8xf32>
    %10 = arith.divf %8, %9 : vector<256x8xf32>
    %11 = arith.mulf %5, %10 : vector<256x8xf32>
    %12 = vector.extract_strided_slice %11 {offsets = [0, 0], sizes = [256, 4], strides = [1, 1]} : vector<256x8xf32> to vector<256x4xf32>
    %13 = arith.truncf %12 : vector<256x4xf32> to vector<256x4xbf16>
    %c0_6 = arith.constant 0 : index
    %c0_7 = arith.constant 0 : index
    %14 = vector.load %arg4[%c0_6, %c0_7] : memref<256x4xbf16, #tpu.memory_space<vmem>>, vector<256x4xbf16>
    tpu.vector_store %arg4[%c0_6, %c0_7], %13 {strides = array<i32>} : memref<256x4xbf16, #tpu.memory_space<vmem>>, vector<256x4xbf16>,
    %15 = vector.extract_strided_slice %11 {offsets = [0, 4], sizes = [256, 4], strides = [1, 1]} : vector<256x8xf32> to vector<256x4xf32>
    %16 = arith.truncf %15 : vector<256x4xf32> to vector<256x4xbf16>
    %c0_8 = arith.constant 0 : index
    %c0_9 = arith.constant 0 : index
    %17 = vector.load %arg5[%c0_8, %c0_9] : memref<256x4xbf16, #tpu.memory_space<vmem>>, vector<256x4xbf16>
    tpu.vector_store %arg5[%c0_8, %c0_9], %16 {strides = array<i32>} : memref<256x4xbf16, #tpu.memory_space<vmem>>, vector<256x4xbf16>,
    return
  }
  func.func @transform_0(%arg0: i32) -> (i32, i32) {
    %c0_i32 = arith.constant 0 : i32
    %c0_i32_0 = arith.constant 0 : i32
    return %arg0, %c0_i32 : i32, i32
  }
  func.func @transform_1(%arg0: i32) -> (i32, i32) {
    %c0_i32 = arith.constant 0 : i32
    %c0_i32_0 = arith.constant 0 : i32
    %c0_i32_1 = arith.constant 0 : i32
    return %c0_i32, %c0_i32_0 : i32, i32
  }
  func.func @transform_2(%arg0: i32) -> (i32, i32) {
    %c0_i32 = arith.constant 0 : i32
    %c0_i32_0 = arith.constant 0 : i32
    %c0_i32_1 = arith.constant 0 : i32
    return %c0_i32, %c0_i32_0 : i32, i32
  }
  func.func @transform_3(%arg0: i32) -> (i32, i32) {
    %c0_i32 = arith.constant 0 : i32
    %c0_i32_0 = arith.constant 0 : i32
    return %arg0, %c0_i32 : i32, i32
  }
  func.func @transform_4(%arg0: i32) -> (i32, i32) {
    %c0_i32 = arith.constant 0 : i32
    %c0_i32_0 = arith.constant 0 : i32
    return %arg0, %c0_i32 : i32, i32
  }
}

module attributes {stable_mosaic.version = 11 : i64} {
  func.func @_tail_kernel(%arg0: i32, %arg1: memref<256x4xbf16, #tpu.memory_space<vmem>>, %arg2: memref<256x4xbf16, #tpu.memory_space<vmem>>, %arg3: memref<4x8xbf16, #tpu.memory_space<vmem>>, %arg4: memref<4x8xbf16, #tpu.memory_space<vmem>>, %arg5: memref<1x8xf32, #tpu.memory_space<vmem>>, %arg6: memref<256x8xbf16, #tpu.memory_space<vmem>>) attributes {dimension_semantics = [#tpu.dimension_semantics<parallel>], iteration_bounds = array<i64: 2>, scalar_prefetch = 0 : i64, scratch_operands = 0 : i64, tpu.core_type = #tpu.core_type<tc>, window_params = [{transform_indices = @transform_0, window_bounds = array<i64: 256, 4>}, {transform_indices = @transform_1, window_bounds = array<i64: 256, 4>}, {pipeline_mode = #tpu.pipeline_mode<synchronous>, transform_indices = @transform_2, window_bounds = array<i64: 4, 8>}, {pipeline_mode = #tpu.pipeline_mode<synchronous>, transform_indices = @transform_3, window_bounds = array<i64: 4, 8>}, {pipeline_mode = #tpu.pipeline_mode<synchronous>, transform_indices = @transform_4, window_bounds = array<i64: 1, 8>}, {transform_indices = @transform_5, window_bounds = array<i64: 256, 8>}]} {
    %c0 = arith.constant 0 : index
    %c0_0 = arith.constant 0 : index
    %0 = vector.load %arg1[%c0, %c0_0] : memref<256x4xbf16, #tpu.memory_space<vmem>>, vector<256x4xbf16>
    %c0_1 = arith.constant 0 : index
    %c0_2 = arith.constant 0 : index
    %1 = vector.load %arg3[%c0_1, %c0_2] : memref<4x8xbf16, #tpu.memory_space<vmem>>, vector<4x8xbf16>
    %cst = arith.constant dense<0.000000e+00> : vector<256x8xf32>
    %2 = tpu.matmul %0, %1, %cst {dimension_numbers = #tpu.dot_dimension_numbers<[1], [0], [0], [1], [0, 0, 1, 1], [], []>} : vector<256x4xbf16>, vector<4x8xbf16>, vector<256x8xf32> -> vector<256x8xf32>
    %c0_3 = arith.constant 0 : index
    %c0_4 = arith.constant 0 : index
    %3 = vector.load %arg2[%c0_3, %c0_4] : memref<256x4xbf16, #tpu.memory_space<vmem>>, vector<256x4xbf16>
    %c0_5 = arith.constant 0 : index
    %c0_6 = arith.constant 0 : index
    %4 = vector.load %arg4[%c0_5, %c0_6] : memref<4x8xbf16, #tpu.memory_space<vmem>>, vector<4x8xbf16>
    %cst_7 = arith.constant dense<0.000000e+00> : vector<256x8xf32>
    %5 = tpu.matmul %3, %4, %cst_7 {dimension_numbers = #tpu.dot_dimension_numbers<[1], [0], [0], [1], [0, 0, 1, 1], [], []>} : vector<256x4xbf16>, vector<4x8xbf16>, vector<256x8xf32> -> vector<256x8xf32>
    %6 = arith.addf %2, %5 : vector<256x8xf32>
    %c0_8 = arith.constant 0 : index
    %c0_9 = arith.constant 0 : index
    %7 = vector.load %arg5[%c0_8, %c0_9] : memref<1x8xf32, #tpu.memory_space<vmem>>, vector<1x8xf32>
    %8 = vector.broadcast %7 : vector<1x8xf32> to vector<256x8xf32>
    %9 = arith.addf %6, %8 : vector<256x8xf32>
    %10 = arith.negf %9 : vector<256x8xf32>
    %11 = math.exp %10 : vector<256x8xf32>
    %cst_10 = arith.constant 1.000000e+00 : f32
    %12 = vector.broadcast %cst_10 : f32 to vector<256x8xf32>
    %13 = arith.addf %12, %11 : vector<256x8xf32>
    %14 = arith.divf %12, %13 : vector<256x8xf32>
    %15 = arith.mulf %9, %14 : vector<256x8xf32>
    %16 = arith.truncf %15 : vector<256x8xf32> to vector<256x8xbf16>
    %c0_11 = arith.constant 0 : index
    %c0_12 = arith.constant 0 : index
    %17 = vector.load %arg6[%c0_11, %c0_12] : memref<256x8xbf16, #tpu.memory_space<vmem>>, vector<256x8xbf16>
    tpu.vector_store %arg6[%c0_11, %c0_12], %16 {strides = array<i32>} : memref<256x8xbf16, #tpu.memory_space<vmem>>, vector<256x8xbf16>,
    return
  }
  func.func @transform_0(%arg0: i32) -> (i32, i32) {
    %c0_i32 = arith.constant 0 : i32
    %c0_i32_0 = arith.constant 0 : i32
    return %arg0, %c0_i32 : i32, i32
  }
  func.func @transform_1(%arg0: i32) -> (i32, i32) {
    %c0_i32 = arith.constant 0 : i32
    %c0_i32_0 = arith.constant 0 : i32
    return %arg0, %c0_i32 : i32, i32
  }
  func.func @transform_2(%arg0: i32) -> (i32, i32) {
    %c0_i32 = arith.constant 0 : i32
    %c0_i32_0 = arith.constant 0 : i32
    %c0_i32_1 = arith.constant 0 : i32
    return %c0_i32, %c0_i32_0 : i32, i32
  }
  func.func @transform_3(%arg0: i32) -> (i32, i32) {
    %c0_i32 = arith.constant 0 : i32
    %c0_i32_0 = arith.constant 0 : i32
    %c0_i32_1 = arith.constant 0 : i32
    return %c0_i32, %c0_i32_0 : i32, i32
  }
  func.func @transform_4(%arg0: i32) -> (i32, i32) {
    %c0_i32 = arith.constant 0 : i32
    %c0_i32_0 = arith.constant 0 : i32
    %c0_i32_1 = arith.constant 0 : i32
    return %c0_i32, %c0_i32_0 : i32, i32
  }
  func.func @transform_5(%arg0: i32) -> (i32, i32) {
    %c0_i32 = arith.constant 0 : i32
    %c0_i32_0 = arith.constant 0 : i32
    return %arg0, %c0_i32 : i32, i32
  }
}

module attributes {stable_mosaic.version = 11 : i64} {
  func.func @_bottleneck_kernel(%arg0: i32, %arg1: i32, %arg2: memref<1x16x16x4xbf16, #tpu.memory_space<vmem>>, %arg3: memref<4x4xbf16, #tpu.memory_space<vmem>>, %arg4: memref<1x4xf32, #tpu.memory_space<vmem>>, %arg5: memref<3x12x4xbf16, #tpu.memory_space<vmem>>, %arg6: memref<1x4xf32, #tpu.memory_space<vmem>>, %arg7: memref<1x8x16x4xbf16, #tpu.memory_space<vmem>>) attributes {dimension_semantics = [#tpu.dimension_semantics<parallel>, #tpu.dimension_semantics<parallel>], iteration_bounds = array<i64: 2, 2>, scalar_prefetch = 0 : i64, scratch_operands = 0 : i64, tpu.core_type = #tpu.core_type<tc>, window_params = [{transform_indices = @transform_0, window_bounds = array<i64: 1, 16, 16, 4>}, {pipeline_mode = #tpu.pipeline_mode<synchronous>, transform_indices = @transform_1, window_bounds = array<i64: 4, 4>}, {pipeline_mode = #tpu.pipeline_mode<synchronous>, transform_indices = @transform_2, window_bounds = array<i64: 1, 4>}, {pipeline_mode = #tpu.pipeline_mode<synchronous>, transform_indices = @transform_3, window_bounds = array<i64: 3, 12, 4>}, {pipeline_mode = #tpu.pipeline_mode<synchronous>, transform_indices = @transform_4, window_bounds = array<i64: 1, 4>}, {transform_indices = @transform_5, window_bounds = array<i64: 1, 8, 16, 4>}]} {
    %c8_i32 = arith.constant 8 : i32
    %0 = arith.muli %arg1, %c8_i32 : i32
    %c1_i32 = arith.constant 1 : i32
    %1 = arith.subi %0, %c1_i32 : i32
    %c0_i32 = arith.constant 0 : i32
    %2 = arith.maxsi %1, %c0_i32 : i32
    %c0 = arith.constant 0 : index
    %3 = arith.index_cast %2 : i32 to index
    %c0_0 = arith.constant 0 : index
    %c0_1 = arith.constant 0 : index
    %4 = vector.load %arg2[%c0, %3, %c0_0, %c0_1] : memref<1x16x16x4xbf16, #tpu.memory_space<vmem>>, vector<1x1x16x4xbf16>
    %5 = vector.shape_cast %4 : vector<1x1x16x4xbf16> to vector<1x16x4xbf16>
    %c0_2 = arith.constant 0 : index
    %6 = arith.index_cast %0 : i32 to index
    %c0_3 = arith.constant 0 : index
    %c0_4 = arith.constant 0 : index
    %7 = vector.load %arg2[%c0_2, %6, %c0_3, %c0_4] : memref<1x16x16x4xbf16, #tpu.memory_space<vmem>>, vector<1x8x16x4xbf16>
    %8 = vector.shape_cast %7 : vector<1x8x16x4xbf16> to vector<8x16x4xbf16>
    %c8_i32_5 = arith.constant 8 : i32
    %9 = arith.addi %0, %c8_i32_5 : i32
    %c15_i32 = arith.constant 15 : i32
    %10 = arith.minsi %9, %c15_i32 : i32
    %c0_6 = arith.constant 0 : index
    %11 = arith.index_cast %10 : i32 to index
    %c0_7 = arith.constant 0 : index
    %c0_8 = arith.constant 0 : index
    %12 = vector.load %arg2[%c0_6, %11, %c0_7, %c0_8] : memref<1x16x16x4xbf16, #tpu.memory_space<vmem>>, vector<1x1x16x4xbf16>
    %13 = vector.shape_cast %12 : vector<1x1x16x4xbf16> to vector<1x16x4xbf16>
    %14 = tpu.concatenate %5, %8, %13 in 0 : vector<1x16x4xbf16>, vector<8x16x4xbf16>, vector<1x16x4xbf16> -> vector<10x16x4xbf16>
    %15 = vector.shape_cast %14 : vector<10x16x4xbf16> to vector<160x4xbf16>
    %c0_9 = arith.constant 0 : index
    %c0_10 = arith.constant 0 : index
    %16 = vector.load %arg3[%c0_9, %c0_10] : memref<4x4xbf16, #tpu.memory_space<vmem>>, vector<4x4xbf16>
    %cst = arith.constant dense<0.000000e+00> : vector<160x4xf32>
    %17 = tpu.matmul %15, %16, %cst {dimension_numbers = #tpu.dot_dimension_numbers<[1], [0], [0], [1], [0, 0, 1, 1], [], []>} : vector<160x4xbf16>, vector<4x4xbf16>, vector<160x4xf32> -> vector<160x4xf32>
    %c0_11 = arith.constant 0 : index
    %c0_12 = arith.constant 0 : index
    %18 = vector.load %arg4[%c0_11, %c0_12] : memref<1x4xf32, #tpu.memory_space<vmem>>, vector<1x4xf32>
    %19 = vector.broadcast %18 : vector<1x4xf32> to vector<160x4xf32>
    %20 = arith.addf %17, %19 : vector<160x4xf32>
    %21 = arith.negf %20 : vector<160x4xf32>
    %22 = math.exp %21 : vector<160x4xf32>
    %cst_13 = arith.constant 1.000000e+00 : f32
    %23 = vector.broadcast %cst_13 : f32 to vector<160x4xf32>
    %24 = arith.addf %23, %22 : vector<160x4xf32>
    %25 = arith.divf %23, %24 : vector<160x4xf32>
    %26 = arith.mulf %20, %25 : vector<160x4xf32>
    %27 = vector.shape_cast %26 : vector<160x4xf32> to vector<10x16x4xf32>
    %28 = tpu.iota {dimensions = array<i32: 0>} : vector<10x1x1xi32>
    %c0_i32_14 = arith.constant 0 : i32
    %29 = vector.broadcast %c0_i32_14 : i32 to vector<10x1x1xi32>
    %30 = arith.cmpi ne, %28, %29 : vector<10x1x1xi32>
    %c0_i32_15 = arith.constant 0 : i32
    %31 = arith.cmpi sgt, %0, %c0_i32_15 : i32
    %32 = vector.broadcast %31 : i1 to vector<10x1x1xi1>
    %33 = arith.ori %30, %32 : vector<10x1x1xi1>
    %c9_i32 = arith.constant 9 : i32
    %34 = vector.broadcast %c9_i32 : i32 to vector<10x1x1xi32>
    %35 = arith.cmpi ne, %28, %34 : vector<10x1x1xi32>
    %c8_i32_16 = arith.constant 8 : i32
    %36 = arith.addi %0, %c8_i32_16 : i32
    %c16_i32 = arith.constant 16 : i32
    %37 = arith.cmpi slt, %36, %c16_i32 : i32
    %38 = vector.broadcast %37 : i1 to vector<10x1x1xi1>
    %39 = arith.ori %35, %38 : vector<10x1x1xi1>
    %40 = arith.andi %33, %39 : vector<10x1x1xi1>
    %cst_17 = arith.constant 0.000000e+00 : f32
    %41 = vector.shape_cast %40 : vector<10x1x1xi1> to vector<10x1x1xi1>
    %42 = vector.broadcast %41 : vector<10x1x1xi1> to vector<10x16x4xi1>
    %43 = vector.broadcast %cst_17 : f32 to vector<10x16x4xf32>
    %44 = arith.select %42, %27, %43 : vector<10x16x4xi1>, vector<10x16x4xf32>
    %cst_18 = arith.constant 0.000000e+00 : f32
    %45 = vector.broadcast %cst_18 : f32 to vector<10x1x4xf32>
    %46 = vector.extract_strided_slice %44 {offsets = [0, 0, 0], sizes = [10, 15, 4], strides = [1, 1, 1]} : vector<10x16x4xf32> to vector<10x15x4xf32>
    %47 = tpu.concatenate %45, %46 in 1 : vector<10x1x4xf32>, vector<10x15x4xf32> -> vector<10x16x4xf32>
    %48 = vector.extract_strided_slice %44 {offsets = [0, 1, 0], sizes = [10, 15, 4], strides = [1, 1, 1]} : vector<10x16x4xf32> to vector<10x15x4xf32>
    %49 = tpu.concatenate %48, %45 in 1 : vector<10x15x4xf32>, vector<10x1x4xf32> -> vector<10x16x4xf32>
    %50 = tpu.concatenate %47, %44, %49 in 2 : vector<10x16x4xf32>, vector<10x16x4xf32>, vector<10x16x4xf32> -> vector<10x16x12xf32>
    %51 = arith.truncf %50 : vector<10x16x12xf32> to vector<10x16x12xbf16>
    %52 = vector.extract_strided_slice %51 {offsets = [0, 0, 0], sizes = [8, 16, 12], strides = [1, 1, 1]} : vector<10x16x12xbf16> to vector<8x16x12xbf16>
    %53 = vector.shape_cast %52 : vector<8x16x12xbf16> to vector<128x12xbf16>
    %c0_19 = arith.constant 0 : index
    %c0_20 = arith.constant 0 : index
    %c0_21 = arith.constant 0 : index
    %54 = vector.load %arg5[%c0_19, %c0_20, %c0_21] : memref<3x12x4xbf16, #tpu.memory_space<vmem>>, vector<1x12x4xbf16>
    %55 = vector.shape_cast %54 : vector<1x12x4xbf16> to vector<12x4xbf16>
    %cst_22 = arith.constant dense<0.000000e+00> : vector<128x4xf32>
    %56 = tpu.matmul %53, %55, %cst_22 {dimension_numbers = #tpu.dot_dimension_numbers<[1], [0], [0], [1], [0, 0, 1, 1], [], []>} : vector<128x12xbf16>, vector<12x4xbf16>, vector<128x4xf32> -> vector<128x4xf32>
    %57 = vector.extract_strided_slice %51 {offsets = [1, 0, 0], sizes = [8, 16, 12], strides = [1, 1, 1]} : vector<10x16x12xbf16> to vector<8x16x12xbf16>
    %58 = vector.shape_cast %57 : vector<8x16x12xbf16> to vector<128x12xbf16>
    %c1 = arith.constant 1 : index
    %c0_23 = arith.constant 0 : index
    %c0_24 = arith.constant 0 : index
    %59 = vector.load %arg5[%c1, %c0_23, %c0_24] : memref<3x12x4xbf16, #tpu.memory_space<vmem>>, vector<1x12x4xbf16>
    %60 = vector.shape_cast %59 : vector<1x12x4xbf16> to vector<12x4xbf16>
    %cst_25 = arith.constant dense<0.000000e+00> : vector<128x4xf32>
    %61 = tpu.matmul %58, %60, %cst_25 {dimension_numbers = #tpu.dot_dimension_numbers<[1], [0], [0], [1], [0, 0, 1, 1], [], []>} : vector<128x12xbf16>, vector<12x4xbf16>, vector<128x4xf32> -> vector<128x4xf32>
    %62 = arith.addf %56, %61 : vector<128x4xf32>
    %63 = vector.extract_strided_slice %51 {offsets = [2, 0, 0], sizes = [8, 16, 12], strides = [1, 1, 1]} : vector<10x16x12xbf16> to vector<8x16x12xbf16>
    %64 = vector.shape_cast %63 : vector<8x16x12xbf16> to vector<128x12xbf16>
    %c2 = arith.constant 2 : index
    %c0_26 = arith.constant 0 : index
    %c0_27 = arith.constant 0 : index
    %65 = vector.load %arg5[%c2, %c0_26, %c0_27] : memref<3x12x4xbf16, #tpu.memory_space<vmem>>, vector<1x12x4xbf16>
    %66 = vector.shape_cast %65 : vector<1x12x4xbf16> to vector<12x4xbf16>
    %cst_28 = arith.constant dense<0.000000e+00> : vector<128x4xf32>
    %67 = tpu.matmul %64, %66, %cst_28 {dimension_numbers = #tpu.dot_dimension_numbers<[1], [0], [0], [1], [0, 0, 1, 1], [], []>} : vector<128x12xbf16>, vector<12x4xbf16>, vector<128x4xf32> -> vector<128x4xf32>
    %68 = arith.addf %62, %67 : vector<128x4xf32>
    %c0_29 = arith.constant 0 : index
    %c0_30 = arith.constant 0 : index
    %69 = vector.load %arg6[%c0_29, %c0_30] : memref<1x4xf32, #tpu.memory_space<vmem>>, vector<1x4xf32>
    %70 = vector.broadcast %69 : vector<1x4xf32> to vector<128x4xf32>
    %71 = arith.addf %68, %70 : vector<128x4xf32>
    %72 = arith.negf %71 : vector<128x4xf32>
    %73 = math.exp %72 : vector<128x4xf32>
    %cst_31 = arith.constant 1.000000e+00 : f32
    %74 = vector.broadcast %cst_31 : f32 to vector<128x4xf32>
    %75 = arith.addf %74, %73 : vector<128x4xf32>
    %76 = arith.divf %74, %75 : vector<128x4xf32>
    %77 = arith.mulf %71, %76 : vector<128x4xf32>
    %78 = vector.shape_cast %8 : vector<8x16x4xbf16> to vector<128x4xbf16>
    %79 = arith.extf %78 : vector<128x4xbf16> to vector<128x4xf32>
    %80 = arith.addf %77, %79 : vector<128x4xf32>
    %81 = vector.shape_cast %80 : vector<128x4xf32> to vector<8x16x4xf32>
    %82 = arith.truncf %81 : vector<8x16x4xf32> to vector<8x16x4xbf16>
    %c0_32 = arith.constant 0 : index
    %c0_33 = arith.constant 0 : index
    %c0_34 = arith.constant 0 : index
    %c0_35 = arith.constant 0 : index
    %83 = vector.load %arg7[%c0_32, %c0_33, %c0_34, %c0_35] : memref<1x8x16x4xbf16, #tpu.memory_space<vmem>>, vector<1x8x16x4xbf16>
    %84 = vector.shape_cast %83 : vector<1x8x16x4xbf16> to vector<8x16x4xbf16>
    %85 = vector.shape_cast %82 : vector<8x16x4xbf16> to vector<1x8x16x4xbf16>
    tpu.vector_store %arg7[%c0_32, %c0_33, %c0_34, %c0_35], %85 {strides = array<i32>} : memref<1x8x16x4xbf16, #tpu.memory_space<vmem>>, vector<1x8x16x4xbf16>,
    return
  }
  func.func @transform_0(%arg0: i32, %arg1: i32) -> (i32, i32, i32, i32) {
    %c0_i32 = arith.constant 0 : i32
    %c0_i32_0 = arith.constant 0 : i32
    %c0_i32_1 = arith.constant 0 : i32
    %c0_i32_2 = arith.constant 0 : i32
    return %arg0, %c0_i32, %c0_i32_0, %c0_i32_1 : i32, i32, i32, i32
  }
  func.func @transform_1(%arg0: i32, %arg1: i32) -> (i32, i32) {
    %c0_i32 = arith.constant 0 : i32
    %c0_i32_0 = arith.constant 0 : i32
    %c0_i32_1 = arith.constant 0 : i32
    return %c0_i32, %c0_i32_0 : i32, i32
  }
  func.func @transform_2(%arg0: i32, %arg1: i32) -> (i32, i32) {
    %c0_i32 = arith.constant 0 : i32
    %c0_i32_0 = arith.constant 0 : i32
    %c0_i32_1 = arith.constant 0 : i32
    return %c0_i32, %c0_i32_0 : i32, i32
  }
  func.func @transform_3(%arg0: i32, %arg1: i32) -> (i32, i32, i32) {
    %c0_i32 = arith.constant 0 : i32
    %c0_i32_0 = arith.constant 0 : i32
    %c0_i32_1 = arith.constant 0 : i32
    %c0_i32_2 = arith.constant 0 : i32
    return %c0_i32, %c0_i32_0, %c0_i32_1 : i32, i32, i32
  }
  func.func @transform_4(%arg0: i32, %arg1: i32) -> (i32, i32) {
    %c0_i32 = arith.constant 0 : i32
    %c0_i32_0 = arith.constant 0 : i32
    %c0_i32_1 = arith.constant 0 : i32
    return %c0_i32, %c0_i32_0 : i32, i32
  }
  func.func @transform_5(%arg0: i32, %arg1: i32) -> (i32, i32, i32, i32) {
    %c0_i32 = arith.constant 0 : i32
    %c0_i32_0 = arith.constant 0 : i32
    %c0_i32_1 = arith.constant 0 : i32
    return %arg0, %arg1, %c0_i32, %c0_i32_0 : i32, i32, i32, i32
  }
}

</mosaic_0001>

<bundles_post_ra>
// kernel: c3_forward.5
= control target key start
LH: loop header
LB: loop body
LE: loop exit
PB: predicated region body
PF: predicated region fallthrough
CT: control target
= control target key end

     0   :  { %s1983_s18 = smov 0   ;;  %s2734_s0 = inlined_call_operand.vmem [shape: bf16[512,4], index: 0, kind: input, shape index: {}]   ;;  %s2735_s1 = inlined_call_operand.vmem [shape: bf16[512,4], index: 1, kind: input, shape index: {}]   ;;  %s2736_s2 = inlined_call_operand.vmem [shape: bf16[4,8], index: 2, kind: input, shape index: {}]   ;;  %s2737_s3 = inlined_call_operand.vmem [shape: bf16[4,8], index: 3, kind: input, shape index: {}]   ;;  %s2738_s4 = inlined_call_operand.vmem [shape: f32[1,8], index: 4, kind: input, shape index: {}]   ;;  %s2739_s5 = inlined_call_operand.vmem [shape: bf16[512,8], index: 5, kind: output, shape index: {}]  }
   0x1 LB: > { %s1568_s19 = sadd.s32 4294967295, %s1951_s18   ;;  %p1572_p0 = scmp.ge.s32.totalorder %s1951_s18, 1  ;;  %s1951_s18 = sphi %s1983_s18, %s15_s18  }
   0x2   : > { %p199_p1 = scmp.lt.s32.totalorder %s1951_s18, 3 }
   0x4   : > { %p200_p2 = pnand %p1572_p0, %p199_p1 }
   0x5   : > { %s1573_s24 = sshll.u32 (!%p200_p2), %s1568_s19, 5 }
   0x6   : > { %203 = sbr.rel (%p200_p2) target bundleno = 329 (0x149), region = 40  ;;  %p233_p3 = scmp.lt.s32.totalorder (!%p200_p2), %s1573_s24, 63 }
   0xb   : > { %v316_v0 = vld [vmem:[%s2737_s3] sm:$0x3]  ;;  %vm446_vm0 = vcmask 1041408   ;;  %s2789_s24 = smov (!%p233_p3, %s1573_s24), 63  ;;  %vm397_vm1 = vcmask 31744   ;;  %vm1467_vm2 = vcmask 60416  }
   0xc   : > { %v283_v1 = vld [vmem:[%s2736_s2] sm:$0x3]  ;;  %v448_v2 = vsel %vm446_vm0, %v316_v0, 0  ;;  %s1997_s25 = sshll.u32 %s2789_s24, 2 }
   0xd   : > { %v668_v3 = vsel %vm446_vm0, %v283_v1, 0  ;;  %457 = vmatpush.bf16.msra.mxu0 %v448_v2  ;;  %1805 = vmatpush.bf16.msra.mxu2 %v448_v2  ;;  %s2003_s28 = scalar_lea.vmem %s2735_s1, %s1997_s25  ;;  %s2009_s6 = scalar_lea.vmem %s2734_s0, %s1997_s25  ;;  %v2078_v37 = vld [vmem:[%s2738_s4] ss:$0 sm:$0xff] }
   0xe   : > { %677 = vmatpush.bf16.msra.mxu1 %v668_v3  ;;  %1806 = vmatpush.bf16.msra.mxu3 %v668_v3  ;;  %v1789_v4 = vld [vmem:[%s2003_s28] sm:$0xff]  ;;  %v1790_v8 = vld [vmem:[%s2003_s28 + $0x8] sm:$0xff]  ;;  %v1791_v12 = vld [vmem:[%s2003_s28 + $0x10] sm:$0xff]  ;;  %s2142_s11 = scalar_lea.vmem %s2739_s5, %s1997_s25 }
   0xf   : > { %v1797_v5 = vld [vmem:[%s2003_s28 + $0x40] sm:$0xff]  ;;  %v1798_v9 = vld [vmem:[%s2003_s28 + $0x48] sm:$0xff]  ;;  %v1799_v13 = vld [vmem:[%s2003_s28 + $0x50] sm:$0xff] }
  0x10   : > { %v1773_v6 = vld [vmem:[%s2009_s6] sm:$0xff]  ;;  %1643 = vmatmul.msk.bf16.vlgmr.msra.gmra.mxu0 %vm397_vm1, %v1789_v4  ;;  %1651 = vmatmul.msk.bf16.vlgmr.msra.gmra.mxu2 %vm397_vm1, %v1797_v5  ;;  %v1774_v10 = vld [vmem:[%s2009_s6 + $0x8] sm:$0xff]  ;;  %v1775_v14 = vld [vmem:[%s2009_s6 + $0x10] sm:$0xff] }
  0x11   : > { %v1781_v7 = vld [vmem:[%s2009_s6 + $0x40] sm:$0xff]  ;;  %1723 = vmatmul.msk.bf16.vlgmr.msra.gmra.mxu1 %vm397_vm1, %v1773_v6  ;;  %v1782_v11 = vld [vmem:[%s2009_s6 + $0x48] sm:$0xff]  ;;  %v1783_v15 = vld [vmem:[%s2009_s6 + $0x50] sm:$0xff] }
  0x12   : > { %1731 = vmatmul.msk.bf16.vlgmr.msra.gmra.mxu3 %vm397_vm1, %v1781_v7  ;;  %v1792_v16 = vld [vmem:[%s2003_s28 + $0x18] sm:$0xff]  ;;  %v1793_v20 = vld [vmem:[%s2003_s28 + $0x20] sm:$0xff]  ;;  %v1794_v24 = vld [vmem:[%s2003_s28 + $0x28] sm:$0xff] }
  0x13   : > { %v1800_v17 = vld [vmem:[%s2003_s28 + $0x58] sm:$0xff]  ;;  %v1801_v21 = vld [vmem:[%s2003_s28 + $0x60] sm:$0xff]  ;;  %v1802_v25 = vld [vmem:[%s2003_s28 + $0x68] sm:$0xff] }
  0x14   : > { %v1776_v18 = vld [vmem:[%s2009_s6 + $0x18] sm:$0xff]  ;;  %v1777_v22 = vld [vmem:[%s2009_s6 + $0x20] sm:$0xff]  ;;  %v1778_v26 = vld [vmem:[%s2009_s6 + $0x28] sm:$0xff] }
  0x15   : > { %v1784_v19 = vld [vmem:[%s2009_s6 + $0x58] sm:$0xff]  ;;  %v1785_v23 = vld [vmem:[%s2009_s6 + $0x60] sm:$0xff]  ;;  %v1786_v27 = vld [vmem:[%s2009_s6 + $0x68] sm:$0xff] }
  0x16   : > { %v1795_v28 = vld [vmem:[%s2003_s28 + $0x30] sm:$0xff]  ;;  %v1796_v32 = vld [vmem:[%s2003_s28 + $0x38] sm:$0xff] }
  0x17   : > { %v1803_v29 = vld [vmem:[%s2003_s28 + $0x70] sm:$0xff]  ;;  %v1804_v33 = vld [vmem:[%s2003_s28 + $0x78] sm:$0xff] }
  0x18   : > { %v1779_v30 = vld [vmem:[%s2009_s6 + $0x30] sm:$0xff]  ;;  %v1780_v34 = vld [vmem:[%s2009_s6 + $0x38] sm:$0xff] }
  0x19   : > { %v1787_v31 = vld [vmem:[%s2009_s6 + $0x70] sm:$0xff]  ;;  %v1788_v35 = vld [vmem:[%s2009_s6 + $0x78] sm:$0xff] }
  0x20   : > { %1644 = vmatmul.msk.bf16.gmra.mxu0 %vm397_vm1, %v1790_v8  ;;  %1652 = vmatmul.msk.bf16.gmra.mxu2 %vm397_vm1, %v1798_v9 }
  0x21   : > { %1724 = vmatmul.msk.bf16.gmra.mxu1 %vm397_vm1, %v1774_v10 }
  0x22   : > { %1732 = vmatmul.msk.bf16.gmra.mxu3 %vm397_vm1, %v1782_v11 }
  0x30   : > { %1645 = vmatmul.msk.bf16.gmra.mxu0 %vm397_vm1, %v1791_v12  ;;  %1653 = vmatmul.msk.bf16.gmra.mxu2 %vm397_vm1, %v1799_v13 }
  0x31   : > { %1725 = vmatmul.msk.bf16.gmra.mxu1 %vm397_vm1, %v1775_v14 }
  0x32   : > { %1733 = vmatmul.msk.bf16.gmra.mxu3 %vm397_vm1, %v1783_v15 }
  0x40   : > { %1646 = vmatmul.msk.bf16.gmra.mxu0 %vm397_vm1, %v1792_v16  ;;  %1654 = vmatmul.msk.bf16.gmra.mxu2 %vm397_vm1, %v1800_v17 }
  0x41   : > { %1726 = vmatmul.msk.bf16.gmra.mxu1 %vm397_vm1, %v1776_v18 }
  0x42   : > { %1734 = vmatmul.msk.bf16.gmra.mxu3 %vm397_vm1, %v1784_v19 }
  0x50   : > { %1647 = vmatmul.msk.bf16.gmra.mxu0 %vm397_vm1, %v1793_v20  ;;  %1655 = vmatmul.msk.bf16.gmra.mxu2 %vm397_vm1, %v1801_v21 }
  0x51   : > { %1727 = vmatmul.msk.bf16.gmra.mxu1 %vm397_vm1, %v1777_v22 }
  0x52   : > { %1735 = vmatmul.msk.bf16.gmra.mxu3 %vm397_vm1, %v1785_v23 }
  0x60   : > { %1648 = vmatmul.msk.bf16.gmra.mxu0 %vm397_vm1, %v1794_v24  ;;  %1656 = vmatmul.msk.bf16.gmra.mxu2 %vm397_vm1, %v1802_v25 }
  0x61   : > { %1728 = vmatmul.msk.bf16.gmra.mxu1 %vm397_vm1, %v1778_v26 }
  0x62   : > { %1736 = vmatmul.msk.bf16.gmra.mxu3 %vm397_vm1, %v1786_v27 }
  0x70   : > { %1649 = vmatmul.msk.bf16.gmra.mxu0 %vm397_vm1, %v1795_v28  ;;  %1657 = vmatmul.msk.bf16.gmra.mxu2 %vm397_vm1, %v1803_v29 }
  0x71   : > { %1729 = vmatmul.msk.bf16.gmra.mxu1 %vm397_vm1, %v1779_v30 }
  0x72   : > { %1737 = vmatmul.msk.bf16.gmra.mxu3 %vm397_vm1, %v1787_v31 }
  0x80   : > { %1650 = vmatmul.msk.bf16.gmra.mxu0 %vm397_vm1, %v1796_v32  ;;  %1658 = vmatmul.msk.bf16.gmra.mxu2 %vm397_vm1, %v1804_v33 }
  0x81   : > { %1730 = vmatmul.msk.bf16.gmra.mxu1 %vm397_vm1, %v1780_v34 }
  0x82   : > { %1738 = vmatmul.msk.bf16.gmra.mxu3 %vm397_vm1, %v1788_v35 }
  0x8d   : > { %v459_v36 = vpop.f32.mrf.mxu0 }
  0x8e   : > { %v679_v38 = vpop.f32.mrf.mxu1 }
  0x8f   : > { %v680_v39 = vadd.f32 %v679_v38, %v459_v36 }
  0x91   : > { %v2081_v40 = vadd.f32 %v2078_v37, %v680_v39 }
  0x93   : > { %v1739_v41 = vmul.f32 -1.442695, %v2081_v40  ;;  %v499_v42 = vpop.f32.mrf.mxu2 }
  0x95   : > { %v719_v43 = vpop.f32.mrf.mxu3  ;;  %1816 = vpow2.f32 %v1739_v41  ;;  %v461_v45 = vpop.f32.mrf.mxu0 }
  0x96   : > { %v720_v44 = vadd.f32 %v719_v43, %v499_v42  ;;  %v681_v46 = vpop.f32.mrf.mxu1 }
  0x97   : > { %v682_v48 = vadd.f32 %v681_v46, %v461_v45 }
  0x98   : > { %v2085_v47 = vadd.f32 %v2078_v37, %v720_v44 }
  0x99   : > { %v2089_v50 = vadd.f32 %v2078_v37, %v682_v48 }
  0x9a   : > { %v1755_v49 = vmul.f32 -1.442695, %v2085_v47 }
  0x9b   : > { %v1817_v51 = vpop.eup %1816  ;;  %v1740_v52 = vmul.f32 -1.442695, %v2089_v50  ;;  %v501_v53 = vpop.f32.mrf.mxu2 }
  0x9c   : > { %1818 = vpow2.f32 %v1755_v49  ;;  %v891_v54 = vadd.f32 1.0, %v1817_v51 }
  0x9d   : > { %v721_v55 = vpop.f32.mrf.mxu3  ;;  %1820 = vpow2.f32 %v1740_v52  ;;  %v464_v57 = vpop.f32.mrf.mxu0 }
  0x9e   : > { %v722_v56 = vadd.f32 %v721_v55, %v501_v53  ;;  %1822 = vrcp.f32 %v891_v54  ;;  %v684_v58 = vpop.f32.mrf.mxu1  ;;  %v932_v7 = vand.u32 2147483647, %v891_v54  ;;  %v934_v10 = vand.u32 2147483648, %v891_v54 }
  0x9f   : > { %v685_v60 = vadd.f32 %v684_v58, %v464_v57  ;;  %vm928_vm3 = vweird.f32 %v891_v54 }
  0xa0   : > { %v2093_v59 = vadd.f32 %v2078_v37, %v722_v56  ;;  %vm2110_vm5 = vcmp.eq.f32.partialorder %v932_v7, 8.507059e+37  ;;  %v935_v21 = vor.u32 1.1754944e-38, %v934_v10 }
  0xa1   : > { %v2097_v63 = vadd.f32 %v2078_v37, %v685_v60 }
  0xa2   : > { %v1819_v61 = vpop.eup %1818  ;;  %v1756_v62 = vmul.f32 -1.442695, %v2093_v59 }
  0xa3   : > { %v2099_v0 = vadd.f32 1.0, %v1819_v61  ;;  %v1821_v1 = vpop.eup %1820  ;;  %v1741_v2 = vmul.f32 -1.442695, %v2097_v63  ;;  %v504_v3 = vpop.f32.mrf.mxu2 }
  0xa4   : > { %1824 = vpow2.f32 %v1756_v62  ;;  %v1823_v4 = vpop.eup %1822  ;;  %v2103_v8 = vadd.f32 1.0, %v1821_v1 }
  0xa5   : > { %1826 = vrcp.f32 %v2099_v0  ;;  %v724_v5 = vpop.f32.mrf.mxu3  ;;  %v924_v6 = vmul.f32 %v1823_v4, %v891_v54  ;;  %v466_v9 = vpop.f32.mrf.mxu0  ;;  %v1172_v14 = vand.u32 2147483647, %v2099_v0  ;;  %vm929_vm4 = vweird.f32 %v1823_v4 }
  0xa6   : > { %1828 = vpow2.f32 %v1741_v2  ;;  %v725_v11 = vadd.f32 %v724_v5, %v504_v3  ;;  %v686_v12 = vpop.f32.mrf.mxu1  ;;  %v1174_v22 = vand.u32 2147483648, %v2099_v0  ;;  %vm1168_vm6 = vweird.f32 %v2099_v0  ;;  %vm930_vm8 = vmor %vm928_vm3, %vm929_vm4 }
  0xa7   : > { %v925_v13 = vsub.f32 1.0, %v924_v6  ;;  %1830 = vrcp.f32 %v2103_v8  ;;  %v687_v16 = vadd.f32 %v686_v12, %v466_v9  ;;  %vm2120_vm7 = vcmp.eq.f32.partialorder %v1172_v14, 8.507059e+37 }
  0xa8   : > { %v2108_v15 = vadd.f32 %v2078_v37, %v725_v11  ;;  %v947_v30 = vand.u32 2147483647, %v2103_v8  ;;  %v949_v31 = vand.u32 2147483648, %v2103_v8  ;;  %v1175_v42 = vor.u32 1.1754944e-38, %v1174_v22 }
  0xa9   : > { %v926_v18 = vmul.f32 %v1823_v4, %v925_v13  ;;  %v2128_v32 = vadd.f32 %v2078_v37, %v687_v16  ;;  %vm943_vm10 = vweird.f32 %v2103_v8 }
  0xaa   : > { %v1825_v17 = vpop.eup %1824  ;;  %v1757_v24 = vmul.f32 -1.442695, %v2108_v15  ;;  %vm2145_vm11 = vcmp.eq.f32.partialorder %v947_v30, 8.507059e+37  ;;  %v950_v52 = vor.u32 1.1754944e-38, %v949_v31 }
  0xab   : > { %v1827_v20 = vpop.eup %1826  ;;  %v2115_v23 = vadd.f32 1.0, %v1825_v17  ;;  %v927_v26 = vadd.f32 %v1823_v4, %v926_v18  ;;  %v506_v29 = vpop.f32.mrf.mxu2  ;;  %v1742_v54 = vmul.f32 -1.442695, %v2128_v32 }
  0xac   : > { %v1829_v25 = vpop.eup %1828  ;;  %v1164_v27 = vmul.f32 %v1827_v20, %v2099_v0  ;;  %vm1169_vm9 = vweird.f32 %v1827_v20 }
  0xad   : > { %1832 = vrcp.f32 %v2115_v23  ;;  %v726_v33 = vpop.f32.mrf.mxu3  ;;  %v1831_v34 = vpop.eup %1830  ;;  %v931_v35 = vsel %vm930_vm8, %v1823_v4, %v927_v26  ;;  %v2130_v38 = vadd.f32 1.0, %v1829_v25  ;;  %v1187_v48 = vand.u32 2147483647, %v2115_v23  ;;  %vm1170_vm13 = vmor %vm1168_vm6, %vm1169_vm9 }
  0xae   : > { %v1165_v36 = vsub.f32 1.0, %v1164_v27  ;;  %1834 = vpow2.f32 %v1757_v24  ;;  %v469_v39 = vpop.f32.mrf.mxu0  ;;  %v936_v41 = vsel %vm2110_vm5, %v935_v21, %v931_v35  ;;  %v939_v43 = vmul.f32 %v1831_v34, %v2103_v8  ;;  %v689_v44 = vpop.f32.mrf.mxu1 }
  0xaf   : > { %v1403_v45 = vmul.f32 %v936_v41, %v2081_v40  ;;  %1836 = vrcp.f32 %v2130_v38  ;;  %vm1183_vm12 = vweird.f32 %v2115_v23  ;;  %v727_v55 = vadd.f32 %v726_v33, %v506_v29 }
  0xb0   : > { %v1166_v46 = vmul.f32 %v1827_v20, %v1165_v36  ;;  %v940_v49 = vsub.f32 1.0, %v939_v43  ;;  %vm944_vm14 = vweird.f32 %v1831_v34  ;;  %v1189_v58 = vand.u32 2147483648, %v2115_v23 }
  0xb1   : > { %v1435_v40 = vpack.c.bf16 %v1403_v45, %v1403_v45  ;;  %v690_v60 = vadd.f32 %v689_v44, %v469_v39  ;;  %vm2158_vm15 = vcmp.eq.f32.partialorder %v1187_v48, 8.507059e+37  ;;  %1838 = vpow2.f32 %v1742_v54  ;;  %vm945_vm0 = vmor %vm943_vm10, %vm944_vm14 }
  0xb2   : > { %v1167_v53 = vadd.f32 %v1827_v20, %v1166_v46  ;;  %v941_v57 = vmul.f32 %v1831_v34, %v940_v49  ;;  %v2167_v6 = vadd.f32 %v2078_v37, %v727_v55  ;;  %v1190_v17 = vor.u32 1.1754944e-38, %v1189_v58 }
  0xb3   : > { %v1833_v56 = vpop.eup %1832  ;;  %1468 = vst.msk [vmem:[%s2142_s11] sm:$0xf] %vm1467_vm2, %v1435_v40  ;;  %v509_v3 = vpop.f32.mrf.mxu2  ;;  %v2174_v12 = vadd.f32 %v2078_v37, %v690_v60  ;;  %vm958_vm3 = vweird.f32 %v2130_v38  ;;  %v964_v24 = vand.u32 2147483648, %v2130_v38  ;;  %v962_v31 = vand.u32 2147483647, %v2130_v38 }
  0xb4   : > { %v1835_v61 = vpop.eup %1834  ;;  %v1171_v62 = vsel %vm1170_vm13, %v1827_v20, %v1167_v53  ;;  %v1179_v1 = vmul.f32 %v1833_v56, %v2115_v23  ;;  %v942_v4 = vadd.f32 %v1831_v34, %v941_v57  ;;  %vm1184_vm1 = vweird.f32 %v1833_v56 }
  0xb5   : > { %v1176_v0 = vsel %vm2120_vm7, %v1175_v42, %v1171_v62  ;;  %v2164_v5 = vadd.f32 1.0, %v1835_v61  ;;  %v729_v7 = vpop.f32.mrf.mxu3  ;;  %v1837_v9 = vpop.eup %1836  ;;  %v1758_v27 = vmul.f32 -1.442695, %v2167_v6  ;;  %v1743_v28 = vmul.f32 -1.442695, %v2174_v12  ;;  %vm1185_vm4 = vmor %vm1183_vm12, %vm1184_vm1 }
  0xb6   : > { %v1419_v10 = vmul.f32 %v1176_v0, %v2085_v47  ;;  %v1180_v11 = vsub.f32 1.0, %v1179_v1  ;;  %v730_v13 = vadd.f32 %v729_v7, %v509_v3  ;;  %v471_v14 = vpop.f32.mrf.mxu0  ;;  %v946_v16 = vsel %vm945_vm0, %v1831_v34, %v942_v4  ;;  %v691_v19 = vpop.f32.mrf.mxu1 }
  0xb7   : > { %v954_v18 = vmul.f32 %v1837_v9, %v2130_v38  ;;  %1840 = vrcp.f32 %v2164_v5  ;;  %v951_v47 = vsel %vm2145_vm11, %v950_v52, %v946_v16  ;;  %v1839_v25 = vpop.eup %1838  ;;  %vm959_vm5 = vweird.f32 %v1837_v9 }
  0xb8   : > { %v1451_v20 = vpack.c.bf16 %v1419_v10, %v1419_v10  ;;  %v1181_v8 = vmul.f32 %v1833_v56, %v1180_v11  ;;  %v1404_v21 = vmul.f32 %v951_v47, %v2089_v50  ;;  %v2188_v29 = vadd.f32 %v2078_v37, %v730_v13  ;;  %vm960_vm6 = vmor %vm958_vm3, %vm959_vm5 }
  0xb9   : > { %v955_v22 = vsub.f32 1.0, %v954_v18  ;;  %v2193_v34 = vadd.f32 1.0, %v1839_v25  ;;  %1842 = vpow2.f32 %v1758_v27  ;;  %v692_v23 = vadd.f32 %v691_v19, %v471_v14 }
  0xba   : > { %1484 = vst.msk [vmem:[%s2142_s11 + $0x40] sm:$0xf] %vm1467_vm2, %v1451_v20  ;;  %v1182_v26 = vadd.f32 %v1833_v56, %v1181_v8  ;;  %v1436_v30 = vpack.c.bf16 %v1404_v21, %v1404_v21  ;;  %v1759_v35 = vmul.f32 -1.442695, %v2188_v29  ;;  %1844 = vpow2.f32 %v1743_v28 }
  0xbb   : > { %v956_v50 = vmul.f32 %v1837_v9, %v955_v22  ;;  %v511_v36 = vpop.f32.mrf.mxu2  ;;  %v965_v45 = vor.u32 1.1754944e-38, %v964_v24  ;;  %1846 = vrcp.f32 %v2193_v34  ;;  %vm963_vm7 = vcmp.eq.f32.partialorder %v962_v31, 8.507059e+37 }
  0xbc   : > { %v1186_v33 = vsel %vm1185_vm4, %v1833_v56, %v1182_v26  ;;  %1469 = vst.msk [vmem:[%s2142_s11 + $0x4] sm:$0xf] %vm1467_vm2, %v1436_v30  ;;  %v1202_v49 = vand.u32 2147483647, %v2164_v5  ;;  %v1204_v51 = vand.u32 2147483648, %v2164_v5  ;;  %1848 = vpow2.f32 %v1759_v35 }
  0xbd   : > { %v1841_v39 = vpop.eup %1840  ;;  %v1191_v41 = vsel %vm2158_vm15, %v1190_v17, %v1186_v33  ;;  %v957_v42 = vadd.f32 %v1837_v9, %v956_v50  ;;  %v731_v43 = vpop.f32.mrf.mxu3  ;;  %v2210_v55 = vadd.f32 %v2078_v37, %v692_v23  ;;  %vm1198_vm8 = vweird.f32 %v2164_v5 }
  0xbe   : > { %v1420_v44 = vmul.f32 %v1191_v41, %v2093_v59  ;;  %v1194_v46 = vmul.f32 %v1841_v39, %v2164_v5  ;;  %v474_v52 = vpop.f32.mrf.mxu0  ;;  %v694_v40 = vpop.f32.mrf.mxu1  ;;  %vm1199_vm9 = vweird.f32 %v1841_v39  ;;  %v732_v58 = vadd.f32 %v731_v43, %v511_v36 }
  0xbf   : > { %v961_v48 = vsel %vm960_vm6, %v1837_v9, %v957_v42  ;;  %v1843_v56 = vpop.eup %1842  ;;  %v977_v62 = vand.u32 2147483647, %v2193_v34  ;;  %v695_v2 = vadd.f32 %v694_v40, %v474_v52  ;;  %vm2218_vm10 = vcmp.eq.f32.partialorder %v1202_v49, 8.507059e+37  ;;  %vm1200_vm11 = vmor %vm1198_vm8, %vm1199_vm9 }
  0xc0   : > { %v1452_v53 = vpack.c.bf16 %v1420_v44, %v1420_v44  ;;  %v966_v59 = vsel %vm963_vm7, %v965_v45, %v961_v48  ;;  %v1195_v54 = vsub.f32 1.0, %v1194_v46  ;;  %v1845_v60 = vpop.eup %1844  ;;  %v2216_v1 = vadd.f32 1.0, %v1843_v56 }
  0xc1   : > { %v1405_v38 = vmul.f32 %v966_v59, %v2097_v63  ;;  %v1847_v63 = vpop.eup %1846  ;;  %v1205_v4 = vor.u32 1.1754944e-38, %v1204_v51  ;;  %v2222_v7 = vadd.f32 1.0, %v1845_v60  ;;  %vm973_vm12 = vweird.f32 %v2193_v34 }
  0xc2   : > { %1485 = vst.msk [vmem:[%s2142_s11 + $0x44] sm:$0xf] %vm1467_vm2, %v1452_v53  ;;  %v1196_v57 = vmul.f32 %v1841_v39, %v1195_v54  ;;  %v969_v10 = vmul.f32 %v1847_v63, %v2193_v34  ;;  %1850 = vrcp.f32 %v2216_v1  ;;  %v1744_v11 = vmul.f32 -1.442695, %v2210_v55  ;;  %v1849_v14 = vpop.eup %1848 }
  0xc3   : > { %v1437_v61 = vpack.c.bf16 %v1405_v38, %v1405_v38  ;;  %v514_v9 = vpop.f32.mrf.mxu2  ;;  %v979_v17 = vand.u32 2147483648, %v2193_v34  ;;  %1852 = vrcp.f32 %v2222_v7  ;;  %v2235_v18 = vadd.f32 %v2078_v37, %v732_v58 }
  0xc4   : > { %v1197_v3 = vadd.f32 %v1841_v39, %v1196_v57  ;;  %v970_v19 = vsub.f32 1.0, %v969_v10  ;;  %vm2239_vm13 = vcmp.eq.f32.partialorder %v977_v62, 8.507059e+37  ;;  %v2244_v47 = vadd.f32 %v2078_v37, %v695_v2 }
  0xc5   : > { %1470 = vst.msk [vmem:[%s2142_s11 + $0x8] sm:$0xf] %vm1467_vm2, %v1437_v61  ;;  %v734_v13 = vpop.f32.mrf.mxu3  ;;  %vm974_vm14 = vweird.f32 %v1847_v63  ;;  %v1217_v21 = vand.u32 2147483647, %v2216_v1  ;;  %v1219_v22 = vand.u32 2147483648, %v2216_v1  ;;  %v2250_v26 = vadd.f32 1.0, %v1849_v14 }
  0xc6   : > { %v1201_v16 = vsel %vm1200_vm11, %v1841_v39, %v1197_v3  ;;  %v971_v24 = vmul.f32 %v1847_v63, %v970_v19  ;;  %v992_v25 = vand.u32 2147483647, %v2222_v7  ;;  %1854 = vpow2.f32 %v1744_v11  ;;  %v476_v27 = vpop.f32.mrf.mxu0  ;;  %v696_v28 = vpop.f32.mrf.mxu1  ;;  %vm975_vm0 = vmor %vm973_vm12, %vm974_vm14 }
  0xc7   : > { %v1206_v5 = vsel %vm2218_vm10, %v1205_v4, %v1201_v16  ;;  %v980_v50 = vor.u32 1.1754944e-38, %v979_v17  ;;  %v994_v31 = vand.u32 2147483648, %v2222_v7  ;;  %vm1213_vm15 = vweird.f32 %v2216_v1 }
  0xc8   : > { %v1421_v8 = vmul.f32 %v1206_v5, %v2108_v15  ;;  %v1760_v15 = vmul.f32 -1.442695, %v2235_v18  ;;  %v1851_v33 = vpop.eup %1850  ;;  %v972_v35 = vadd.f32 %v1847_v63, %v971_v24  ;;  %1856 = vrcp.f32 %v2250_v26 }
  0xc9   : > { %v1745_v36 = vmul.f32 -1.442695, %v2244_v47  ;;  %v1853_v39 = vpop.eup %1852  ;;  %v1209_v41 = vmul.f32 %v1851_v33, %v2216_v1  ;;  %vm2263_vm1 = vcmp.eq.f32.partialorder %v1217_v21, 8.507059e+37  ;;  %vm988_vm3 = vweird.f32 %v2222_v7 }
  0xca   : > { %v1453_v30 = vpack.c.bf16 %v1421_v8, %v1421_v8  ;;  %1858 = vpow2.f32 %v1760_v15  ;;  %v976_v43 = vsel %vm975_vm0, %v1847_v63, %v972_v35  ;;  %v1220_v44 = vor.u32 1.1754944e-38, %v1219_v22 }
  0xcb   : > { %v516_v23 = vpop.f32.mrf.mxu2  ;;  %v984_v45 = vmul.f32 %v1853_v39, %v2222_v7  ;;  %vm2269_vm4 = vcmp.eq.f32.partialorder %v992_v25, 8.507059e+37  ;;  %v981_v48 = vsel %vm2239_vm13, %v980_v50, %v976_v43  ;;  %v1210_v49 = vsub.f32 1.0, %v1209_v41 }
  0xcc   : > { %1486 = vst.msk [vmem:[%s2142_s11 + $0x48] sm:$0xf] %vm1467_vm2, %v1453_v30  ;;  %v995_v51 = vor.u32 1.1754944e-38, %v994_v31  ;;  %v1232_v52 = vand.u32 2147483647, %v2250_v26  ;;  %v1855_v40 = vpop.eup %1854  ;;  %v1406_v53 = vmul.f32 %v981_v48, %v2128_v32  ;;  %1860 = vpow2.f32 %v1745_v36 }
  0xcd   : > { %v736_v34 = vpop.f32.mrf.mxu3  ;;  %v985_v59 = vsub.f32 1.0, %v984_v45  ;;  %v735_v54 = vadd.f32 %v734_v13, %v514_v9  ;;  %v1211_v38 = vmul.f32 %v1851_v33, %v1210_v49  ;;  %vm1214_vm5 = vweird.f32 %v1851_v33 }
  0xce   : > { %vm1228_vm6 = vweird.f32 %v2250_v26  ;;  %v2278_v56 = vadd.f32 1.0, %v1855_v40  ;;  %v1857_v57 = vpop.eup %1856  ;;  %v1438_v58 = vpack.c.bf16 %v1406_v53, %v1406_v53  ;;  %vm989_vm7 = vweird.f32 %v1853_v39  ;;  %vm1215_vm8 = vmor %vm1213_vm15, %vm1214_vm5  ;;  %v479_v10 = vpop.f32.mrf.mxu0 }
  0xcf   : > { %v986_v60 = vmul.f32 %v1853_v39, %v985_v59  ;;  %v2281_v61 = vadd.f32 %v2078_v37, %v735_v54  ;;  %v1212_v2 = vadd.f32 %v1851_v33, %v1211_v38  ;;  %v1224_v32 = vmul.f32 %v1857_v57, %v2250_v26  ;;  %v699_v11 = vpop.f32.mrf.mxu1  ;;  %vm990_vm10 = vmor %vm988_vm3, %vm989_vm7 }
  0xd0   : > { %v1859_v62 = vpop.eup %1858  ;;  %v1234_v63 = vand.u32 2147483648, %v2250_v26  ;;  %1862 = vrcp.f32 %v2278_v56  ;;  %1471 = vst.msk [vmem:[%s2142_s11 + $0xc] sm:$0xf] %vm1467_vm2, %v1438_v58  ;;  %vm2290_vm9 = vcmp.eq.f32.partialorder %v1232_v52, 8.507059e+37  ;;  %v697_v4 = vadd.f32 %v696_v28, %v476_v27 }
  0xd1   : > { %v987_v3 = vadd.f32 %v1853_v39, %v986_v60  ;;  %v737_v9 = vadd.f32 %v736_v34, %v516_v23  ;;  %v1216_v13 = vsel %vm1215_vm8, %v1851_v33, %v1212_v2  ;;  %v1225_v14 = vsub.f32 1.0, %v1224_v32 }
  0xd2   : > { %v2297_v16 = vadd.f32 1.0, %v1859_v62  ;;  %v1761_v1 = vmul.f32 -1.442695, %v2281_v61  ;;  %v1861_v17 = vpop.eup %1860  ;;  %v1221_v5 = vsel %vm2263_vm1, %v1220_v44, %v1216_v13  ;;  %vm1229_vm11 = vweird.f32 %v1857_v57 }
  0xd3   : > { %v991_v19 = vsel %vm990_vm10, %v1853_v39, %v987_v3  ;;  %v1007_v20 = vand.u32 2147483647, %v2278_v56  ;;  %v1422_v8 = vmul.f32 %v1221_v5, %v2167_v6  ;;  %v1226_v7 = vmul.f32 %v1857_v57, %v1225_v14  ;;  %v519_v22 = vpop.f32.mrf.mxu2  ;;  %vm1230_vm12 = vmor %vm1228_vm6, %vm1229_vm11 }
  0xd4   : > { %v996_v21 = vsel %vm2269_vm4, %v995_v51, %v991_v19  ;;  %1864 = vrcp.f32 %v2297_v16  ;;  %v1009_v27 = vand.u32 2147483648, %v2278_v56  ;;  %v2310_v28 = vadd.f32 %v2078_v37, %v697_v4 }
  0xd5   : > { %v739_v24 = vpop.f32.mrf.mxu3  ;;  %v1407_v25 = vmul.f32 %v996_v21, %v2174_v12  ;;  %v700_v30 = vadd.f32 %v699_v11, %v479_v10  ;;  %v1454_v6 = vpack.c.bf16 %v1422_v8, %v1422_v8  ;;  %v1227_v31 = vadd.f32 %v1857_v57, %v1226_v7 }
  0xd6   : > { %v1863_v50 = vpop.eup %1862  ;;  %v2312_v15 = vadd.f32 1.0, %v1861_v17  ;;  %1866 = vpow2.f32 %v1761_v1  ;;  %v1235_v35 = vor.u32 1.1754944e-38, %v1234_v63  ;;  %vm1003_vm13 = vweird.f32 %v2278_v56  ;;  %v481_v52 = vpop.f32.mrf.mxu0 }
  0xd7   : > { %v1439_v33 = vpack.c.bf16 %v1407_v25, %v1407_v25  ;;  %v999_v12 = vmul.f32 %v1863_v50, %v2278_v56  ;;  %1487 = vst.msk [vmem:[%s2142_s11 + $0x4c] sm:$0xf] %vm1467_vm2, %v1454_v6  ;;  %v1231_v36 = vsel %vm1230_vm12, %v1857_v57, %v1227_v31  ;;  %vm2321_vm14 = vcmp.eq.f32.partialorder %v1007_v20, 8.507059e+37  ;;  %v701_v40 = vpop.f32.mrf.mxu1 }
  0xd8   : > { %v1247_v41 = vand.u32 2147483647, %v2297_v16  ;;  %1868 = vrcp.f32 %v2312_v15  ;;  %v1236_v26 = vsel %vm2290_vm9, %v1235_v35, %v1231_v36  ;;  %v1010_v23 = vor.u32 1.1754944e-38, %v1009_v27 }
  0xd9   : > { %1472 = vst.msk [vmem:[%s2142_s11 + $0x10] sm:$0xf] %vm1467_vm2, %v1439_v33  ;;  %v1000_v42 = vsub.f32 1.0, %v999_v12  ;;  %v1249_v43 = vand.u32 2147483648, %v2297_v16  ;;  %v1423_v45 = vmul.f32 %v1236_v26, %v2188_v29  ;;  %v1746_v46 = vmul.f32 -1.442695, %v2310_v28 }
  0xda   : > { %v1865_v44 = vpop.eup %1864  ;;  %v2335_v34 = vadd.f32 %v2078_v37, %v737_v9  ;;  %v2338_v48 = vadd.f32 %v2078_v37, %v700_v30  ;;  %vm1004_vm15 = vweird.f32 %v1863_v50  ;;  %vm1243_vm0 = vweird.f32 %v2297_v16 }
  0xdb   : > { %v1001_v49 = vmul.f32 %v1863_v50, %v1000_v42  ;;  %v1239_v51 = vmul.f32 %v1865_v44, %v2297_v16  ;;  %v1455_v59 = vpack.c.bf16 %v1423_v45, %v1423_v45  ;;  %vm2342_vm1 = vcmp.eq.f32.partialorder %v1247_v41, 8.507059e+37  ;;  %vm1005_vm3 = vmor %vm1003_vm13, %vm1004_vm15  ;;  %v521_v3 = vpop.f32.mrf.mxu2 }
  0xdc   : > { %v1867_v53 = vpop.eup %1866  ;;  %1870 = vpow2.f32 %v1746_v46  ;;  %v1762_v54 = vmul.f32 -1.442695, %v2335_v34  ;;  %v1250_v58 = vor.u32 1.1754944e-38, %v1249_v43  ;;  %v1747_v2 = vmul.f32 -1.442695, %v2338_v48 }
  0xdd   : > { %v1002_v38 = vadd.f32 %v1863_v50, %v1001_v49  ;;  %v1240_v57 = vsub.f32 1.0, %v1239_v51  ;;  %v2347_v60 = vadd.f32 1.0, %v1867_v53  ;;  %1488 = vst.msk [vmem:[%s2142_s11 + $0x50] sm:$0xf] %vm1467_vm2, %v1455_v59  ;;  %v740_v32 = vadd.f32 %v739_v24, %v519_v22  ;;  %v741_v0 = vpop.f32.mrf.mxu3 }
  0xde   : > { %v1869_v62 = vpop.eup %1868  ;;  %1872 = vpow2.f32 %v1762_v54  ;;  %v702_v63 = vadd.f32 %v701_v40, %v481_v52  ;;  %vm1244_vm4 = vweird.f32 %v1865_v44  ;;  %vm1018_vm5 = vweird.f32 %v2312_v15  ;;  %v484_v39 = vpop.f32.mrf.mxu0 }
  0xdf   : > { %v1006_v4 = vsel %vm1005_vm3, %v1863_v50, %v1002_v38  ;;  %v1241_v9 = vmul.f32 %v1865_v44, %v1240_v57  ;;  %v1014_v10 = vmul.f32 %v1869_v62, %v2312_v15  ;;  %v1022_v56 = vand.u32 2147483647, %v2312_v15  ;;  %vm1245_vm6 = vmor %vm1243_vm0, %vm1244_vm4  ;;  %v704_v41 = vpop.f32.mrf.mxu1 }
  0xe0   : > { %v1011_v11 = vsel %vm2321_vm14, %v1010_v23, %v1006_v4  ;;  %1874 = vrcp.f32 %v2347_v60  ;;  %v1024_v17 = vand.u32 2147483648, %v2312_v15  ;;  %v2366_v19 = vadd.f32 %v2078_v37, %v740_v32 }
  0xe1   : > { %v1408_v13 = vmul.f32 %v1011_v11, %v2210_v55  ;;  %v1242_v14 = vadd.f32 %v1865_v44, %v1241_v9  ;;  %v1015_v1 = vsub.f32 1.0, %v1014_v10  ;;  %1876 = vpow2.f32 %v1747_v2 }
  0xe2   : > { %v1871_v5 = vpop.eup %1870  ;;  %v2369_v20 = vadd.f32 %v2078_v37, %v702_v63  ;;  %v742_v8 = vadd.f32 %v741_v0, %v521_v3  ;;  %vm1019_vm7 = vweird.f32 %v1869_v62  ;;  %vm1023_vm8 = vcmp.eq.f32.partialorder %v1022_v56, 8.507059e+37 }
  0xe3   : > { %v1440_v21 = vpack.c.bf16 %v1408_v13, %v1408_v13  ;;  %v1246_v7 = vsel %vm1245_vm6, %v1865_v44, %v1242_v14  ;;  %v1016_v55 = vmul.f32 %v1869_v62, %v1015_v1  ;;  %v2373_v25 = vadd.f32 1.0, %v1871_v5  ;;  %vm1020_vm9 = vmor %vm1018_vm5, %vm1019_vm7  ;;  %v524_v43 = vpop.f32.mrf.mxu2 }
  0xe4   : > { %v1873_v22 = vpop.eup %1872  ;;  %v1251_v24 = vsel %vm2342_vm1, %v1250_v58, %v1246_v7  ;;  %v1025_v6 = vor.u32 1.1754944e-38, %v1024_v17  ;;  %v1763_v31 = vmul.f32 -1.442695, %v2366_v19  ;;  %v1748_v33 = vmul.f32 -1.442695, %v2369_v20 }
  0xe5   : > { %1473 = vst.msk [vmem:[%s2142_s11 + $0x14] sm:$0xf] %vm1467_vm2, %v1440_v21  ;;  %v1424_v16 = vmul.f32 %v1251_v24, %v2235_v18  ;;  %v1017_v27 = vadd.f32 %v1869_v62, %v1016_v55  ;;  %v2378_v30 = vadd.f32 1.0, %v1873_v22  ;;  %1878 = vrcp.f32 %v2373_v25  ;;  %v744_v44 = vpop.f32.mrf.mxu3 }
  0xe6   : > { %v1875_v50 = vpop.eup %1874  ;;  %v2387_v36 = vadd.f32 %v2078_v37, %v742_v8  ;;  %v1262_v42 = vand.u32 2147483647, %v2347_v60  ;;  %v1264_v23 = vand.u32 2147483648, %v2347_v60  ;;  %v1037_v49 = vand.u32 2147483647, %v2373_v25  ;;  %v486_v21 = vpop.f32.mrf.mxu0 }
  0xe7   : > { %v1456_v35 = vpack.c.bf16 %v1424_v16, %v1424_v16  ;;  %v1021_v12 = vsel %vm1020_vm9, %v1869_v62, %v1017_v27  ;;  %v1254_v18 = vmul.f32 %v1875_v50, %v2347_v60  ;;  %v1877_v26 = vpop.eup %1876  ;;  %1880 = vrcp.f32 %v2378_v30  ;;  %v706_v7 = vpop.f32.mrf.mxu1 }
  0xe8   : > { %v1026_v15 = vsel %vm1023_vm8, %v1025_v6, %v1021_v12  ;;  %v1039_v51 = vand.u32 2147483648, %v2373_v25  ;;  %vm1259_vm10 = vweird.f32 %v1875_v50  ;;  %v1277_v52 = vand.u32 2147483647, %v2378_v30 }
  0xe9   : > { %1489 = vst.msk [vmem:[%s2142_s11 + $0x54] sm:$0xf] %vm1467_vm2, %v1456_v35  ;;  %v1409_v45 = vmul.f32 %v1026_v15, %v2244_v47  ;;  %v1255_v46 = vsub.f32 1.0, %v1254_v18  ;;  %v2398_v40 = vadd.f32 1.0, %v1877_v26  ;;  %1882 = vpow2.f32 %v1763_v31 }
  0xea   : > { %1884 = vpow2.f32 %v1748_v33  ;;  %v1764_v29 = vmul.f32 -1.442695, %v2387_v36  ;;  %vm1258_vm11 = vweird.f32 %v2347_v60  ;;  %vm2402_vm12 = vcmp.eq.f32.partialorder %v1262_v42, 8.507059e+37 }
  0xeb   : > { %v1441_v53 = vpack.c.bf16 %v1409_v45, %v1409_v45  ;;  %v1256_v59 = vmul.f32 %v1875_v50, %v1255_v46  ;;  %v1879_v54 = vpop.eup %1878  ;;  %v1265_v38 = vor.u32 1.1754944e-38, %v1264_v23  ;;  %1886 = vrcp.f32 %v2398_v40  ;;  %vm1260_vm15 = vmor %vm1258_vm11, %vm1259_vm10  ;;  %v526_v27 = vpop.f32.mrf.mxu2 }
  0xec   : > { %v1029_v58 = vmul.f32 %v1879_v54, %v2373_v25  ;;  %vm1033_vm13 = vweird.f32 %v2373_v25  ;;  %vm2411_vm14 = vcmp.eq.f32.partialorder %v1037_v49, 8.507059e+37  ;;  %v1040_v60 = vor.u32 1.1754944e-38, %v1039_v51 }
  0xed   : > { %1474 = vst.msk [vmem:[%s2142_s11 + $0x18] sm:$0xf] %vm1467_vm2, %v1441_v53  ;;  %v1257_v57 = vadd.f32 %v1875_v50, %v1256_v59  ;;  %v1881_v2 = vpop.eup %1880  ;;  %vm1273_vm0 = vweird.f32 %v2378_v30  ;;  %v1279_v32 = vand.u32 2147483648, %v2378_v30  ;;  %v705_v63 = vadd.f32 %v704_v41, %v484_v39 }
  0xee   : > { %v1030_v0 = vsub.f32 1.0, %v1029_v58  ;;  %v1269_v4 = vmul.f32 %v1881_v2, %v2378_v30  ;;  %vm2419_vm1 = vcmp.eq.f32.partialorder %v1277_v52, 8.507059e+37  ;;  %1888 = vpow2.f32 %v1764_v29  ;;  %v489_v58 = vpop.f32.mrf.mxu0 }
  0xef   : > { %v1261_v3 = vsel %vm1260_vm15, %v1875_v50, %v1257_v57  ;;  %v1883_v10 = vpop.eup %1882  ;;  %vm1034_vm3 = vweird.f32 %v1879_v54  ;;  %v2426_v56 = vadd.f32 %v2078_v37, %v705_v63  ;;  %v745_v13 = vadd.f32 %v744_v44, %v524_v43  ;;  %v746_v50 = vpop.f32.mrf.mxu3 }
  0xf0   : > { %v1266_v11 = vsel %vm2402_vm12, %v1265_v38, %v1261_v3  ;;  %v1885_v14 = vpop.eup %1884  ;;  %v1031_v17 = vmul.f32 %v1879_v54, %v1030_v0  ;;  %v1270_v5 = vsub.f32 1.0, %v1269_v4  ;;  %v2429_v8 = vadd.f32 1.0, %v1883_v10  ;;  %vm1035_vm5 = vmor %vm1033_vm13, %vm1034_vm3  ;;  %v709_v62 = vpop.f32.mrf.mxu1 }
  0xf1   : > { %v1425_v1 = vmul.f32 %v1266_v11, %v2281_v61  ;;  %v1887_v55 = vpop.eup %1886  ;;  %vm1274_vm4 = vweird.f32 %v1881_v2  ;;  %v1052_v22 = vand.u32 2147483647, %v2398_v40  ;;  %v1054_v24 = vand.u32 2147483648, %v2398_v40 }
  0xf2   : > { %v2433_v16 = vadd.f32 1.0, %v1885_v14  ;;  %v1032_v31 = vadd.f32 %v1879_v54, %v1031_v17  ;;  %v1271_v61 = vmul.f32 %v1881_v2, %v1270_v5  ;;  %v1044_v33 = vmul.f32 %v1887_v55, %v2398_v40  ;;  %vm1275_vm7 = vmor %vm1273_vm0, %vm1274_vm4 }
  0xf3   : > { %v1457_v6 = vpack.c.bf16 %v1425_v1, %v1425_v1  ;;  %v1280_v35 = vor.u32 1.1754944e-38, %v1279_v32  ;;  %vm1048_vm6 = vweird.f32 %v2398_v40  ;;  %1890 = vrcp.f32 %v2429_v8  ;;  %v529_v63 = vpop.f32.mrf.mxu2 }
  0xf4   : > { %v2442_v12 = vadd.f32 %v2078_v37, %v745_v13  ;;  %v1889_v18 = vpop.eup %1888  ;;  %v1036_v39 = vsel %vm1035_vm5, %v1879_v54, %v1032_v31  ;;  %v1272_v41 = vadd.f32 %v1881_v2, %v1271_v61  ;;  %v1045_v26 = vsub.f32 1.0, %v1044_v33  ;;  %v2507_v61 = vld [vmem:[%s2738_s4] ss:$0 sm:$0xff] }
  0xf5   : > { %1490 = vst.msk [vmem:[%s2142_s11 + $0x58] sm:$0xf] %vm1467_vm2, %v1457_v6  ;;  %v1749_v15 = vmul.f32 -1.442695, %v2426_v56  ;;  %v1041_v25 = vsel %vm2411_vm14, %v1040_v60, %v1036_v39  ;;  %vm2452_vm8 = vcmp.eq.f32.partialorder %v1052_v22, 8.507059e+37  ;;  %v1055_v23 = vor.u32 1.1754944e-38, %v1054_v24 }
  0xf6   : > { %1892 = vrcp.f32 %v2433_v16  ;;  %v1410_v43 = vmul.f32 %v1041_v25, %v2310_v28  ;;  %v1276_v44 = vsel %vm1275_vm7, %v1881_v2, %v1272_v41  ;;  %v1046_v45 = vmul.f32 %v1887_v55, %v1045_v26 }
  0xf7   : > { %vm1049_vm9 = vweird.f32 %v1887_v55  ;;  %v1281_v46 = vsel %vm2419_vm1, %v1280_v35, %v1276_v44  ;;  %v1292_v49 = vand.u32 2147483647, %v2429_v8  ;;  %v2461_v30 = vadd.f32 1.0, %v1889_v18  ;;  %v749_v3 = vpop.f32.mrf.mxu3 }
  0xf8   : > { %v1765_v51 = vmul.f32 -1.442695, %v2442_v12  ;;  %v1442_v52 = vpack.c.bf16 %v1410_v43, %v1410_v43  ;;  %v1426_v53 = vmul.f32 %v1281_v46, %v2335_v34  ;;  %v1047_v59 = vadd.f32 %v1887_v55, %v1046_v45  ;;  %vm1050_vm10 = vmor %vm1048_vm6, %vm1049_vm9  ;;  %v491_v43 = vpop.f32.mrf.mxu0  ;;  %v711_v44 = vpop.f32.mrf.mxu1 }
  0xf9   : > { %1894 = vpow2.f32 %v1749_v15  ;;  %v1891_v29 = vpop.eup %1890  ;;  %v1294_v28 = vand.u32 2147483648, %v2429_v8  ;;  %v1067_v54 = vand.u32 2147483647, %v2433_v16  ;;  %v707_v47 = vadd.f32 %v706_v7, %v486_v21 }
  0xfa   : > { %1896 = vrcp.f32 %v2461_v30  ;;  %1475 = vst.msk [vmem:[%s2142_s11 + $0x1c] sm:$0xf] %vm1467_vm2, %v1442_v52  ;;  %v1458_v38 = vpack.c.bf16 %v1426_v53, %v1426_v53  ;;  %v1051_v57 = vsel %vm1050_vm10, %v1887_v55, %v1047_v59  ;;  %v1284_v34 = vmul.f32 %v1891_v29, %v2429_v8 }
  0xfb   : > { %vm1288_vm11 = vweird.f32 %v2429_v8  ;;  %v1056_v2 = vsel %vm2452_vm8, %v1055_v23, %v1051_v57  ;;  %vm2476_vm12 = vcmp.eq.f32.partialorder %v1292_v49, 8.507059e+37  ;;  %v1069_v32 = vand.u32 2147483648, %v2433_v16  ;;  %v531_v49 = vpop.f32.mrf.mxu2 }
  0xfc   : > { %v1893_v40 = vpop.eup %1892  ;;  %1898 = vpow2.f32 %v1765_v51  ;;  %1491 = vst.msk [vmem:[%s2142_s11 + $0x5c] sm:$0xf] %vm1467_vm2, %v1458_v38  ;;  %v1411_v0 = vmul.f32 %v1056_v2, %v2338_v48  ;;  %v1285_v4 = vsub.f32 1.0, %v1284_v34  ;;  %vm1063_vm13 = vweird.f32 %v2433_v16 }
  0xfd   : > { %v1059_v9 = vmul.f32 %v1893_v40, %v2433_v16  ;;  %v1295_v10 = vor.u32 1.1754944e-38, %v1294_v28  ;;  %vm2486_vm14 = vcmp.eq.f32.partialorder %v1067_v54, 8.507059e+37  ;;  %v2491_v13 = vadd.f32 %v2078_v37, %v707_v47 }
  0xfe   : > { %v747_v14 = vadd.f32 %v746_v50, %v526_v27  ;;  %v1443_v17 = vpack.c.bf16 %v1411_v0, %v1411_v0  ;;  %v1286_v5 = vmul.f32 %v1891_v29, %v1285_v4  ;;  %vm1289_vm15 = vweird.f32 %v1891_v29 }
  0xff   : > { %v1895_v1 = vpop.eup %1894  ;;  %v1060_v48 = vsub.f32 1.0, %v1059_v9  ;;  %v1070_v7 = vor.u32 1.1754944e-38, %v1069_v32  ;;  %v1307_v55 = vand.u32 2147483647, %v2461_v30  ;;  %v1750_v24 = vmul.f32 -1.442695, %v2491_v13  ;;  %vm1290_vm1 = vmor %vm1288_vm11, %vm1289_vm15  ;;  %v751_v51 = vpop.f32.mrf.mxu3 }
 0x100   : > { %v1897_v21 = vpop.eup %1896  ;;  %v2494_v22 = vadd.f32 1.0, %v1895_v1  ;;  %1476 = vst.msk [vmem:[%s2142_s11 + $0x20] sm:$0xf] %vm1467_vm2, %v1443_v17  ;;  %v1287_v6 = vadd.f32 %v1891_v29, %v1286_v5  ;;  %vm1064_vm0 = vweird.f32 %v1893_v40  ;;  %v1309_v50 = vand.u32 2147483648, %v2461_v30 }
 0x101   : > { %v1061_v31 = vmul.f32 %v1893_v40, %v1060_v48  ;;  %v1299_v37 = vmul.f32 %v1897_v21, %v2461_v30  ;;  %v2510_v33 = vadd.f32 %v2507_v61, %v747_v14  ;;  %v710_v35 = vadd.f32 %v709_v62, %v489_v58  ;;  %vm1065_vm3 = vmor %vm1063_vm13, %vm1064_vm0  ;;  %v494_v48 = vpop.f32.mrf.mxu0 }
 0x102   : > { %v1899_v27 = vpop.eup %1898  ;;  %1900 = vrcp.f32 %v2494_v22  ;;  %v1291_v18 = vsel %vm1290_vm1, %v1891_v29, %v1287_v6  ;;  %vm1304_vm4 = vweird.f32 %v1897_v21  ;;  %v750_v15 = vadd.f32 %v749_v3, %v529_v63 }
 0x103   : > { %v1062_v39 = vadd.f32 %v1893_v40, %v1061_v31  ;;  %v1300_v41 = vsub.f32 1.0, %v1299_v37  ;;  %v2512_v26 = vadd.f32 1.0, %v1899_v27  ;;  %v1296_v8 = vsel %vm2476_vm12, %v1295_v10, %v1291_v18  ;;  %v534_v6 = vpop.f32.mrf.mxu2 }
 0x104   : > { %1902 = vpow2.f32 %v1750_v24  ;;  %v1427_v25 = vmul.f32 %v1296_v8, %v2366_v19  ;;  %vm1303_vm5 = vweird.f32 %v2461_v30  ;;  %vm2523_vm6 = vcmp.eq.f32.partialorder %v1307_v55, 8.507059e+37 }
 0x105   : > { %v1066_v42 = vsel %vm1065_vm3, %v1893_v40, %v1062_v39  ;;  %v1301_v23 = vmul.f32 %v1897_v21, %v1300_v41  ;;  %1904 = vrcp.f32 %v2512_v26  ;;  %v1310_v46 = vor.u32 1.1754944e-38, %v1309_v50  ;;  %vm1305_vm7 = vmor %vm1303_vm5, %vm1304_vm4 }
 0x106   : > { %v1071_v45 = vsel %vm2486_vm14, %v1070_v7, %v1066_v42  ;;  %v1459_v19 = vpack.c.bf16 %v1427_v25, %v1427_v25  ;;  %v1766_v59 = vmul.f32 -1.442695, %v2510_v33  ;;  %vm1078_vm8 = vweird.f32 %v2494_v22 }
 0x107   : > { %v1412_v52 = vmul.f32 %v1071_v45, %v2369_v20  ;;  %v1302_v53 = vadd.f32 %v1897_v21, %v1301_v23  ;;  %v1082_v30 = vand.u32 2147483647, %v2494_v22  ;;  %v2533_v28 = vadd.f32 %v2507_v61, %v710_v35  ;;  %v754_v31 = vpop.f32.mrf.mxu3 }
 0x108   : > { %v1901_v29 = vpop.eup %1900  ;;  %v2536_v54 = vadd.f32 %v2507_v61, %v750_v15  ;;  %1492 = vst.msk [vmem:[%s2142_s11 + $0x60] sm:$0xf] %vm1467_vm2, %v1459_v19  ;;  %v1084_v57 = vand.u32 2147483648, %v2494_v22  ;;  %1906 = vpow2.f32 %v1766_v59  ;;  %v1322_v63 = vand.u32 2147483647, %v2512_v26 }
 0x109   : > { %v1444_v20 = vpack.c.bf16 %v1412_v52, %v1412_v52  ;;  %v1306_v47 = vsel %vm1305_vm7, %v1897_v21, %v1302_v53  ;;  %v1074_v38 = vmul.f32 %v1901_v29, %v2494_v22  ;;  %v1751_v62 = vmul.f32 -1.442695, %v2533_v28  ;;  %v714_v21 = vpop.f32.mrf.mxu1 }
 0x10a   : > { %v1903_v34 = vpop.eup %1902  ;;  %v1311_v58 = vsel %vm2523_vm6, %v1310_v46, %v1306_v47  ;;  %v1767_v40 = vmul.f32 -1.442695, %v2536_v54  ;;  %vm1079_vm9 = vweird.f32 %v1901_v29  ;;  %v712_v4 = vadd.f32 %v711_v44, %v491_v43 }
 0x10b   : > { %v1905_v2 = vpop.eup %1904  ;;  %1477 = vst.msk [vmem:[%s2142_s11 + $0x24] sm:$0xf] %vm1467_vm2, %v1444_v20  ;;  %v1428_v60 = vmul.f32 %v1311_v58, %v2387_v36  ;;  %v1075_v32 = vsub.f32 1.0, %v1074_v38  ;;  %v2550_v3 = vadd.f32 1.0, %v1903_v34  ;;  %1908 = vpow2.f32 %v1751_v62  ;;  %vm1080_vm11 = vmor %vm1078_vm8, %vm1079_vm9 }
 0x10c   : > { %v1314_v0 = vmul.f32 %v1905_v2, %v2512_v26  ;;  %v752_v11 = vadd.f32 %v751_v51, %v531_v49  ;;  %v1324_v1 = vand.u32 2147483648, %v2512_v26  ;;  %vm2557_vm10 = vcmp.eq.f32.partialorder %v1082_v30, 8.507059e+37 }
 0x10d   : > { %v1460_v9 = vpack.c.bf16 %v1428_v60, %v1428_v60  ;;  %v1076_v10 = vmul.f32 %v1901_v29, %v1075_v32  ;;  %1910 = vrcp.f32 %v2550_v3  ;;  %v1085_v5 = vor.u32 1.1754944e-38, %v1084_v57 }
 0x10e   : > { %v1315_v14 = vsub.f32 1.0, %v1314_v0  ;;  %1912 = vpow2.f32 %v1767_v40  ;;  %v1907_v7 = vpop.eup %1906  ;;  %vm1318_vm12 = vweird.f32 %v2512_v26  ;;  %vm1319_vm13 = vweird.f32 %v1905_v2  ;;  %v496_v40 = vpop.f32.mrf.mxu0 }
 0x10f   : > { %1493 = vst.msk [vmem:[%s2142_s11 + $0x64] sm:$0xf] %vm1467_vm2, %v1460_v9  ;;  %v1077_v36 = vadd.f32 %v1901_v29, %v1076_v10  ;;  %v2566_v24 = vadd.f32 %v2507_v61, %v712_v4  ;;  %vm2568_vm14 = vcmp.eq.f32.partialorder %v1322_v63, 8.507059e+37  ;;  %v2572_v50 = vadd.f32 1.0, %v1907_v7  ;;  %vm1320_vm15 = vmor %vm1318_vm12, %vm1319_vm13 }
 0x110   : > { %v1316_v55 = vmul.f32 %v1905_v2, %v1315_v14  ;;  %v2575_v35 = vadd.f32 %v2507_v61, %v752_v11  ;;  %v1325_v41 = vor.u32 1.1754944e-38, %v1324_v1  ;;  %v715_v8 = vadd.f32 %v714_v21, %v494_v48  ;;  %v536_v48 = vpop.f32.mrf.mxu2  ;;  %v756_v21 = vpop.f32.mrf.mxu3 }
 0x111   : > { %v1081_v37 = vsel %vm1080_vm11, %v1901_v29, %v1077_v36  ;;  %v1909_v22 = vpop.eup %1908  ;;  %v1097_v42 = vand.u32 2147483647, %v2550_v3  ;;  %1914 = vrcp.f32 %v2572_v50  ;;  %v755_v23 = vadd.f32 %v754_v31, %v534_v6 }
 0x112   : > { %v1086_v18 = vsel %vm2557_vm10, %v1085_v5, %v1081_v37  ;;  %v1317_v39 = vadd.f32 %v1905_v2, %v1316_v55  ;;  %v1099_v16 = vand.u32 2147483648, %v2550_v3  ;;  %v1752_v46 = vmul.f32 -1.442695, %v2566_v24 }
 0x113   : > { %v1911_v15 = vpop.eup %1910  ;;  %v1413_v25 = vmul.f32 %v1086_v18, %v2426_v56  ;;  %v2590_v26 = vadd.f32 1.0, %v1909_v22  ;;  %v1768_v51 = vmul.f32 -1.442695, %v2575_v35  ;;  %v2597_v59 = vadd.f32 %v2507_v61, %v715_v8 }
 0x114   : > { %v1913_v43 = vpop.eup %1912  ;;  %v1321_v44 = vsel %vm1320_vm15, %v1905_v2, %v1317_v39  ;;  %v1089_v45 = vmul.f32 %v1911_v15, %v2550_v3  ;;  %v1337_v29 = vand.u32 2147483647, %v2572_v50  ;;  %v1339_v30 = vand.u32 2147483648, %v2572_v50  ;;  %v716_v2 = vpop.f32.mrf.mxu1 }
 0x115   : > { %v1445_v49 = vpack.c.bf16 %v1413_v25, %v1413_v25  ;;  %v1326_v56 = vsel %vm2568_vm14, %v1325_v41, %v1321_v44  ;;  %v2594_v53 = vadd.f32 1.0, %v1913_v43  ;;  %1916 = vrcp.f32 %v2590_v26 }
 0x116   : > { %v1429_v19 = vmul.f32 %v1326_v56, %v2442_v12  ;;  %v1090_v52 = vsub.f32 1.0, %v1089_v45  ;;  %v2605_v20 = vadd.f32 %v2507_v61, %v755_v23  ;;  %vm1094_vm0 = vweird.f32 %v1911_v15 }
 0x117   : > { %1478 = vst.msk [vmem:[%s2142_s11 + $0x28] sm:$0xf] %vm1467_vm2, %v1445_v49  ;;  %1918 = vrcp.f32 %v2594_v53  ;;  %v1915_v38 = vpop.eup %1914  ;;  %vm1093_vm1 = vweird.f32 %v2550_v3  ;;  %vm2609_vm3 = vcmp.eq.f32.partialorder %v1097_v42, 8.507059e+37  ;;  %v1100_v34 = vor.u32 1.1754944e-38, %v1099_v16 }
 0x118   : > { %v1461_v47 = vpack.c.bf16 %v1429_v19, %v1429_v19  ;;  %v1091_v12 = vmul.f32 %v1911_v15, %v1090_v52  ;;  %v1329_v62 = vmul.f32 %v1915_v38, %v2572_v50  ;;  %vm1333_vm4 = vweird.f32 %v2572_v50  ;;  %vm1095_vm5 = vmor %vm1093_vm1, %vm1094_vm0 }
 0x119   : > { %1920 = vpow2.f32 %v1752_v46  ;;  %vm2617_vm6 = vcmp.eq.f32.partialorder %v1337_v29, 8.507059e+37  ;;  %v1340_v32 = vor.u32 1.1754944e-38, %v1339_v30  ;;  %v1753_v63 = vmul.f32 -1.442695, %v2597_v59 }
 0x11a   : > { %1494 = vst.msk [vmem:[%s2142_s11 + $0x68] sm:$0xf] %vm1467_vm2, %v1461_v47  ;;  %v1092_v58 = vadd.f32 %v1911_v15, %v1091_v12  ;;  %1922 = vpow2.f32 %v1768_v51  ;;  %v1330_v0 = vsub.f32 1.0, %v1329_v62  ;;  %vm1108_vm7 = vweird.f32 %v2590_v26 }
 0x11b   : > { %v1769_v4 = vmul.f32 -1.442695, %v2605_v20  ;;  %v1917_v9 = vpop.eup %1916  ;;  %vm1334_vm8 = vweird.f32 %v1915_v38  ;;  %v1112_v11 = vand.u32 2147483647, %v2590_v26  ;;  %v717_v14 = vadd.f32 %v716_v2, %v496_v40 }
 0x11c   : > { %v1096_v3 = vsel %vm1095_vm5, %v1911_v15, %v1092_v58  ;;  %v1331_v17 = vmul.f32 %v1915_v38, %v1330_v0  ;;  %v1104_v5 = vmul.f32 %v1917_v9, %v2590_v26  ;;  %1924 = vpow2.f32 %v1753_v63  ;;  %vm1335_vm9 = vmor %vm1333_vm4, %vm1334_vm8 }
 0x11d   : > { %v1101_v10 = vsel %vm2609_vm3, %v1100_v34, %v1096_v3  ;;  %v1919_v1 = vpop.eup %1918  ;;  %v1114_v7 = vand.u32 2147483648, %v2590_v26  ;;  %v1352_v6 = vand.u32 2147483647, %v2594_v53  ;;  %1926 = vpow2.f32 %v1769_v4 }
 0x11e   : > { %v1414_v36 = vmul.f32 %v1101_v10, %v2491_v13  ;;  %v1344_v55 = vmul.f32 %v1919_v1, %v2594_v53  ;;  %v1332_v27 = vadd.f32 %v1915_v38, %v1331_v17  ;;  %v1105_v22 = vsub.f32 1.0, %v1104_v5 }
 0x11f   : > { %v1921_v31 = vpop.eup %1920  ;;  %v1354_v13 = vand.u32 2147483648, %v2594_v53  ;;  %v2639_v8 = vadd.f32 %v2507_v61, %v717_v14  ;;  %v757_v15 = vadd.f32 %v756_v21, %v536_v48  ;;  %vm1109_vm10 = vweird.f32 %v1917_v9 }
 0x120   : > { %v1446_v37 = vpack.c.bf16 %v1414_v36, %v1414_v36  ;;  %v1923_v18 = vpop.eup %1922  ;;  %v1345_v39 = vsub.f32 1.0, %v1344_v55  ;;  %v2636_v41 = vadd.f32 1.0, %v1921_v31  ;;  %v1336_v25 = vsel %vm1335_vm9, %v1915_v38, %v1332_v27  ;;  %vm1110_vm14 = vmor %vm1108_vm7, %vm1109_vm10 }
 0x121   : > { %v1106_v42 = vmul.f32 %v1917_v9, %v1105_v22  ;;  %v2643_v23 = vadd.f32 1.0, %v1923_v18  ;;  %v1341_v43 = vsel %vm2617_vm6, %v1340_v32, %v1336_v25  ;;  %vm1349_vm11 = vweird.f32 %v1919_v1 }
 0x122   : > { %1479 = vst.msk [vmem:[%s2142_s11 + $0x2c] sm:$0xf] %vm1467_vm2, %v1446_v37  ;;  %v1346_v44 = vmul.f32 %v1919_v1, %v1345_v39  ;;  %1928 = vrcp.f32 %v2636_v41  ;;  %v1925_v50 = vpop.eup %1924  ;;  %v1430_v45 = vmul.f32 %v1341_v43, %v2510_v33  ;;  %vm1113_vm12 = vcmp.eq.f32.partialorder %v1112_v11, 8.507059e+37 }
 0x123   : > { %v1107_v16 = vadd.f32 %v1917_v9, %v1106_v42  ;;  %vm1348_vm13 = vweird.f32 %v2594_v53  ;;  %v1927_v46 = vpop.eup %1926  ;;  %v1115_v49 = vor.u32 1.1754944e-38, %v1114_v7  ;;  %1930 = vrcp.f32 %v2643_v23 }
 0x124   : > { %v1347_v56 = vadd.f32 %v1919_v1, %v1346_v44  ;;  %v1754_v51 = vmul.f32 -1.442695, %v2639_v8  ;;  %v1462_v19 = vpack.c.bf16 %v1430_v45, %v1430_v45  ;;  %vm1350_vm15 = vmor %vm1348_vm13, %vm1349_vm11  ;;  %v1355_v33 = vor.u32 1.1754944e-38, %v1354_v13 }
 0x125   : > { %v1111_v52 = vsel %vm1110_vm14, %v1917_v9, %v1107_v16  ;;  %v2656_v29 = vadd.f32 %v2507_v61, %v757_v15  ;;  %vm1353_vm0 = vcmp.eq.f32.partialorder %v1352_v6, 8.507059e+37  ;;  %v2661_v12 = vadd.f32 1.0, %v1925_v50 }
 0x126   : > { %v1116_v30 = vsel %vm1113_vm12, %v1115_v49, %v1111_v52  ;;  %v1351_v53 = vsel %vm1350_vm15, %v1919_v1, %v1347_v56  ;;  %1495 = vst.msk [vmem:[%s2142_s11 + $0x6c] sm:$0xf] %vm1467_vm2, %v1462_v19  ;;  %v2663_v38 = vadd.f32 1.0, %v1927_v46  ;;  %1932 = vpow2.f32 %v1754_v51 }
 0x127   : > { %v1415_v26 = vmul.f32 %v1116_v30, %v2533_v28  ;;  %v1356_v47 = vsel %vm1353_vm0, %v1355_v33, %v1351_v53  ;;  %1934 = vrcp.f32 %v2661_v12  ;;  %v1770_v62 = vmul.f32 -1.442695, %v2656_v29 }
 0x128   : > { %v1929_v57 = vpop.eup %1928  ;;  %v1431_v34 = vmul.f32 %v1356_v47, %v2536_v54  ;;  %v1127_v28 = vand.u32 2147483647, %v2636_v41  ;;  %1936 = vrcp.f32 %v2663_v38  ;;  %v1129_v54 = vand.u32 2147483648, %v2636_v41 }
 0x129   : > { %v1447_v61 = vpack.c.bf16 %v1415_v26, %v1415_v26  ;;  %v1119_v58 = vmul.f32 %v1929_v57, %v2636_v41  ;;  %v1931_v40 = vpop.eup %1930  ;;  %v1367_v63 = vand.u32 2147483647, %v2643_v23  ;;  %v1369_v3 = vand.u32 2147483648, %v2643_v23 }
 0x12a   : > { %v1463_v2 = vpack.c.bf16 %v1431_v34, %v1431_v34  ;;  %v1359_v32 = vmul.f32 %v1931_v40, %v2643_v23  ;;  %vm1124_vm1 = vweird.f32 %v1929_v57  ;;  %1938 = vpow2.f32 %v1770_v62 }
 0x12b   : > { %1480 = vst.msk [vmem:[%s2142_s11 + $0x30] sm:$0xf] %vm1467_vm2, %v1447_v61  ;;  %v1120_v60 = vsub.f32 1.0, %v1119_v58  ;;  %vm1123_vm3 = vweird.f32 %v2636_v41  ;;  %vm2680_vm4 = vcmp.eq.f32.partialorder %v1127_v28, 8.507059e+37  ;;  %vm1363_vm5 = vweird.f32 %v2643_v23 }
 0x12c   : > { %1496 = vst.msk [vmem:[%s2142_s11 + $0x70] sm:$0xf] %vm1467_vm2, %v1463_v2  ;;  %v1360_v4 = vsub.f32 1.0, %v1359_v32  ;;  %v1933_v9 = vpop.eup %1932  ;;  %vm1364_vm6 = vweird.f32 %v1931_v40  ;;  %vm1125_vm7 = vmor %vm1123_vm3, %vm1124_vm1  ;;  %v1130_v17 = vor.u32 1.1754944e-38, %v1129_v54  ;;  %vm2687_vm8 = vcmp.eq.f32.partialorder %v1367_v63, 8.507059e+37 }
 0x12d   : > { %v1121_v0 = vmul.f32 %v1929_v57, %v1120_v60  ;;  %v1935_v11 = vpop.eup %1934  ;;  %v2685_v36 = vadd.f32 1.0, %v1933_v9  ;;  %v1370_v48 = vor.u32 1.1754944e-38, %v1369_v3  ;;  %vm1138_vm9 = vweird.f32 %v2661_v12  ;;  %vm1365_vm10 = vmor %vm1363_vm5, %vm1364_vm6 }
 0x12e   : > { %v1361_v1 = vmul.f32 %v1931_v40, %v1360_v4  ;;  %v1134_v21 = vmul.f32 %v1935_v11, %v2661_v12  ;;  %v1937_v7 = vpop.eup %1936  ;;  %v1142_v27 = vand.u32 2147483647, %v2661_v12  ;;  %vm1139_vm11 = vweird.f32 %v1935_v11 }
 0x12f   : > { %v1122_v14 = vadd.f32 %v1929_v57, %v1121_v0  ;;  %1940 = vrcp.f32 %v2685_v36  ;;  %v1374_v22 = vmul.f32 %v1937_v7, %v2663_v38  ;;  %v1144_v41 = vand.u32 2147483648, %v2661_v12  ;;  %vm1140_vm13 = vmor %vm1138_vm9, %vm1139_vm11 }
 0x130   : > { %v1362_v6 = vadd.f32 %v1931_v40, %v1361_v1  ;;  %v1135_v37 = vsub.f32 1.0, %v1134_v21  ;;  %v1939_v13 = vpop.eup %1938  ;;  %v1382_v50 = vand.u32 2147483647, %v2663_v38  ;;  %v1384_v45 = vand.u32 2147483648, %v2663_v38 }
 0x131   : > { %v1126_v55 = vsel %vm1125_vm7, %v1929_v57, %v1122_v14  ;;  %v1375_v42 = vsub.f32 1.0, %v1374_v22  ;;  %v922_v23 = vadd.f32 1.0, %v1939_v13  ;;  %vm1379_vm12 = vweird.f32 %v1937_v7 }
 0x132   : > { %v1131_v31 = vsel %vm2680_vm4, %v1130_v17, %v1126_v55  ;;  %v1366_v39 = vsel %vm1365_vm10, %v1931_v40, %v1362_v6  ;;  %v1136_v25 = vmul.f32 %v1935_v11, %v1135_v37  ;;  %vm1143_vm14 = vcmp.eq.f32.partialorder %v1142_v27, 8.507059e+37 }
 0x133   : > { %v1416_v18 = vmul.f32 %v1131_v31, %v2566_v24  ;;  %v1371_v15 = vsel %vm2687_vm8, %v1370_v48, %v1366_v39  ;;  %v1376_v16 = vmul.f32 %v1937_v7, %v1375_v42  ;;  %1942 = vrcp.f32 %v922_v23 }
 0x134   : > { %v1432_v44 = vmul.f32 %v1371_v15, %v2575_v35  ;;  %v1137_v24 = vadd.f32 %v1935_v11, %v1136_v25  ;;  %v1145_v56 = vor.u32 1.1754944e-38, %v1144_v41  ;;  %vm1378_vm15 = vweird.f32 %v2663_v38 }
 0x135   : > { %v1448_v43 = vpack.c.bf16 %v1416_v18, %v1416_v18  ;;  %v1941_v46 = vpop.eup %1940  ;;  %v1377_v51 = vadd.f32 %v1937_v7, %v1376_v16  ;;  %vm1380_vm0 = vmor %vm1378_vm15, %vm1379_vm12  ;;  %v1385_v33 = vor.u32 1.1754944e-38, %v1384_v45  ;;  %vm1383_vm1 = vcmp.eq.f32.partialorder %v1382_v50, 8.507059e+37 }
 0x136   : > { %v1464_v49 = vpack.c.bf16 %v1432_v44, %v1432_v44  ;;  %v1141_v35 = vsel %vm1140_vm13, %v1935_v11, %v1137_v24  ;;  %v1149_v19 = vmul.f32 %v1941_v46, %v2685_v36  ;;  %v1157_v12 = vand.u32 2147483647, %v2685_v36 }
 0x137   : > { %1481 = vst.msk [vmem:[%s2142_s11 + $0x34] sm:$0xf] %vm1467_vm2, %v1448_v43  ;;  %v1146_v52 = vsel %vm1143_vm14, %v1145_v56, %v1141_v35  ;;  %v1381_v53 = vsel %vm1380_vm0, %v1937_v7, %v1377_v51  ;;  %v1159_v57 = vand.u32 2147483648, %v2685_v36  ;;  %vm1154_vm3 = vweird.f32 %v1941_v46 }
 0x138   : > { %1497 = vst.msk [vmem:[%s2142_s11 + $0x74] sm:$0xf] %vm1467_vm2, %v1464_v49  ;;  %v1417_v30 = vmul.f32 %v1146_v52, %v2597_v59  ;;  %v1150_v26 = vsub.f32 1.0, %v1149_v19  ;;  %v1386_v47 = vsel %vm1383_vm1, %v1385_v33, %v1381_v53  ;;  %vm1153_vm4 = vweird.f32 %v2685_v36 }
 0x139   : > { %v1943_v38 = vpop.eup %1942  ;;  %v1433_v61 = vmul.f32 %v1386_v47, %v2605_v20  ;;  %vm1155_vm5 = vmor %vm1153_vm4, %vm1154_vm3  ;;  %v1160_v2 = vor.u32 1.1754944e-38, %v1159_v57  ;;  %vm1158_vm6 = vcmp.eq.f32.partialorder %v1157_v12, 8.507059e+37  ;;  %v1399_v32 = vand.u32 2147483648, %v922_v23 }
 0x13a   : > { %v1449_v34 = vpack.c.bf16 %v1417_v30, %v1417_v30  ;;  %v1151_v58 = vmul.f32 %v1941_v46, %v1150_v26  ;;  %v1389_v62 = vmul.f32 %v1943_v38, %v922_v23  ;;  %vm1394_vm7 = vweird.f32 %v1943_v38 }
 0x13b   : > { %v1465_v40 = vpack.c.bf16 %v1433_v61, %v1433_v61  ;;  %v1397_v63 = vand.u32 2147483647, %v922_v23  ;;  %vm1393_vm8 = vweird.f32 %v922_v23  ;;  %v1400_v9 = vor.u32 1.1754944e-38, %v1399_v32 }
 0x13c   : > { %1482 = vst.msk [vmem:[%s2142_s11 + $0x38] sm:$0xf] %vm1467_vm2, %v1449_v34  ;;  %v1152_v59 = vadd.f32 %v1941_v46, %v1151_v58  ;;  %v1390_v28 = vsub.f32 1.0, %v1389_v62  ;;  %vm1395_vm9 = vmor %vm1393_vm8, %vm1394_vm7 }
 0x13d   : > { %1498 = vst.msk [vmem:[%s2142_s11 + $0x78] sm:$0xf] %vm1467_vm2, %v1465_v40  ;;  %vm1398_vm10 = vcmp.eq.f32.partialorder %v1397_v63, 8.507059e+37 }
 0x13e   : > { %v1156_v60 = vsel %vm1155_vm5, %v1941_v46, %v1152_v59  ;;  %v1391_v20 = vmul.f32 %v1943_v38, %v1390_v28 }
 0x13f   : > { %v1161_v54 = vsel %vm1158_vm6, %v1160_v2, %v1156_v60 }
 0x140   : > { %v1418_v3 = vmul.f32 %v1161_v54, %v2639_v8  ;;  %v1392_v0 = vadd.f32 %v1943_v38, %v1391_v20 }
 0x142   : > { %v1450_v4 = vpack.c.bf16 %v1418_v3, %v1418_v3  ;;  %v1396_v10 = vsel %vm1395_vm9, %v1943_v38, %v1392_v0 }
 0x143   : > { %v1401_v11 = vsel %vm1398_vm10, %v1400_v9, %v1396_v10 }
 0x144   : > { %1483 = vst.msk [vmem:[%s2142_s11 + $0x3c] sm:$0xf] %vm1467_vm2, %v1450_v4  ;;  %v1434_v14 = vmul.f32 %v1401_v11, %v2656_v29 }
 0x146   : > { %v1466_v1 = vpack.c.bf16 %v1434_v14, %v1434_v14 }
 0x148   : > { %1499 = vst.msk [vmem:[%s2142_s11 + $0x7c] sm:$0xf] %vm1467_vm2, %v1466_v1 }
 0x149 PF: > { %s15_s18 = sadd.s32 1, %s1951_s18  }
 0x14a   : > { %p12_p4 = scmp.ge.s32.totalorder %s15_s18, 4  }
 0x14c   :  { %14 = sbr.rel (!%p12_p4) target bundleno = 1 (0x1), region = 73 }

// kernel: c3_forward.3
= control target key start
LH: loop header
LB: loop body
LE: loop exit
PB: predicated region body
PF: predicated region fallthrough
CT: control target
= control target key end

     0   :  { %s1747_s15 = smov 0   ;;  %s2799_s0 = inlined_call_operand.vmem [shape: bf16[512,8], index: 0, kind: input, shape index: {}]   ;;  %s2800_s1 = inlined_call_operand.vmem [shape: bf16[8,8], index: 1, kind: input, shape index: {}]   ;;  %s2801_s2 = inlined_call_operand.vmem [shape: f32[1,8], index: 2, kind: input, shape index: {}]   ;;  %s2802_s3 = inlined_call_operand.vmem [shape: bf16[512,4], index: 3, kind: output, shape index: {0}]   ;;  %s2803_s4 = inlined_call_operand.vmem [shape: bf16[512,4], index: 4, kind: output, shape index: {1}]  }
   0x1 LB: > { %s1430_s16 = sadd.s32 4294967295, %s1719_s15   ;;  %p1434_p0 = scmp.ge.s32.totalorder %s1719_s15, 1  ;;  %s1719_s15 = sphi %s1747_s15, %s15_s15  }
   0x2   : > { %p166_p1 = scmp.lt.s32.totalorder %s1719_s15, 3 }
   0x4   : > { %p167_p2 = pnand %p1434_p0, %p166_p1 }
   0x5   : > { %s1435_s19 = sshll.u32 (!%p167_p2), %s1430_s16, 5  ;;  %s1721_s29 = smov (!%p167_p2), 124  }
   0x6   : > { %170 = sbr.rel (%p167_p2) target bundleno = 447 (0x1bf), region = 32  ;;  %p198_p3 = scmp.lt.s32.totalorder (!%p167_p2), %s1435_s19, 63 }
   0xb   : > { %v248_v0 = vld [vmem:[%s2800_s1] sm:$0xf]  ;;  %vm382_vm0 = vcmask 1043456   ;;  %s2883_s19 = smov (!%p198_p3, %s1435_s19), 63  ;;  %vm333_vm1 = vcmask 64512   ;;  %vm1147_vm9 = vcmask 27648  }
   0xc   : > { %v384_v1 = vsel %vm382_vm0, %v248_v0, 0  ;;  %s1758_s20 = sshll.u32 %s2883_s19, 2  ;;  %v1783_v20 = vld [vmem:[%s2801_s2] ss:$0 sm:$0xff] }
   0xd   : > { %393 = vmatpush.bf16.msra.mxu0 %v384_v1  ;;  %1571 = vmatpush.bf16.msra.mxu1 %v384_v1  ;;  %s201_s23 = scalar_lea.vmem %s2799_s0, %s1758_s20  ;;  %s1942_s28 = scalar_lea.vmem %s2802_s3, %s1758_s20 }
   0xe   : > { %1572 = vmatpush.bf16.msra.mxu2 %v384_v1  ;;  %1573 = vmatpush.bf16.msra.mxu3 %v384_v1  ;;  %v1555_v2 = vld [vmem:[%s201_s23] sm:$0xff]  ;;  %v1556_v6 = vld [vmem:[%s201_s23 + $0x8] sm:$0xff]  ;;  %v1557_v10 = vld [vmem:[%s201_s23 + $0x10] sm:$0xff]  ;;  %s2727_s8 = scalar_lea.vmem %s2803_s4, %s1758_s20 }
   0xf   : > { %v1559_v3 = vld [vmem:[%s201_s23 + $0x20] sm:$0xff]  ;;  %v1560_v7 = vld [vmem:[%s201_s23 + $0x28] sm:$0xff]  ;;  %v1561_v11 = vld [vmem:[%s201_s23 + $0x30] sm:$0xff] }
  0x10   : > { %v1563_v4 = vld [vmem:[%s201_s23 + $0x40] sm:$0xff]  ;;  %1505 = vmatmul.msk.bf16.vlgmr.msra.gmra.mxu0 %vm333_vm1, %v1555_v2  ;;  %1509 = vmatmul.msk.bf16.vlgmr.msra.gmra.mxu1 %vm333_vm1, %v1559_v3  ;;  %v1564_v8 = vld [vmem:[%s201_s23 + $0x48] sm:$0xff]  ;;  %v1565_v12 = vld [vmem:[%s201_s23 + $0x50] sm:$0xff] }
  0x11   : > { %v1567_v5 = vld [vmem:[%s201_s23 + $0x60] sm:$0xff]  ;;  %1513 = vmatmul.msk.bf16.vlgmr.msra.gmra.mxu2 %vm333_vm1, %v1563_v4  ;;  %v1568_v9 = vld [vmem:[%s201_s23 + $0x68] sm:$0xff]  ;;  %v1569_v13 = vld [vmem:[%s201_s23 + $0x70] sm:$0xff] }
  0x12   : > { %1517 = vmatmul.msk.bf16.vlgmr.msra.gmra.mxu3 %vm333_vm1, %v1567_v5  ;;  %v1558_v14 = vld [vmem:[%s201_s23 + $0x18] sm:$0xff] }
  0x13   : > { %v1562_v15 = vld [vmem:[%s201_s23 + $0x38] sm:$0xff] }
  0x14   : > { %v1566_v16 = vld [vmem:[%s201_s23 + $0x58] sm:$0xff] }
  0x15   : > { %v1570_v17 = vld [vmem:[%s201_s23 + $0x78] sm:$0xff] }
  0x20   : > { %1506 = vmatmul.msk.bf16.gmra.mxu0 %vm333_vm1, %v1556_v6  ;;  %1510 = vmatmul.msk.bf16.gmra.mxu1 %vm333_vm1, %v1560_v7 }
  0x21   : > { %1514 = vmatmul.msk.bf16.gmra.mxu2 %vm333_vm1, %v1564_v8 }
  0x22   : > { %1518 = vmatmul.msk.bf16.gmra.mxu3 %vm333_vm1, %v1568_v9 }
  0x30   : > { %1507 = vmatmul.msk.bf16.gmra.mxu0 %vm333_vm1, %v1557_v10  ;;  %1511 = vmatmul.msk.bf16.gmra.mxu1 %vm333_vm1, %v1561_v11 }
  0x31   : > { %1515 = vmatmul.msk.bf16.gmra.mxu2 %vm333_vm1, %v1565_v12 }
  0x32   : > { %1519 = vmatmul.msk.bf16.gmra.mxu3 %vm333_vm1, %v1569_v13 }
  0x40   : > { %1508 = vmatmul.msk.bf16.gmra.mxu0 %vm333_vm1, %v1558_v14  ;;  %1512 = vmatmul.msk.bf16.gmra.mxu1 %vm333_vm1, %v1562_v15 }
  0x41   : > { %1516 = vmatmul.msk.bf16.gmra.mxu2 %vm333_vm1, %v1566_v16 }
  0x42   : > { %1520 = vmatmul.msk.bf16.gmra.mxu3 %vm333_vm1, %v1570_v17 }
  0x8d   : > { %v395_v18 = vpop.f32.mrf.mxu0  ;;  %v415_v19 = vpop.f32.mrf.mxu1 }
  0x8e   : > { %v1786_v21 = vadd.f32 %v1783_v20, %v395_v18  ;;  %v1798_v29 = vadd.f32 %v1783_v20, %v415_v19 }
  0x90   : > { %v1521_v31 = vmul.f32 -1.442695, %v1786_v21  ;;  %v1529_v34 = vmul.f32 -1.442695, %v1798_v29 }
  0x94   : > { %v435_v22 = vpop.f32.mrf.mxu2 }
  0x95   : > { %v455_v23 = vpop.f32.mrf.mxu3  ;;  %v397_v25 = vpop.f32.mrf.mxu0  ;;  %v1816_v43 = vadd.f32 %v1783_v20, %v435_v22 }
  0x96   : > { %v1789_v24 = vadd.f32 %v1783_v20, %v455_v23  ;;  %v417_v26 = vpop.f32.mrf.mxu1  ;;  %v1792_v27 = vadd.f32 %v1783_v20, %v397_v25 }
  0x97   : > { %v1795_v28 = vadd.f32 %v1783_v20, %v417_v26  ;;  %v1537_v52 = vmul.f32 -1.442695, %v1816_v43 }
  0x98   : > { %v1545_v30 = vmul.f32 -1.442695, %v1789_v24  ;;  %v1522_v32 = vmul.f32 -1.442695, %v1792_v27 }
  0x99   : > { %v1530_v33 = vmul.f32 -1.442695, %v1795_v28 }
  0x9a   : > { %1584 = vpow2.f32 %v1545_v30 }
  0x9b   : > { %1586 = vpow2.f32 %v1521_v31 }
  0x9c   : > { %v437_v35 = vpop.f32.mrf.mxu2  ;;  %1588 = vpow2.f32 %v1522_v32 }
  0x9d   : > { %v457_v36 = vpop.f32.mrf.mxu3  ;;  %v1806_v37 = vadd.f32 %v1783_v20, %v437_v35  ;;  %v400_v39 = vpop.f32.mrf.mxu0  ;;  %1590 = vpow2.f32 %v1530_v33 }
  0x9e   : > { %v1809_v38 = vadd.f32 %v1783_v20, %v457_v36  ;;  %v1812_v40 = vadd.f32 %v1783_v20, %v400_v39  ;;  %1592 = vpow2.f32 %v1529_v34  ;;  %v420_v45 = vpop.f32.mrf.mxu1 }
  0x9f   : > { %v1538_v41 = vmul.f32 -1.442695, %v1806_v37  ;;  %v1824_v50 = vadd.f32 %v1783_v20, %v420_v45 }
  0xa0   : > { %v1585_v42 = vpop.eup %1584  ;;  %v1546_v44 = vmul.f32 -1.442695, %v1809_v38  ;;  %v1523_v47 = vmul.f32 -1.442695, %v1812_v40 }
  0xa1   : > { %v1819_v46 = vadd.f32 1.0, %v1585_v42  ;;  %1594 = vpow2.f32 %v1538_v41  ;;  %v1587_v48 = vpop.eup %1586  ;;  %v1531_v60 = vmul.f32 -1.442695, %v1824_v50 }
  0xa2   : > { %v1589_v49 = vpop.eup %1588  ;;  %v1829_v55 = vadd.f32 1.0, %v1587_v48 }
  0xa3   : > { %1596 = vrcp.f32 %v1819_v46  ;;  %v1591_v51 = vpop.eup %1590  ;;  %v1827_v53 = vadd.f32 1.0, %v1589_v49  ;;  %v972_v57 = vand.u32 2147483647, %v1819_v46  ;;  %v974_v58 = vand.u32 2147483648, %v1819_v46 }
  0xa4   : > { %1598 = vpow2.f32 %v1546_v44  ;;  %v1593_v54 = vpop.eup %1592  ;;  %v1831_v56 = vadd.f32 1.0, %v1591_v51  ;;  %v440_v0 = vpop.f32.mrf.mxu2  ;;  %vm968_vm2 = vweird.f32 %v1819_v46 }
  0xa5   : > { %1600 = vpow2.f32 %v1523_v47  ;;  %v1838_v61 = vadd.f32 1.0, %v1593_v54  ;;  %v629_v62 = vand.u32 2147483648, %v1827_v53  ;;  %v460_v1 = vpop.f32.mrf.mxu3  ;;  %v627_v3 = vand.u32 2147483647, %v1827_v53  ;;  %v402_v18 = vpop.f32.mrf.mxu0 }
  0xa6   : > { %1602 = vrcp.f32 %v1827_v53  ;;  %v749_v4 = vand.u32 2147483648, %v1831_v56  ;;  %vm1848_vm3 = vcmp.eq.f32.partialorder %v972_v57, 8.507059e+37  ;;  %v975_v8 = vor.u32 1.1754944e-38, %v974_v58 }
  0xa7   : > { %v1595_v59 = vpop.eup %1594  ;;  %1604 = vrcp.f32 %v1831_v56  ;;  %v747_v9 = vand.u32 2147483647, %v1831_v56  ;;  %vm623_vm4 = vweird.f32 %v1827_v53  ;;  %v1858_v12 = vadd.f32 %v1783_v20, %v440_v0 }
  0xa8   : > { %1606 = vpow2.f32 %v1537_v52  ;;  %v1841_v63 = vadd.f32 1.0, %v1595_v59  ;;  %v1861_v13 = vadd.f32 %v1783_v20, %v460_v1  ;;  %v630_v16 = vor.u32 1.1754944e-38, %v629_v62 }
  0xa9   : > { %v1597_v2 = vpop.eup %1596  ;;  %1608 = vrcp.f32 %v1829_v55  ;;  %vm743_vm5 = vweird.f32 %v1831_v56  ;;  %vm1870_vm6 = vcmp.eq.f32.partialorder %v627_v3, 8.507059e+37  ;;  %v750_v25 = vor.u32 1.1754944e-38, %v749_v4 }
  0xaa   : > { %v1599_v5 = vpop.eup %1598  ;;  %v964_v6 = vmul.f32 %v1597_v2, %v1819_v46  ;;  %1610 = vrcp.f32 %v1841_v63  ;;  %v867_v26 = vand.u32 2147483647, %v1841_v63  ;;  %v869_v30 = vand.u32 2147483648, %v1841_v63 }
  0xab   : > { %v1601_v10 = vpop.eup %1600  ;;  %v1855_v11 = vadd.f32 1.0, %v1599_v5  ;;  %1612 = vpow2.f32 %v1531_v60  ;;  %vm969_vm7 = vweird.f32 %v1597_v2  ;;  %vm1879_vm8 = vcmp.eq.f32.partialorder %v747_v9, 8.507059e+37 }
  0xac   : > { %v1863_v14 = vpop.eup %1602  ;;  %v965_v15 = vsub.f32 1.0, %v964_v6  ;;  %v1866_v17 = vadd.f32 1.0, %v1601_v10  ;;  %vm863_vm10 = vweird.f32 %v1841_v63  ;;  %v1888_v39 = vmul.f32 -1.442695, %v1858_v12  ;;  %vm970_vm12 = vmor %vm968_vm2, %vm969_vm7 }
  0xad   : > { %v1605_v19 = vpop.eup %1604  ;;  %v619_v22 = vmul.f32 %v1863_v14, %v1827_v53  ;;  %1614 = vrcp.f32 %v1855_v11  ;;  %v1891_v41 = vmul.f32 -1.442695, %v1861_v13  ;;  %v1894_v42 = vadd.f32 %v1783_v20, %v402_v18 }
  0xae   : > { %v1876_v31 = vpop.eup %1606  ;;  %v966_v32 = vmul.f32 %v1597_v2, %v965_v15  ;;  %v739_v33 = vmul.f32 %v1605_v19, %v1831_v56  ;;  %vm624_vm11 = vweird.f32 %v1863_v14  ;;  %1616 = vrcp.f32 %v1866_v17 }
  0xaf   : > { %v1884_v35 = vpop.eup %1608  ;;  %v620_v36 = vsub.f32 1.0, %v619_v22  ;;  %vm1903_vm13 = vcmp.eq.f32.partialorder %v867_v26, 8.507059e+37  ;;  %v870_v54 = vor.u32 1.1754944e-38, %v869_v30  ;;  %v987_v57 = vand.u32 2147483647, %v1855_v11  ;;  %vm625_vm1 = vmor %vm623_vm4, %vm624_vm11 }
  0xb0   : > { %v1611_v44 = vpop.eup %1610  ;;  %v967_v45 = vadd.f32 %v1597_v2, %v966_v32  ;;  %v740_v47 = vsub.f32 1.0, %v739_v33  ;;  %vm744_vm14 = vweird.f32 %v1605_v19  ;;  %v989_v60 = vand.u32 2147483648, %v1855_v11 }
  0xb1   : > { %v1613_v48 = vpop.eup %1612  ;;  %v621_v49 = vmul.f32 %v1863_v14, %v620_v36  ;;  %v859_v51 = vmul.f32 %v1611_v44, %v1841_v63  ;;  %vm864_vm15 = vweird.f32 %v1611_v44  ;;  %vm983_vm0 = vweird.f32 %v1855_v11  ;;  %v422_v36 = vpop.f32.mrf.mxu1 }
  0xb2   : > { %v971_v58 = vsel %vm970_vm12, %v1597_v2, %v967_v45  ;;  %v741_v59 = vmul.f32 %v1605_v19, %v740_v47  ;;  %vm638_vm2 = vweird.f32 %v1866_v17  ;;  %v642_v4 = vand.u32 2147483647, %v1866_v17  ;;  %vm865_vm4 = vmor %vm863_vm10, %vm864_vm15 }
  0xb3   : > { %v976_v46 = vsel %vm1848_vm3, %v975_v8, %v971_v58  ;;  %v622_v62 = vadd.f32 %v1863_v14, %v621_v49  ;;  %v860_v0 = vsub.f32 1.0, %v859_v51  ;;  %v1615_v1 = vpop.eup %1614  ;;  %v1920_v5 = vadd.f32 1.0, %v1613_v48  ;;  %vm745_vm3 = vmor %vm743_vm5, %vm744_vm14 }
  0xb4   : > { %v1107_v3 = vmul.f32 %v976_v46, %v1789_v24  ;;  %v742_v2 = vadd.f32 %v1605_v19, %v741_v59  ;;  %v979_v7 = vmul.f32 %v1615_v1, %v1855_v11  ;;  %vm1927_vm7 = vcmp.eq.f32.partialorder %v987_v57, 8.507059e+37  ;;  %v1932_v9 = vpop.eup %1616  ;;  %v462_v57 = vpop.f32.mrf.mxu3 }
  0xb5   : > { %v626_v6 = vsel %vm625_vm1, %v1863_v14, %v622_v62  ;;  %v861_v24 = vmul.f32 %v1611_v44, %v860_v0  ;;  %v644_v8 = vand.u32 2147483648, %v1866_v17  ;;  %v990_v18 = vor.u32 1.1754944e-38, %v989_v60  ;;  %v405_v11 = vpop.f32.mrf.mxu0 }
  0xb6   : > { %v1934_v10 = vpack.c.bf16 %v1107_v3, %v1107_v3  ;;  %v631_v14 = vsel %vm1870_vm6, %v630_v16, %v626_v6  ;;  %v746_v15 = vsel %vm745_vm3, %v1605_v19, %v742_v2  ;;  %v980_v30 = vsub.f32 1.0, %v979_v7 }
  0xb7   : > { %v1084_v56 = vmul.f32 %v631_v14, %v1792_v27  ;;  %v751_v22 = vsel %vm1879_vm8, %v750_v25, %v746_v15  ;;  %v862_v26 = vadd.f32 %v1611_v44, %v861_v24  ;;  %vm984_vm5 = vweird.f32 %v1615_v1 }
  0xb8   : > { %1172 = vst.msk [vmem:[%s1942_s28 + $0x60] sm:$0xf] %vm1147_vm9, %v1934_v10  ;;  %v1092_v16 = vmul.f32 %v751_v22, %v1795_v28  ;;  %v634_v19 = vmul.f32 %v1932_v9, %v1866_v17  ;;  %vm1956_vm6 = vcmp.eq.f32.partialorder %v642_v4, 8.507059e+37  ;;  %1618 = vrcp.f32 %v1920_v5  ;;  %vm985_vm11 = vmor %vm983_vm0, %vm984_vm5 }
  0xb9   : > { %v1961_v23 = vpack.c.bf16 %v1084_v56, %v1084_v56  ;;  %v866_v25 = vsel %vm865_vm4, %v1611_v44, %v862_v26  ;;  %v981_v32 = vmul.f32 %v1615_v1, %v980_v30  ;;  %v645_v28 = vor.u32 1.1754944e-38, %v644_v8  ;;  %v442_v44 = vpop.f32.mrf.mxu2 }
  0xba   : > { %v1963_v33 = vpack.c.bf16 %v1092_v16, %v1092_v16  ;;  %v871_v63 = vsel %vm1903_vm13, %v870_v54, %v866_v25  ;;  %v635_v34 = vsub.f32 1.0, %v634_v19  ;;  %vm639_vm8 = vweird.f32 %v1932_v9 }
  0xbb   : > { %1149 = vst.msk [vmem:[%s1942_s28 + $0x4] sm:$0xf] %vm1147_vm9, %v1961_v23  ;;  %v1100_v45 = vmul.f32 %v871_v63, %v1806_v37  ;;  %v982_v47 = vadd.f32 %v1615_v1, %v981_v32  ;;  %vm758_vm10 = vweird.f32 %v1920_v5  ;;  %1620 = vpow2.f32 %v1888_v39  ;;  %vm640_vm12 = vmor %vm638_vm2, %vm639_vm8 }
  0xbc   : > { %1157 = vst.msk [vmem:[%s1942_s28 + $0x24] sm:$0xf] %vm1147_vm9, %v1963_v33  ;;  %v636_v48 = vmul.f32 %v1932_v9, %v635_v34  ;;  %v762_v49 = vand.u32 2147483647, %v1920_v5  ;;  %1622 = vpow2.f32 %v1891_v41  ;;  %v1524_v37 = vmul.f32 -1.442695, %v1894_v42 }
  0xbd   : > { %v1984_v51 = vpack.c.bf16 %v1100_v45, %v1100_v45  ;;  %v986_v39 = vsel %vm985_vm11, %v1615_v1, %v982_v47  ;;  %v764_v52 = vand.u32 2147483648, %v1920_v5  ;;  %v1988_v54 = vadd.f32 %v1783_v20, %v422_v36 }
  0xbe   : > { %v1619_v58 = vpop.eup %1618  ;;  %v991_v59 = vsel %vm1927_vm7, %v990_v18, %v986_v39  ;;  %v637_v60 = vadd.f32 %v1932_v9, %v636_v48  ;;  %1624 = vpow2.f32 %v1524_v37  ;;  %v1994_v41 = vadd.f32 %v1783_v20, %v442_v44 }
  0xbf   : > { %1165 = vst.msk [vmem:[%s1942_s28 + $0x44] sm:$0xf] %vm1147_vm9, %v1984_v51  ;;  %v1108_v46 = vmul.f32 %v991_v59, %v1809_v38  ;;  %v754_v62 = vmul.f32 %v1619_v58, %v1920_v5  ;;  %vm759_vm13 = vweird.f32 %v1619_v58  ;;  %v1532_v0 = vmul.f32 -1.442695, %v1988_v54  ;;  %v425_v5 = vpop.f32.mrf.mxu1 }
  0xc0   : > { %v641_v1 = vsel %vm640_vm12, %v1932_v9, %v637_v60  ;;  %v1540_v3 = vmul.f32 -1.442695, %v1994_v41  ;;  %v2009_v2 = vadd.f32 %v1783_v20, %v462_v57  ;;  %v2012_v38 = vadd.f32 %v1783_v20, %v405_v11  ;;  %vm2037_vm14 = vmor %vm758_vm10, %vm759_vm13 }
  0xc1   : > { %v1621_v4 = vpop.eup %1620  ;;  %v2014_v6 = vpack.c.bf16 %v1108_v46, %v1108_v46  ;;  %v646_v17 = vsel %vm1956_vm6, %v645_v28, %v641_v1  ;;  %v755_v24 = vsub.f32 1.0, %v754_v62  ;;  %1626 = vpow2.f32 %v1532_v0 }
  0xc2   : > { %v1623_v7 = vpop.eup %1622  ;;  %1628 = vrcp.f32 %v1838_v61  ;;  %v1085_v53 = vmul.f32 %v646_v17, %v1812_v40  ;;  %v2020_v8 = vadd.f32 1.0, %v1621_v4  ;;  %v1548_v9 = vmul.f32 -1.442695, %v2009_v2 }
  0xc3   : > { %1173 = vst.msk [vmem:[%s1942_s28 + $0x64] sm:$0xf] %vm1147_vm9, %v2014_v6  ;;  %v756_v14 = vmul.f32 %v1619_v58, %v755_v24  ;;  %v2026_v15 = vadd.f32 1.0, %v1623_v7  ;;  %1630 = vpow2.f32 %v1540_v3  ;;  %v1525_v18 = vmul.f32 -1.442695, %v2012_v38 }
  0xc4   : > { %v1625_v56 = vpop.eup %1624  ;;  %v2030_v22 = vadd.f32 1.0, %v1876_v31  ;;  %v2032_v26 = vpack.c.bf16 %v1085_v53, %v1085_v53  ;;  %v765_v30 = vor.u32 1.1754944e-38, %v764_v52  ;;  %1632 = vrcp.f32 %v2020_v8 }
  0xc5   : > { %v757_v16 = vadd.f32 %v1619_v58, %v756_v14  ;;  %vm763_vm15 = vcmp.eq.f32.partialorder %v762_v49, 8.507059e+37  ;;  %1634 = vrcp.f32 %v2026_v15  ;;  %v882_v31 = vand.u32 2147483647, %v2020_v8 }
  0xc6   : > { %1150 = vst.msk [vmem:[%s1942_s28 + $0x8] sm:$0xf] %vm1147_vm9, %v2032_v26  ;;  %v884_v19 = vand.u32 2147483648, %v2020_v8  ;;  %1636 = vpow2.f32 %v1548_v9  ;;  %v1002_v32 = vand.u32 2147483647, %v2026_v15  ;;  %v2051_v28 = vadd.f32 1.0, %v1625_v56 }
  0xc7   : > { %v1627_v27 = vpop.eup %1626  ;;  %v761_v25 = vsel %vm2037_vm14, %v1619_v58, %v757_v16  ;;  %1638 = vpow2.f32 %v1525_v18  ;;  %v1004_v36 = vand.u32 2147483648, %v2026_v15  ;;  %vm878_vm0 = vweird.f32 %v2020_v8 }
  0xc8   : > { %v2053_v63 = vpop.eup %1628  ;;  %1640 = vrcp.f32 %v2030_v22  ;;  %v766_v34 = vsel %vm763_vm15, %v765_v30, %v761_v25  ;;  %v2057_v45 = vadd.f32 1.0, %v1627_v27  ;;  %v2063_v48 = vadd.f32 %v1783_v20, %v425_v5 }
  0xc9   : > { %v1631_v47 = vpop.eup %1630  ;;  %v1093_v44 = vmul.f32 %v766_v34, %v1824_v50  ;;  %1642 = vrcp.f32 %v2051_v28  ;;  %vm2065_vm1 = vcmp.eq.f32.partialorder %v882_v31, 8.507059e+37  ;;  %v885_v39 = vor.u32 1.1754944e-38, %v884_v19 }
  0xca   : > { %v1633_v49 = vpop.eup %1632  ;;  %vm998_vm2 = vweird.f32 %v2026_v15  ;;  %1644 = vrcp.f32 %v2057_v45  ;;  %vm2074_vm3 = vcmp.eq.f32.partialorder %v1002_v32, 8.507059e+37  ;;  %v659_v58 = vand.u32 2147483648, %v2051_v28 }
  0xcb   : > { %v1635_v52 = vpop.eup %1634  ;;  %v2071_v50 = vpack.c.bf16 %v1093_v44, %v1093_v44  ;;  %v874_v57 = vmul.f32 %v1633_v49, %v2020_v8  ;;  %v1005_v46 = vor.u32 1.1754944e-38, %v1004_v36  ;;  %v657_v62 = vand.u32 2147483647, %v2051_v28 }
  0xcc   : > { %v1637_v59 = vpop.eup %1636  ;;  %v994_v60 = vmul.f32 %v1635_v52, %v2026_v15  ;;  %v777_v0 = vand.u32 2147483647, %v2057_v45  ;;  %vm879_vm7 = vweird.f32 %v1633_v49  ;;  %v779_v4 = vand.u32 2147483648, %v2057_v45 }
  0xcd   : > { %v1639_v1 = vpop.eup %1638  ;;  %1158 = vst.msk [vmem:[%s1942_s28 + $0x28] sm:$0xf] %vm1147_vm9, %v2071_v50  ;;  %v875_v3 = vsub.f32 1.0, %v874_v57  ;;  %v2086_v17 = vadd.f32 1.0, %v1631_v47  ;;  %vm999_vm4 = vweird.f32 %v1635_v52  ;;  %vm653_vm5 = vweird.f32 %v2051_v28  ;;  %vm2100_vm8 = vmor %vm878_vm0, %vm879_vm7 }
  0xce   : > { %v2088_v24 = vpop.eup %1640  ;;  %v995_v7 = vsub.f32 1.0, %v994_v60  ;;  %vm773_vm6 = vweird.f32 %v2057_v45  ;;  %v2092_v53 = vadd.f32 1.0, %v1637_v59  ;;  %v660_v18 = vor.u32 1.1754944e-38, %v659_v58  ;;  %vm2117_vm11 = vmor %vm998_vm2, %vm999_vm4 }
  0xcf   : > { %v1643_v9 = vpop.eup %1642  ;;  %v876_v14 = vmul.f32 %v1633_v49, %v875_v3  ;;  %1646 = vrcp.f32 %v2086_v17  ;;  %v2095_v56 = vadd.f32 1.0, %v1639_v1  ;;  %vm2105_vm10 = vcmp.eq.f32.partialorder %v657_v62, 8.507059e+37 }
  0xd0   : > { %v1645_v40 = vpop.eup %1644  ;;  %v996_v16 = vmul.f32 %v1635_v52, %v995_v7  ;;  %v649_v31 = vmul.f32 %v1643_v9, %v2051_v28  ;;  %v1533_v5 = vmul.f32 -1.442695, %v2063_v48  ;;  %v2112_v27 = vmul.f32 %v2053_v63, %v1838_v61 }
  0xd1   : > { %v877_v25 = vadd.f32 %v1633_v49, %v876_v14  ;;  %v769_v32 = vmul.f32 %v1645_v40, %v2057_v45  ;;  %vm2122_vm12 = vcmp.eq.f32.partialorder %v777_v0, 8.507059e+37  ;;  %v780_v36 = vor.u32 1.1754944e-38, %v779_v4 }
  0xd2   : > { %v899_v47 = vand.u32 2147483648, %v2086_v17  ;;  %v997_v44 = vadd.f32 %v1635_v52, %v996_v16  ;;  %v650_v57 = vsub.f32 1.0, %v649_v31  ;;  %vm893_vm13 = vweird.f32 %v2086_v17 }
  0xd3   : > { %v897_v58 = vand.u32 2147483647, %v2086_v17  ;;  %1648 = vrcp.f32 %v2092_v53  ;;  %v881_v15 = vsel %vm2100_vm8, %v1633_v49, %v877_v25  ;;  %vm654_vm14 = vweird.f32 %v1643_v9 }
  0xd4   : > { %v770_v59 = vsub.f32 1.0, %v769_v32  ;;  %vm774_vm15 = vweird.f32 %v1645_v40  ;;  %v886_v60 = vsel %vm2065_vm1, %v885_v39, %v881_v15  ;;  %v1001_v62 = vsel %vm2117_vm11, %v1635_v52, %v997_v44  ;;  %vm655_vm1 = vmor %vm653_vm5, %vm654_vm14 }
  0xd5   : > { %v651_v0 = vmul.f32 %v1643_v9, %v650_v57  ;;  %v900_v1 = vor.u32 1.1754944e-38, %v899_v47  ;;  %v1647_v3 = vpop.eup %1646  ;;  %v1101_v4 = vmul.f32 %v886_v60, %v1858_v12  ;;  %v1006_v7 = vsel %vm2074_vm3, %v1005_v46, %v1001_v62  ;;  %vm775_vm7 = vmor %vm773_vm6, %vm774_vm15 }
  0xd6   : > { %v771_v14 = vmul.f32 %v1645_v40, %v770_v59  ;;  %v1017_v49 = vand.u32 2147483647, %v2092_v53  ;;  %v1109_v30 = vmul.f32 %v1006_v7, %v1861_v13  ;;  %v889_v37 = vmul.f32 %v1647_v3, %v2086_v17 }
  0xd7   : > { %v652_v16 = vadd.f32 %v1643_v9, %v651_v0  ;;  %vm2142_vm0 = vcmp.eq.f32.partialorder %v897_v58, 8.507059e+37  ;;  %v1019_v52 = vand.u32 2147483648, %v2092_v53  ;;  %v2147_v31 = vpack.c.bf16 %v1101_v4, %v1101_v4 }
  0xd8   : > { %v772_v12 = vadd.f32 %v1645_v40, %v771_v14  ;;  %vm894_vm2 = vweird.f32 %v1647_v3  ;;  %vm1013_vm3 = vweird.f32 %v2092_v53  ;;  %v2153_v11 = vpack.c.bf16 %v1109_v30, %v1109_v30 }
  0xd9   : > { %v1649_v13 = vpop.eup %1648  ;;  %v656_v46 = vsel %vm655_vm1, %v1643_v9, %v652_v16  ;;  %v890_v25 = vsub.f32 1.0, %v889_v37  ;;  %1650 = vrcp.f32 %v2095_v56  ;;  %1166 = vst.msk [vmem:[%s1942_s28 + $0x48] sm:$0xf] %vm1147_vm9, %v2147_v31  ;;  %vm2165_vm4 = vcmp.eq.f32.partialorder %v1017_v49, 8.507059e+37  ;;  %vm895_vm6 = vmor %vm893_vm13, %vm894_vm2  ;;  %v445_v37 = vpop.f32.mrf.mxu2 }
  0xda   : > { %v661_v28 = vsel %vm2105_vm10, %v660_v18, %v656_v46  ;;  %v776_v8 = vsel %vm775_vm7, %v1645_v40, %v772_v12  ;;  %v1009_v32 = vmul.f32 %v1649_v13, %v2092_v53  ;;  %1174 = vst.msk [vmem:[%s1942_s28 + $0x68] sm:$0xf] %vm1147_vm9, %v2153_v11  ;;  %v1020_v57 = vor.u32 1.1754944e-38, %v1019_v52 }
  0xdb   : > { %v1086_v45 = vmul.f32 %v661_v28, %v1894_v42  ;;  %v781_v9 = vsel %vm2122_vm12, %v780_v36, %v776_v8  ;;  %v891_v44 = vmul.f32 %v1647_v3, %v890_v25  ;;  %vm1014_vm5 = vweird.f32 %v1649_v13  ;;  %v465_v25 = vpop.f32.mrf.mxu3 }
  0xdc   : > { %v1094_v18 = vmul.f32 %v781_v9, %v1988_v54  ;;  %v1010_v40 = vsub.f32 1.0, %v1009_v32  ;;  %v674_v19 = vand.u32 2147483648, %v2095_v56  ;;  %1652 = vpow2.f32 %v1533_v5  ;;  %vm1015_vm13 = vmor %vm1013_vm3, %vm1014_vm5 }
  0xdd   : > { %v2177_v58 = vpack.c.bf16 %v1086_v45, %v1086_v45  ;;  %v892_v15 = vadd.f32 %v1647_v3, %v891_v44  ;;  %v725_v59 = vsub.f32 1.0, %v2112_v27  ;;  %vm668_vm8 = vweird.f32 %v2095_v56 }
  0xde   : > { %v2180_v42 = vpack.c.bf16 %v1094_v18, %v1094_v18  ;;  %v1011_v34 = vmul.f32 %v1649_v13, %v1010_v40  ;;  %v672_v54 = vand.u32 2147483647, %v2095_v56  ;;  %vm728_vm10 = vweird.f32 %v1838_v61  ;;  %v427_v40 = vpop.f32.mrf.mxu1 }
  0xdf   : > { %v1651_v36 = vpop.eup %1650  ;;  %1151 = vst.msk [vmem:[%s1942_s28 + $0xc] sm:$0xf] %vm1147_vm9, %v2177_v58  ;;  %v896_v60 = vsel %vm895_vm6, %v1647_v3, %v892_v15  ;;  %v726_v5 = vmul.f32 %v2053_v63, %v725_v59  ;;  %vm729_vm11 = vweird.f32 %v2053_v63  ;;  %v675_v0 = vor.u32 1.1754944e-38, %v674_v19 }
  0xe0   : > { %1159 = vst.msk [vmem:[%s1942_s28 + $0x2c] sm:$0xf] %vm1147_vm9, %v2180_v42  ;;  %v901_v17 = vsel %vm2142_vm0, %v900_v1, %v896_v60  ;;  %v1012_v27 = vadd.f32 %v1649_v13, %v1011_v34  ;;  %v664_v62 = vmul.f32 %v1651_v36, %v2095_v56  ;;  %vm2199_vm12 = vmor %vm728_vm10, %vm729_vm11  ;;  %v732_v14 = vand.u32 2147483647, %v1838_v61  ;;  %v407_v56 = vpop.f32.mrf.mxu0 }
  0xe1   : > { %v1102_v3 = vmul.f32 %v901_v17, %v1994_v41  ;;  %v727_v7 = vadd.f32 %v2053_v63, %v726_v5  ;;  %v734_v1 = vand.u32 2147483648, %v1838_v61  ;;  %vm669_vm14 = vweird.f32 %v1651_v36 }
  0xe2   : > { %v1016_v49 = vsel %vm1015_vm13, %v1649_v13, %v1012_v27  ;;  %v665_v30 = vsub.f32 1.0, %v664_v62  ;;  %v604_v16 = vmul.f32 %v1884_v35, %v1829_v55  ;;  %v1653_v39 = vpop.eup %1652  ;;  %vm733_vm15 = vcmp.eq.f32.partialorder %v732_v14, 8.507059e+37  ;;  %vm2227_vm0 = vmor %vm668_vm8, %vm669_vm14 }
  0xe3   : > { %v2212_v41 = vpack.c.bf16 %v1102_v3, %v1102_v3  ;;  %v1021_v53 = vsel %vm2165_vm4, %v1020_v57, %v1016_v49  ;;  %v731_v52 = vsel %vm2199_vm12, %v2053_v63, %v727_v7  ;;  %v2220_v13 = vadd.f32 1.0, %v1653_v39  ;;  %v447_v3 = vpop.f32.mrf.mxu2 }
  0xe4   : > { %v1110_v61 = vmul.f32 %v1021_v53, %v2009_v2  ;;  %v666_v12 = vmul.f32 %v1651_v36, %v665_v30  ;;  %v735_v46 = vor.u32 1.1754944e-38, %v734_v1  ;;  %v605_v8 = vsub.f32 1.0, %v604_v16 }
  0xe5   : > { %1167 = vst.msk [vmem:[%s1942_s28 + $0x4c] sm:$0xf] %vm1147_vm9, %v2212_v41  ;;  %v612_v63 = vand.u32 2147483647, %v1829_v55  ;;  %v614_v2 = vand.u32 2147483648, %v1829_v55  ;;  %vm673_vm1 = vcmp.eq.f32.partialorder %v672_v54, 8.507059e+37  ;;  %1654 = vrcp.f32 %v2220_v13 }
  0xe6   : > { %v2233_v32 = vpack.c.bf16 %v1110_v61, %v1110_v61  ;;  %v667_v47 = vadd.f32 %v1651_v36, %v666_v12  ;;  %v736_v45 = vsel %vm733_vm15, %v735_v46, %v731_v52  ;;  %v606_v9 = vmul.f32 %v1884_v35, %v605_v8  ;;  %v430_v59 = vpop.f32.mrf.mxu1 }
  0xe7   : > { %vm608_vm2 = vweird.f32 %v1829_v55  ;;  %vm609_vm3 = vweird.f32 %v1884_v35  ;;  %vm788_vm7 = vweird.f32 %v2220_v13  ;;  %v792_v57 = vand.u32 2147483647, %v2220_v13 }
  0xe8   : > { %1175 = vst.msk [vmem:[%s1942_s28 + $0x6c] sm:$0xf] %vm1147_vm9, %v2233_v32  ;;  %v671_v44 = vsel %vm2227_vm0, %v1651_v36, %v667_v47  ;;  %v1091_v18 = vmul.f32 %v736_v45, %v1798_v29  ;;  %v607_v15 = vadd.f32 %v1884_v35, %v606_v9  ;;  %vm2248_vm4 = vcmp.eq.f32.partialorder %v612_v63, 8.507059e+37  ;;  %vm610_vm5 = vmor %vm608_vm2, %vm609_vm3  ;;  %v410_v28 = vpop.f32.mrf.mxu0 }
  0xe9   : > { %v676_v19 = vsel %vm673_vm1, %v675_v0, %v671_v44  ;;  %v615_v34 = vor.u32 1.1754944e-38, %v614_v2  ;;  %v2256_v36 = vadd.f32 %v1783_v20, %v445_v37  ;;  %v2259_v29 = vadd.f32 %v1783_v20, %v465_v25  ;;  %v467_v37 = vpop.f32.mrf.mxu3 }
  0xea   : > { %v1087_v54 = vmul.f32 %v676_v19, %v2012_v38  ;;  %v1123_v60 = vpack.c.bf16 %v1091_v18, %v1091_v18  ;;  %v611_v5 = vsel %vm610_vm5, %v1884_v35, %v607_v15  ;;  %v2263_v17 = vadd.f32 %v1783_v20, %v407_v56 }
  0xeb   : > { %v2266_v27 = vadd.f32 %v1783_v20, %v427_v40  ;;  %v844_v38 = vmul.f32 %v2088_v24, %v2030_v22  ;;  %v1655_v55 = vpop.eup %1654  ;;  %v616_v35 = vsel %vm2248_vm4, %v615_v34, %v611_v5  ;;  %v1541_v0 = vmul.f32 -1.442695, %v2256_v36  ;;  %v450_v5 = vpop.f32.mrf.mxu2 }
  0xec   : > { %v2270_v62 = vpack.c.bf16 %v1087_v54, %v1087_v54  ;;  %1228 = vrot.lane.b32.xlu2 %v1123_v60, %s1721_s29  ;;  %1156 = vst.msk [vmem:[%s1942_s28 + $0x20] sm:$0xf] %vm1147_vm9, %v1123_v60  ;;  %v1549_v4 = vmul.f32 -1.442695, %v2259_v29  ;;  %v784_v7 = vmul.f32 %v1655_v55, %v2220_v13  ;;  %v794_v14 = vand.u32 2147483648, %v2220_v13 }
  0xed   : > { %v1083_v1 = vmul.f32 %v616_v35, %v1786_v21  ;;  %v1526_v49 = vmul.f32 -1.442695, %v2263_v17  ;;  %vm789_vm6 = vweird.f32 %v1655_v55  ;;  %1656 = vpow2.f32 %v1541_v0 }
  0xee   : > { %1152 = vst.msk [vmem:[%s1942_s28 + $0x10] sm:$0xf] %vm1147_vm9, %v2270_v62  ;;  %v1534_v30 = vmul.f32 -1.442695, %v2266_v27  ;;  %v845_v16 = vsub.f32 1.0, %v844_v38  ;;  %v785_v39 = vsub.f32 1.0, %v784_v7  ;;  %1658 = vpow2.f32 %v1549_v4  ;;  %vm2303_vm10 = vmor %vm788_vm7, %vm789_vm6 }
  0xef   : > { %v1115_v53 = vpack.c.bf16 %v1083_v1, %v1083_v1  ;;  %vm849_vm8 = vweird.f32 %v2088_v24  ;;  %1660 = vpow2.f32 %v1526_v49  ;;  %v852_v52 = vand.u32 2147483647, %v2030_v22 }
  0xf0   : > { %v846_v21 = vmul.f32 %v2088_v24, %v845_v16  ;;  %v854_v61 = vand.u32 2147483648, %v2030_v22  ;;  %v786_v12 = vmul.f32 %v1655_v55, %v785_v39  ;;  %1662 = vpow2.f32 %v1534_v30 }
  0xf1   : > { %1212 = vrot.lane.b32.xlu0 %v1115_v53, %s1721_s29  ;;  %1148 = vst.msk [vmem:[%s1942_s28] sm:$0xf] %vm1147_vm9, %v1115_v53  ;;  %v2295_v46 = vadd.f32 %v1783_v20, %v447_v3  ;;  %v2298_v25 = vadd.f32 %v1783_v20, %v467_v37  ;;  %vm2307_vm11 = vcmp.eq.f32.partialorder %v792_v57, 8.507059e+37  ;;  %v795_v2 = vor.u32 1.1754944e-38, %v794_v14  ;;  %v470_v4 = vpop.f32.mrf.mxu3 }
  0xf2   : > { %v847_v47 = vadd.f32 %v2088_v24, %v846_v21  ;;  %vm848_vm12 = vweird.f32 %v2030_v22  ;;  %v787_v45 = vadd.f32 %v1655_v55, %v786_v12  ;;  %v855_v9 = vor.u32 1.1754944e-38, %v854_v61 }
  0xf3   : > { %vm850_vm13 = vmor %vm848_vm12, %vm849_vm8  ;;  %v1542_v13 = vmul.f32 -1.442695, %v2295_v46  ;;  %v1550_v56 = vmul.f32 -1.442695, %v2298_v25  ;;  %v1657_v44 = vpop.eup %1656  ;;  %vm853_vm14 = vcmp.eq.f32.partialorder %v852_v52, 8.507059e+37  ;;  %v2319_v18 = vadd.f32 %v1783_v20, %v410_v28 }
  0xf4   : > { %v851_v57 = vsel %vm850_vm13, %v2088_v24, %v847_v47  ;;  %1246 = vrot.lane.b32.xlu2 %v1984_v51, %s1721_s29  ;;  %v1659_v22 = vpop.eup %1658  ;;  %v791_v40 = vsel %vm2303_vm10, %v1655_v55, %v787_v45  ;;  %v2325_v19 = vadd.f32 1.0, %v1657_v44  ;;  %v2340_v0 = vadd.f32 %v1783_v20, %v430_v59 }
  0xf5   : > { %v856_v15 = vsel %vm853_vm14, %v855_v9, %v851_v57  ;;  %1664 = vpow2.f32 %v1542_v13  ;;  %v1661_v34 = vpop.eup %1660  ;;  %v796_v24 = vsel %vm2307_vm11, %v795_v2, %v791_v40  ;;  %v2329_v54 = vadd.f32 1.0, %v1659_v22 }
  0xf6   : > { %v1099_v60 = vmul.f32 %v856_v15, %v1816_v43  ;;  %1666 = vpow2.f32 %v1550_v56  ;;  %v1663_v51 = vpop.eup %1662  ;;  %v1095_v38 = vmul.f32 %v796_v24, %v2063_v48  ;;  %v912_v55 = vand.u32 2147483647, %v2325_v19 }
  0xf7   : > { %1668 = vrcp.f32 %v2325_v19  ;;  %v2337_v35 = vmul.f32 -1.442695, %v2319_v18  ;;  %v914_v3 = vand.u32 2147483648, %v2325_v19  ;;  %v2345_v7 = vadd.f32 1.0, %v1661_v34 }
  0xf8   : > { %1670 = vrcp.f32 %v2329_v54  ;;  %v2342_v43 = vpack.c.bf16 %v1095_v38, %v1095_v38  ;;  %v2350_v48 = vadd.f32 %v1783_v20, %v450_v5  ;;  %v1032_v14 = vand.u32 2147483647, %v2329_v54 }
  0xf9   : > { %1260 = vrot.lane.b32.xlu0 %v1934_v10, %s1721_s29  ;;  %v1034_v1 = vand.u32 2147483648, %v2329_v54  ;;  %v2354_v49 = vadd.f32 1.0, %v1663_v51  ;;  %v1131_v30 = vpack.c.bf16 %v1099_v60, %v1099_v60  ;;  %vm908_vm15 = vweird.f32 %v2325_v19 }
  0xfa   : > { %1160 = vst.msk [vmem:[%s1942_s28 + $0x30] sm:$0xf] %vm1147_vm9, %v2342_v43  ;;  %vm1028_vm0 = vweird.f32 %v2329_v54  ;;  %1672 = vrcp.f32 %v2345_v7  ;;  %v2363_v10 = vadd.f32 %v1783_v20, %v470_v4  ;;  %vm2365_vm1 = vcmp.eq.f32.partialorder %v912_v55, 8.507059e+37 }
  0xfb   : > { %v1665_v16 = vpop.eup %1664  ;;  %v687_v53 = vand.u32 2147483647, %v2345_v7  ;;  %v689_v21 = vand.u32 2147483648, %v2345_v7  ;;  %1674 = vrcp.f32 %v2354_v49  ;;  %1244 = vrot.lane.b32.xlu1 %v1131_v30, %s1721_s29  ;;  %1164 = vst.msk [vmem:[%s1942_s28 + $0x40] sm:$0xf] %vm1147_vm9, %v1131_v30  ;;  %v809_v61 = vand.u32 2147483648, %v2354_v49 }
  0xfc   : > { %v1667_v37 = vpop.eup %1666  ;;  %1264 = vrot.lane.b32.xlu2 %v2153_v11, %s1721_s29  ;;  %v807_v52 = vand.u32 2147483647, %v2354_v49  ;;  %v2379_v12 = vadd.f32 1.0, %v1665_v16  ;;  %v915_v2 = vor.u32 1.1754944e-38, %v914_v3  ;;  %vm2384_vm2 = vcmp.eq.f32.partialorder %v1032_v14, 8.507059e+37 }
  0xfd   : > { %v1669_v20 = vpop.eup %1668  ;;  %v2381_v28 = vadd.f32 1.0, %v1667_v37  ;;  %v1035_v45 = vor.u32 1.1754944e-38, %v1034_v1  ;;  %vm683_vm3 = vweird.f32 %v2345_v7  ;;  %vm803_vm7 = vweird.f32 %v2354_v49 }
  0xfe   : > { %v1671_v8 = vpop.eup %1670  ;;  %v904_v63 = vmul.f32 %v1669_v20, %v2325_v19  ;;  %1676 = vrcp.f32 %v2379_v12  ;;  %vm909_vm4 = vweird.f32 %v1669_v20  ;;  %vm2392_vm5 = vcmp.eq.f32.partialorder %v687_v53, 8.507059e+37 }
  0xff   : > { %v1024_v11 = vmul.f32 %v1671_v8, %v2329_v54  ;;  %v690_v56 = vor.u32 1.1754944e-38, %v689_v21  ;;  %v929_v44 = vand.u32 2147483648, %v2379_v12  ;;  %vm1029_vm6 = vweird.f32 %v1671_v8  ;;  %vm2410_vm11 = vmor %vm908_vm15, %vm909_vm4 }
 0x100   : > { %v905_v9 = vsub.f32 1.0, %v904_v63  ;;  %v1673_v57 = vpop.eup %1672  ;;  %vm2397_vm8 = vcmp.eq.f32.partialorder %v807_v52, 8.507059e+37  ;;  %v810_v15 = vor.u32 1.1754944e-38, %v809_v61  ;;  %1678 = vrcp.f32 %v2381_v28  ;;  %vm2419_vm13 = vmor %vm1028_vm0, %vm1029_vm6 }
 0x101   : > { %v1025_v22 = vsub.f32 1.0, %v1024_v11  ;;  %1214 = vrot.lane.b32.xlu0 %v1961_v23, %s1721_s29  ;;  %v1675_v59 = vpop.eup %1674  ;;  %v679_v24 = vmul.f32 %v1673_v57, %v2345_v7  ;;  %vm923_vm10 = vweird.f32 %v2379_v12  ;;  %v927_v60 = vand.u32 2147483647, %v2379_v12 }
 0x102   : > { %v906_v34 = vmul.f32 %v1669_v20, %v905_v9  ;;  %vm684_vm12 = vweird.f32 %v1673_v57  ;;  %v799_v38 = vmul.f32 %v1675_v59, %v2354_v49  ;;  %v1047_v23 = vand.u32 2147483647, %v2381_v28 }
 0x103   : > { %v1026_v51 = vmul.f32 %v1671_v8, %v1025_v22  ;;  %v680_v3 = vsub.f32 1.0, %v679_v24  ;;  %vm804_vm14 = vweird.f32 %v1675_v59  ;;  %v930_v19 = vor.u32 1.1754944e-38, %v929_v44  ;;  %1262 = vrot.lane.b32.xlu1 %v2014_v6, %s1721_s29  ;;  %vm2443_vm0 = vmor %vm683_vm3, %vm684_vm12 }
 0x104   : > { %v907_v55 = vadd.f32 %v1669_v20, %v906_v34  ;;  %1234 = vrot.lane.b32.xlu2 %v2180_v42, %s1721_s29  ;;  %v1677_v14 = vpop.eup %1676  ;;  %v800_v30 = vsub.f32 1.0, %v799_v38  ;;  %vm1043_vm15 = vweird.f32 %v2381_v28  ;;  %v1049_v54 = vand.u32 2147483648, %v2381_v28 }
 0x105   : > { %v1027_v1 = vadd.f32 %v1671_v8, %v1026_v51  ;;  %1680 = vpow2.f32 %v2337_v35  ;;  %v681_v37 = vmul.f32 %v1673_v57, %v680_v3  ;;  %v919_v53 = vmul.f32 %v1677_v14, %v2379_v12 }
 0x106   : > { %v911_v16 = vsel %vm2410_vm11, %v1669_v20, %v907_v55  ;;  %v1535_v6 = vmul.f32 -1.442695, %v2340_v0  ;;  %v2434_v21 = vpop.eup %1678  ;;  %v801_v20 = vmul.f32 %v1675_v59, %v800_v30  ;;  %vm924_vm4 = vweird.f32 %v1677_v14 }
 0x107   : > { %v916_v42 = vsel %vm2365_vm1, %v915_v2, %v911_v16  ;;  %v1031_v52 = vsel %vm2419_vm13, %v1671_v8, %v1027_v1  ;;  %v682_v11 = vadd.f32 %v1673_v57, %v681_v37  ;;  %vm2453_vm1 = vmor %vm803_vm7, %vm804_vm14  ;;  %v920_v7 = vsub.f32 1.0, %v919_v53 }
 0x108   : > { %v1103_v61 = vmul.f32 %v916_v42, %v2256_v36  ;;  %v1036_v63 = vsel %vm2384_vm2, %v1035_v45, %v1031_v52  ;;  %v802_v2 = vadd.f32 %v1675_v59, %v801_v20  ;;  %v1039_v9 = vmul.f32 %v2434_v21, %v2381_v28  ;;  %vm925_vm2 = vmor %vm923_vm10, %vm924_vm4  ;;  %v472_v20 = vpop.f32.mrf.mxu3 }
 0x109   : > { %v1111_v8 = vmul.f32 %v1036_v63, %v2259_v29  ;;  %vm1044_vm3 = vweird.f32 %v2434_v21  ;;  %1230 = vrot.lane.b32.xlu0 %v1963_v33, %s1721_s29  ;;  %v686_v49 = vsel %vm2443_vm0, %v1673_v57, %v682_v11  ;;  %v921_v47 = vmul.f32 %v1677_v14, %v920_v7 }
 0x10a   : > { %v1135_v36 = vpack.c.bf16 %v1103_v61, %v1103_v61  ;;  %1682 = vpow2.f32 %v1535_v6  ;;  %v691_v29 = vsel %vm2392_vm5, %v690_v56, %v686_v49  ;;  %v806_v22 = vsel %vm2453_vm1, %v1675_v59, %v802_v2  ;;  %vm1045_vm5 = vmor %vm1043_vm15, %vm1044_vm3 }
 0x10b   : > { %v1681_v45 = vpop.eup %1680  ;;  %v2465_v44 = vpack.c.bf16 %v1111_v8, %v1111_v8  ;;  %v1040_v34 = vsub.f32 1.0, %v1039_v9  ;;  %v1088_v33 = vmul.f32 %v691_v29, %v2263_v17  ;;  %v811_v24 = vsel %vm2397_vm8, %v810_v15, %v806_v22  ;;  %1216 = vrot.lane.b32.xlu1 %v2032_v26, %s1721_s29  ;;  %v412_v15 = vpop.f32.mrf.mxu0 }
 0x10c   : > { %1168 = vst.msk [vmem:[%s1942_s28 + $0x50] sm:$0xf] %vm1147_vm9, %v1135_v36  ;;  %v922_v57 = vadd.f32 %v1677_v14, %v921_v47  ;;  %v2476_v5 = vadd.f32 1.0, %v1681_v45  ;;  %v1096_v13 = vmul.f32 %v811_v24, %v2266_v27  ;;  %v1543_v56 = vmul.f32 -1.442695, %v2350_v48  ;;  %1220 = vrot.lane.b32.xlu2 %v2270_v62, %s1721_s29 }
 0x10d   : > { %1176 = vst.msk [vmem:[%s1942_s28 + $0x70] sm:$0xf] %vm1147_vm9, %v2465_v44  ;;  %v1041_v17 = vmul.f32 %v2434_v21, %v1040_v34  ;;  %v1551_v40 = vmul.f32 -1.442695, %v2363_v10  ;;  %v2492_v26 = vpack.c.bf16 %v1088_v33, %v1088_v33  ;;  %vm928_vm7 = vcmp.eq.f32.partialorder %v927_v60, 8.507059e+37 }
 0x10e   : > { %v926_v59 = vsel %vm925_vm2, %v1677_v14, %v922_v57  ;;  %1684 = vrcp.f32 %v2476_v5  ;;  %v2497_v27 = vpack.c.bf16 %v1096_v13, %v1096_v13  ;;  %v1050_v12 = vor.u32 1.1754944e-38, %v1049_v54  ;;  %v1712_v60 = vld [vmem:[%s2801_s2] ss:$0 sm:$0xff]  ;;  %v452_v54 = vpop.f32.mrf.mxu2 }
 0x10f   : > { %v931_v51 = vsel %vm928_vm7, %v930_v19, %v926_v59  ;;  %v1042_v38 = vadd.f32 %v2434_v21, %v1041_v17  ;;  %1153 = vst.msk [vmem:[%s1942_s28 + $0x14] sm:$0xf] %vm1147_vm9, %v2492_v26  ;;  %1686 = vpow2.f32 %v1543_v56  ;;  %v2511_v4 = vadd.f32 %v1712_v60, %v412_v15  ;;  %v432_v19 = vpop.f32.mrf.mxu1 }
 0x110   : > { %v1683_v55 = vpop.eup %1682  ;;  %v1104_v62 = vmul.f32 %v931_v51, %v2295_v46  ;;  %1161 = vst.msk [vmem:[%s1942_s28 + $0x34] sm:$0xf] %vm1147_vm9, %v2497_v27  ;;  %vm1048_vm6 = vcmp.eq.f32.partialorder %v1047_v23, 8.507059e+37  ;;  %1688 = vpow2.f32 %v1551_v40  ;;  %v2531_v23 = vadd.f32 %v1712_v60, %v432_v19 }
 0x111   : > { %v1046_v3 = vsel %vm1045_vm5, %v2434_v21, %v1042_v38  ;;  %v2519_v46 = vadd.f32 1.0, %v1683_v55  ;;  %1248 = vrot.lane.b32.xlu0 %v2147_v31, %s1721_s29  ;;  %v1528_v30 = vmul.f32 -1.442695, %v2511_v4  ;;  %v2538_v53 = vadd.f32 %v1712_v60, %v452_v54 }
 0x112   : > { %v2523_v14 = vpack.c.bf16 %v1104_v62, %v1104_v62  ;;  %v1051_v1 = vsel %vm1048_vm6, %v1050_v12, %v1046_v3  ;;  %vm698_vm8 = vweird.f32 %v2476_v5  ;;  %v704_v6 = vand.u32 2147483648, %v2476_v5 }
 0x113   : > { %v1112_v16 = vmul.f32 %v1051_v1, %v2298_v25  ;;  %1690 = vrcp.f32 %v2519_v46  ;;  %1232 = vrot.lane.b32.xlu1 %v2071_v50, %s1721_s29  ;;  %v1536_v21 = vmul.f32 -1.442695, %v2531_v23  ;;  %v702_v52 = vand.u32 2147483647, %v2476_v5 }
 0x114   : > { %v1685_v28 = vpop.eup %1684  ;;  %1169 = vst.msk [vmem:[%s1942_s28 + $0x54] sm:$0xf] %vm1147_vm9, %v2523_v14  ;;  %1692 = vpow2.f32 %v1528_v30  ;;  %1252 = vrot.lane.b32.xlu2 %v1135_v36, %s1721_s29  ;;  %v822_v61 = vand.u32 2147483647, %v2519_v46  ;;  %v824_v7 = vand.u32 2147483648, %v2519_v46  ;;  %v705_v36 = vor.u32 1.1754944e-38, %v704_v6 }
 0x115   : > { %v2535_v31 = vpack.c.bf16 %v1112_v16, %v1112_v16  ;;  %v694_v37 = vmul.f32 %v1685_v28, %v2476_v5  ;;  %v1687_v25 = vpop.eup %1686  ;;  %vm699_vm10 = vweird.f32 %v1685_v28  ;;  %1694 = vpow2.f32 %v1536_v21 }
 0x116   : > { %v1689_v42 = vpop.eup %1688  ;;  %v2548_v35 = vadd.f32 1.0, %v1687_v25  ;;  %v1544_v8 = vmul.f32 -1.442695, %v2538_v53  ;;  %vm2560_vm11 = vmor %vm698_vm8, %vm699_vm10  ;;  %v2566_v47 = vadd.f32 %v1712_v60, %v472_v20  ;;  %vm703_vm12 = vcmp.eq.f32.partialorder %v702_v52, 8.507059e+37 }
 0x117   : > { %1177 = vst.msk [vmem:[%s1942_s28 + $0x74] sm:$0xf] %vm1147_vm9, %v2535_v31  ;;  %v695_v50 = vsub.f32 1.0, %v694_v37  ;;  %v2551_v63 = vadd.f32 1.0, %v1689_v42  ;;  %vm818_vm13 = vweird.f32 %v2519_v46  ;;  %vm2570_vm15 = vcmp.eq.f32.partialorder %v822_v61, 8.507059e+37 }
 0x118   : > { %1696 = vrcp.f32 %v2548_v35  ;;  %v825_v24 = vor.u32 1.1754944e-38, %v824_v7  ;;  %v944_v57 = vand.u32 2147483648, %v2548_v35  ;;  %v1552_v56 = vmul.f32 -1.442695, %v2566_v47 }
 0x119   : > { %v1691_v11 = vpop.eup %1690  ;;  %v696_v39 = vmul.f32 %v1685_v28, %v695_v50  ;;  %1266 = vrot.lane.b32.xlu0 %v2233_v32, %s1721_s29  ;;  %1698 = vrcp.f32 %v2551_v63  ;;  %v942_v32 = vand.u32 2147483647, %v2548_v35  ;;  %vm938_vm4 = vweird.f32 %v2548_v35 }
 0x11a   : > { %v1693_v2 = vpop.eup %1692  ;;  %v814_v49 = vmul.f32 %v1691_v11, %v2519_v46  ;;  %vm819_vm14 = vweird.f32 %v1691_v11  ;;  %1700 = vpow2.f32 %v1544_v8  ;;  %vm1058_vm3 = vweird.f32 %v2551_v63 }
 0x11b   : > { %v697_v45 = vadd.f32 %v1685_v28, %v696_v39  ;;  %v2574_v34 = vadd.f32 1.0, %v1693_v2  ;;  %1218 = vrot.lane.b32.xlu1 %v2177_v58, %s1721_s29  ;;  %v1695_v5 = vpop.eup %1694  ;;  %vm2589_vm0 = vmor %vm818_vm13, %vm819_vm14  ;;  %vm2594_vm1 = vcmp.eq.f32.partialorder %v942_v32, 8.507059e+37  ;;  %v1062_v38 = vand.u32 2147483647, %v2551_v63 }
 0x11c   : > { %v815_v29 = vsub.f32 1.0, %v814_v49  ;;  %1222 = vrot.lane.b32.xlu2 %v2492_v26, %s1721_s29  ;;  %v2601_v55 = vadd.f32 1.0, %v1695_v5  ;;  %v945_v12 = vor.u32 1.1754944e-38, %v944_v57  ;;  %v1064_v3 = vand.u32 2147483648, %v2551_v63 }
 0x11d   : > { %v701_v33 = vsel %vm2560_vm11, %v1685_v28, %v697_v45  ;;  %1702 = vrcp.f32 %v2574_v34  ;;  %v717_v16 = vand.u32 2147483647, %v2574_v34  ;;  %v719_v25 = vand.u32 2147483648, %v2574_v34 }
 0x11e   : > { %v706_v13 = vsel %vm703_vm12, %v705_v36, %v701_v33  ;;  %v816_v17 = vmul.f32 %v1691_v11, %v815_v29  ;;  %v1697_v40 = vpop.eup %1696  ;;  %1704 = vrcp.f32 %v2601_v55  ;;  %vm2630_vm6 = vcmp.eq.f32.partialorder %v1062_v38, 8.507059e+37 }
 0x11f   : > { %v1089_v58 = vmul.f32 %v706_v13, %v2319_v18  ;;  %v1699_v59 = vpop.eup %1698  ;;  %v934_v18 = vmul.f32 %v1697_v40, %v2548_v35  ;;  %vm939_vm2 = vweird.f32 %v1697_v40  ;;  %vm713_vm10 = vweird.f32 %v2574_v34 }
 0x120   : > { %v817_v51 = vadd.f32 %v1691_v11, %v816_v17  ;;  %v1054_v60 = vmul.f32 %v1699_v59, %v2551_v63  ;;  %v1701_v1 = vpop.eup %1700  ;;  %vm1059_vm7 = vweird.f32 %v1699_v59  ;;  %vm2626_vm5 = vmor %vm938_vm4, %vm939_vm2  ;;  %vm2644_vm12 = vcmp.eq.f32.partialorder %v717_v16, 8.507059e+37 }
 0x121   : > { %v2603_v62 = vpack.c.bf16 %v1089_v58, %v1089_v58  ;;  %1236 = vrot.lane.b32.xlu0 %v2342_v43, %s1721_s29  ;;  %v935_v19 = vsub.f32 1.0, %v934_v18  ;;  %v2620_v6 = vadd.f32 1.0, %v1701_v1  ;;  %vm2638_vm8 = vmor %vm1058_vm3, %vm1059_vm7  ;;  %v720_v8 = vor.u32 1.1754944e-38, %v719_v25 }
 0x122   : > { %v821_v46 = vsel %vm2589_vm0, %v1691_v11, %v817_v51  ;;  %v1055_v54 = vsub.f32 1.0, %v1054_v60  ;;  %vm833_vm13 = vweird.f32 %v2601_v55  ;;  %v837_v22 = vand.u32 2147483647, %v2601_v55 }
 0x123   : > { %1154 = vst.msk [vmem:[%s1942_s28 + $0x18] sm:$0xf] %vm1147_vm9, %v2603_v62  ;;  %v826_v30 = vsel %vm2570_vm15, %v825_v24, %v821_v46  ;;  %v1703_v28 = vpop.eup %1702  ;;  %v936_v37 = vmul.f32 %v1697_v40, %v935_v19  ;;  %1250 = vrot.lane.b32.xlu1 %v2212_v41, %s1721_s29  ;;  %1706 = vrcp.f32 %v2620_v6  ;;  %v839_v33 = vand.u32 2147483648, %v2601_v55 }
 0x124   : > { %v1097_v43 = vmul.f32 %v826_v30, %v2340_v0  ;;  %v1056_v42 = vmul.f32 %v1699_v59, %v1055_v54  ;;  %v1065_v0 = vor.u32 1.1754944e-38, %v1064_v3  ;;  %v709_v52 = vmul.f32 %v1703_v28, %v2574_v34  ;;  %v1705_v7 = vpop.eup %1704 }
 0x125   : > { %v937_v61 = vadd.f32 %v1697_v40, %v936_v37  ;;  %vm714_vm11 = vweird.f32 %v1703_v28  ;;  %1708 = vpow2.f32 %v1552_v56  ;;  %v829_v49 = vmul.f32 %v1705_v7, %v2601_v55 }
 0x126   : > { %v1129_v20 = vpack.c.bf16 %v1097_v43, %v1097_v43  ;;  %v1057_v35 = vadd.f32 %v1699_v59, %v1056_v42  ;;  %v710_v11 = vsub.f32 1.0, %v709_v52  ;;  %vm2667_vm14 = vmor %vm713_vm10, %vm714_vm11  ;;  %vm834_vm15 = vweird.f32 %v1705_v7 }
 0x127   : > { %v941_v63 = vsel %vm2626_vm5, %v1697_v40, %v937_v61  ;;  %vm2685_vm0 = vmor %vm833_vm13, %vm834_vm15  ;;  %vm2689_vm4 = vcmp.eq.f32.partialorder %v837_v22, 8.507059e+37  ;;  %v840_v15 = vor.u32 1.1754944e-38, %v839_v33  ;;  %v957_v38 = vand.u32 2147483647, %v2620_v6 }
 0x128   : > { %1162 = vst.msk [vmem:[%s1942_s28 + $0x38] sm:$0xf] %vm1147_vm9, %v1129_v20  ;;  %1240 = vrot.lane.b32.xlu2 %v1129_v20, %s1721_s29  ;;  %v946_v2 = vsel %vm2594_vm1, %v945_v12, %v941_v63  ;;  %v1061_v9 = vsel %vm2638_vm8, %v1699_v59, %v1057_v35  ;;  %v711_v36 = vmul.f32 %v1703_v28, %v710_v11  ;;  %vm953_vm1 = vweird.f32 %v2620_v6 }
 0x129   : > { %1254 = vrot.lane.b32.xlu0 %v2523_v14, %s1721_s29  ;;  %v1105_v45 = vmul.f32 %v946_v2, %v2350_v48  ;;  %v1066_v32 = vsel %vm2630_vm6, %v1065_v0, %v1061_v9  ;;  %v830_v48 = vsub.f32 1.0, %v829_v49  ;;  %v1707_v57 = vpop.eup %1706  ;;  %v959_v55 = vand.u32 2147483648, %v2620_v6 }
 0x12a   : > { %v1113_v24 = vmul.f32 %v1066_v32, %v2363_v10  ;;  %v712_v14 = vadd.f32 %v1703_v28, %v711_v36  ;;  %v949_v56 = vmul.f32 %v1707_v57, %v2620_v6  ;;  %vm954_vm3 = vweird.f32 %v1707_v57 }
 0x12b   : > { %v1137_v5 = vpack.c.bf16 %v1105_v45, %v1105_v45  ;;  %1268 = vrot.lane.b32.xlu1 %v2465_v44, %s1721_s29  ;;  %v831_v17 = vmul.f32 %v1705_v7, %v830_v48  ;;  %v1709_v40 = vpop.eup %1708  ;;  %vm955_vm2 = vmor %vm953_vm1, %vm954_vm3  ;;  %v960_v1 = vor.u32 1.1754944e-38, %v959_v55  ;;  %vm958_vm7 = vcmp.eq.f32.partialorder %v957_v38, 8.507059e+37 }
 0x12c   : > { %v1145_v34 = vpack.c.bf16 %v1113_v24, %v1113_v24  ;;  %v716_v13 = vsel %vm2667_vm14, %v1703_v28, %v712_v14  ;;  %v950_v51 = vsub.f32 1.0, %v949_v56  ;;  %v602_v18 = vadd.f32 1.0, %v1709_v40 }
 0x12d   : > { %1170 = vst.msk [vmem:[%s1942_s28 + $0x58] sm:$0xf] %vm1147_vm9, %v1137_v5  ;;  %v721_v10 = vsel %vm2644_vm12, %v720_v8, %v716_v13  ;;  %v832_v59 = vadd.f32 %v1705_v7, %v831_v17 }
 0x12e   : > { %1178 = vst.msk [vmem:[%s1942_s28 + $0x78] sm:$0xf] %vm1147_vm9, %v1145_v34  ;;  %v1090_v26 = vmul.f32 %v721_v10, %v2511_v4  ;;  %v951_v3 = vmul.f32 %v1707_v57, %v950_v51  ;;  %1710 = vrcp.f32 %v602_v18  ;;  %v1079_v25 = vand.u32 2147483648, %v602_v18 }
 0x12f   : > { %v836_v60 = vsel %vm2685_vm0, %v1705_v7, %v832_v59  ;;  %vm1073_vm5 = vweird.f32 %v602_v18  ;;  %v1077_v6 = vand.u32 2147483647, %v602_v18 }
 0x130   : > { %v1122_v12 = vpack.c.bf16 %v1090_v26, %v1090_v26  ;;  %v841_v4 = vsel %vm2689_vm4, %v840_v15, %v836_v60  ;;  %v952_v19 = vadd.f32 %v1707_v57, %v951_v3 }
 0x131   : > { %1224 = vrot.lane.b32.xlu0 %v2603_v62, %s1721_s29  ;;  %v1098_v46 = vmul.f32 %v841_v4, %v2531_v23  ;;  %vm1078_vm10 = vcmp.eq.f32.partialorder %v1077_v6, 8.507059e+37 }
 0x132   : > { %1155 = vst.msk [vmem:[%s1942_s28 + $0x1c] sm:$0xf] %vm1147_vm9, %v1122_v12  ;;  %v956_v54 = vsel %vm955_vm2, %v1707_v57, %v952_v19 }
 0x133   : > { %1238 = vrot.lane.b32.xlu1 %v2497_v27, %s1721_s29  ;;  %v1130_v30 = vpack.c.bf16 %v1098_v46, %v1098_v46  ;;  %v961_v16 = vsel %vm958_vm7, %v960_v1, %v956_v54 }
 0x134   : > { %v1711_v28 = vpop.eup %1710  ;;  %v1106_v62 = vmul.f32 %v961_v16, %v2538_v53  ;;  %v1080_v53 = vor.u32 1.1754944e-38, %v1079_v25 }
 0x135   : > { %1163 = vst.msk [vmem:[%s1942_s28 + $0x3c] sm:$0xf] %vm1147_vm9, %v1130_v30  ;;  %v1069_v43 = vmul.f32 %v1711_v28, %v602_v18  ;;  %vm1074_vm6 = vweird.f32 %v1711_v28 }
 0x136   : > { %v1138_v37 = vpack.c.bf16 %v1106_v62, %v1106_v62  ;;  %vm1075_vm8 = vmor %vm1073_vm5, %vm1074_vm6 }
 0x137   : > { %v1070_v23 = vsub.f32 1.0, %v1069_v43 }
 0x138   : > { %1171 = vst.msk [vmem:[%s1942_s28 + $0x5c] sm:$0xf] %vm1147_vm9, %v1138_v37  ;;  %1258 = vrot.lane.b32.xlu2 %v1138_v37, %s1721_s29 }
 0x139   : > { %1242 = vrot.lane.b32.xlu0 %v1130_v30, %s1721_s29  ;;  %v1071_v27 = vmul.f32 %v1711_v28, %v1070_v23 }
 0x13b   : > { %1256 = vrot.lane.b32.xlu1 %v1137_v5, %s1721_s29  ;;  %v1072_v21 = vadd.f32 %v1711_v28, %v1071_v27 }
 0x13d   : > { %v1076_v42 = vsel %vm1075_vm8, %v1711_v28, %v1072_v21 }
 0x13e   : > { %v1081_v50 = vsel %vm1078_vm10, %v1080_v53, %v1076_v42 }
 0x13f   : > { %v1114_v0 = vmul.f32 %v1081_v50, %v2566_v47 }
 0x140   : > { %1270 = vrot.lane.b32.xlu2 %v2535_v31, %s1721_s29 }
 0x141   : > { %1272 = vrot.lane.b32.xlu0 %v1145_v34, %s1721_s29  ;;  %v1146_v52 = vpack.c.bf16 %v1114_v0, %v1114_v0 }
 0x143   : > { %1226 = vrot.lane.b32.xlu1 %v1122_v12, %s1721_s29  ;;  %1179 = vst.msk [vmem:[%s1942_s28 + $0x7c] sm:$0xf] %vm1147_vm9, %v1146_v52 }
 0x146   : > { %v1229_v47 = vpop.permute.xlu2 %1228 }
 0x147   : > { %1316 = vst.msk [vmem:[%s2727_s8 + $0x20] sm:$0xf] %vm1147_vm9, %v1229_v47 }
 0x14b   : > { %1274 = vrot.lane.b32.xlu1 %v1146_v52, %s1721_s29 }
 0x14e   : > { %v1247_v31 = vpop.permute.xlu2 %1246 }
 0x14f   : > { %1325 = vst.msk [vmem:[%s2727_s8 + $0x44] sm:$0xf] %vm1147_vm9, %v1247_v31 }
 0x156   : > { %v1265_v20 = vpop.permute.xlu2 %1264 }
 0x157   : > { %1334 = vst.msk [vmem:[%s2727_s8 + $0x68] sm:$0xf] %vm1147_vm9, %v1265_v20 }
 0x15e   : > { %v1235_v61 = vpop.permute.xlu2 %1234 }
 0x15f   : > { %1319 = vst.msk [vmem:[%s2727_s8 + $0x2c] sm:$0xf] %vm1147_vm9, %v1235_v61 }
 0x163   : > { %v1213_v41 = vpop.permute.xlu0 %1212 }
 0x164   : > { %1308 = vst.msk [vmem:[%s2727_s8] sm:$0xf] %vm1147_vm9, %v1213_v41 }
 0x166   : > { %v1221_v35 = vpop.permute.xlu2 %1220 }
 0x167   : > { %1312 = vst.msk [vmem:[%s2727_s8 + $0x10] sm:$0xf] %vm1147_vm9, %v1221_v35 }
 0x16b   : > { %v1261_v11 = vpop.permute.xlu0 %1260 }
 0x16c   : > { %1332 = vst.msk [vmem:[%s2727_s8 + $0x60] sm:$0xf] %vm1147_vm9, %v1261_v11 }
 0x16d   : > { %v1245_v39 = vpop.permute.xlu1 %1244 }
 0x16e   : > { %1324 = vst.msk [vmem:[%s2727_s8 + $0x40] sm:$0xf] %vm1147_vm9, %v1245_v39  ;;  %v1253_v7 = vpop.permute.xlu2 %1252 }
 0x16f   : > { %1328 = vst.msk [vmem:[%s2727_s8 + $0x50] sm:$0xf] %vm1147_vm9, %v1253_v7 }
 0x173   : > { %v1215_v63 = vpop.permute.xlu0 %1214 }
 0x174   : > { %1309 = vst.msk [vmem:[%s2727_s8 + $0x4] sm:$0xf] %vm1147_vm9, %v1215_v63 }
 0x175   : > { %v1263_v8 = vpop.permute.xlu1 %1262 }
 0x176   : > { %1333 = vst.msk [vmem:[%s2727_s8 + $0x64] sm:$0xf] %vm1147_vm9, %v1263_v8  ;;  %v1223_v2 = vpop.permute.xlu2 %1222 }
 0x177   : > { %1313 = vst.msk [vmem:[%s2727_s8 + $0x14] sm:$0xf] %vm1147_vm9, %v1223_v2 }
 0x17b   : > { %v1231_v9 = vpop.permute.xlu0 %1230 }
 0x17c   : > { %1317 = vst.msk [vmem:[%s2727_s8 + $0x24] sm:$0xf] %vm1147_vm9, %v1231_v9 }
 0x17d   : > { %v1217_v36 = vpop.permute.xlu1 %1216 }
 0x17e   : > { %1310 = vst.msk [vmem:[%s2727_s8 + $0x8] sm:$0xf] %vm1147_vm9, %v1217_v36 }
 0x182   : > { %v1241_v49 = vpop.permute.xlu2 %1240 }
 0x183   : > { %v1249_v45 = vpop.permute.xlu0 %1248  ;;  %1322 = vst.msk [vmem:[%s2727_s8 + $0x38] sm:$0xf] %vm1147_vm9, %v1241_v49 }
 0x184   : > { %1326 = vst.msk [vmem:[%s2727_s8 + $0x48] sm:$0xf] %vm1147_vm9, %v1249_v45 }
 0x185   : > { %v1233_v32 = vpop.permute.xlu1 %1232 }
 0x186   : > { %1318 = vst.msk [vmem:[%s2727_s8 + $0x28] sm:$0xf] %vm1147_vm9, %v1233_v32 }
 0x18b   : > { %v1267_v29 = vpop.permute.xlu0 %1266 }
 0x18c   : > { %1335 = vst.msk [vmem:[%s2727_s8 + $0x6c] sm:$0xf] %vm1147_vm9, %v1267_v29 }
 0x18d   : > { %v1219_v22 = vpop.permute.xlu1 %1218 }
 0x18e   : > { %1311 = vst.msk [vmem:[%s2727_s8 + $0xc] sm:$0xf] %vm1147_vm9, %v1219_v22 }
 0x192   : > { %v1259_v24 = vpop.permute.xlu2 %1258 }
 0x193   : > { %v1237_v33 = vpop.permute.xlu0 %1236  ;;  %1331 = vst.msk [vmem:[%s2727_s8 + $0x5c] sm:$0xf] %vm1147_vm9, %v1259_v24 }
 0x194   : > { %1320 = vst.msk [vmem:[%s2727_s8 + $0x30] sm:$0xf] %vm1147_vm9, %v1237_v33 }
 0x195   : > { %v1251_v14 = vpop.permute.xlu1 %1250 }
 0x196   : > { %1327 = vst.msk [vmem:[%s2727_s8 + $0x4c] sm:$0xf] %vm1147_vm9, %v1251_v14 }
 0x19a   : > { %v1271_v57 = vpop.permute.xlu2 %1270 }
 0x19b   : > { %v1255_v48 = vpop.permute.xlu0 %1254  ;;  %1337 = vst.msk [vmem:[%s2727_s8 + $0x74] sm:$0xf] %vm1147_vm9, %v1271_v57 }
 0x19c   : > { %1329 = vst.msk [vmem:[%s2727_s8 + $0x54] sm:$0xf] %vm1147_vm9, %v1255_v48 }
 0x19d   : > { %v1269_v5 = vpop.permute.xlu1 %1268 }
 0x19e   : > { %1336 = vst.msk [vmem:[%s2727_s8 + $0x70] sm:$0xf] %vm1147_vm9, %v1269_v5 }
 0x1a3   : > { %v1225_v34 = vpop.permute.xlu0 %1224 }
 0x1a4   : > { %1314 = vst.msk [vmem:[%s2727_s8 + $0x18] sm:$0xf] %vm1147_vm9, %v1225_v34 }
 0x1a5   : > { %v1239_v13 = vpop.permute.xlu1 %1238 }
 0x1a6   : > { %1321 = vst.msk [vmem:[%s2727_s8 + $0x34] sm:$0xf] %vm1147_vm9, %v1239_v13 }
 0x1ab   : > { %v1243_v17 = vpop.permute.xlu0 %1242 }
 0x1ac   : > { %1323 = vst.msk [vmem:[%s2727_s8 + $0x3c] sm:$0xf] %vm1147_vm9, %v1243_v17 }
 0x1ad   : > { %v1257_v56 = vpop.permute.xlu1 %1256 }
 0x1ae   : > { %1330 = vst.msk [vmem:[%s2727_s8 + $0x58] sm:$0xf] %vm1147_vm9, %v1257_v56 }
 0x1b3   : > { %v1273_v40 = vpop.permute.xlu0 %1272 }
 0x1b4   : > { %1338 = vst.msk [vmem:[%s2727_s8 + $0x78] sm:$0xf] %vm1147_vm9, %v1273_v40 }
 0x1b5   : > { %v1227_v10 = vpop.permute.xlu1 %1226 }
 0x1b6   : > { %1315 = vst.msk [vmem:[%s2727_s8 + $0x1c] sm:$0xf] %vm1147_vm9, %v1227_v10 }
 0x1bd   : > { %v1275_v58 = vpop.permute.xlu1 %1274 }
 0x1be   : > { %1339 = vst.msk [vmem:[%s2727_s8 + $0x7c] sm:$0xf] %vm1147_vm9, %v1275_v58 }
 0x1bf PF: > { %s15_s15 = sadd.s32 1, %s1719_s15  }
 0x1c0   : > { %p12_p4 = scmp.ge.s32.totalorder %s15_s15, 4  }
 0x1c2   :  { %14 = sbr.rel (!%p12_p4) target bundleno = 1 (0x1), region = 74 }

// kernel: c3_forward.4
= control target key start
LH: loop header
LB: loop body
LE: loop exit
PB: predicated region body
PF: predicated region fallthrough
CT: control target
= control target key end

     0   :  { %s2495_s18 = smov 0   ;;  %s2497_s19 = smov 0   ;;  %s3377_s0 = inlined_call_operand.vmem [shape: bf16[2,16,16,4], index: 0, kind: input, shape index: {}]   ;;  %s3378_s1 = inlined_call_operand.vmem [shape: bf16[4,4], index: 1, kind: input, shape index: {}]   ;;  %s3379_s2 = inlined_call_operand.vmem [shape: f32[1,4], index: 2, kind: input, shape index: {}]   ;;  %s3380_s3 = inlined_call_operand.vmem [shape: bf16[3,12,4], index: 3, kind: input, shape index: {}]   ;;  %s3381_s4 = inlined_call_operand.vmem [shape: f32[1,4], index: 4, kind: input, shape index: {}]   ;;  %s3382_s5 = inlined_call_operand.vmem [shape: bf16[2,16,16,4], index: 5, kind: output, shape index: {}]  }
   0x1   :  { %s2499_s20 = smov 0   ;;  %s2501_s21 = smov 0  }
   0x2   :  { %s2503_s22 = smov 0  }
   0x3 LB: > { %s24_s23 = sadd.s32 1, %s2453_s20  ;;  %s27_s24 = sadd.s32 1, %s2457_s21  ;;  %s2461_s22 = sphi %s2503_s22, %s15_s22   ;;  %s2457_s21 = sphi %s2501_s21, %s3408_s21   ;;  %s2453_s20 = sphi %s2499_s20, %s3407_s20   ;;  %s2449_s19 = sphi %s2497_s19, %s3406_s19   ;;  %s2445_s18 = sphi %s2495_s18, %s3405_s18  }
   0x4   : > { %p25_p0 = scmp.ge.s32.totalorder %s24_s23, 2  ;;  %p1973_p1 = scmp.ge.s32.totalorder %s2461_s22, 1 }
   0x5   : > { %p201_p2 = scmp.lt.s32.totalorder %s2461_s22, 5 }
   0x6   : > { %s3410_s23 = smov (%p25_p0, %s24_s23), 0  ;;  %s3412_s24 = smov (!%p25_p0, %s27_s24), %s2457_s21 }
   0x7   : > { %p202_p3 = pnand %p1973_p1, %p201_p2  ;;  %p29_p4 = scmp.ge.s32.totalorder %s3412_s24, 2 }
   0x8   : > { %p234_p5 = scmp.lt.s32.totalorder (!%p202_p3), %s2449_s19, 1  ;;  %s2531_s27 = sshll.u32 (!%p202_p3), %s2445_s18, 3 }
   0x9   : > { %s3414_s24 = smov (%p29_p4, %s3412_s24), 0  ;;  %205 = sbr.rel (%p202_p3) target bundleno = 644 (0x284), region = 40 }
   0xa   : > { %p242_p6 = scmp.lt.s32.totalorder (!%p202_p3), %s2531_s27, 15  ;;  %s1981_s28 = sadd.s32 (!%p202_p3), 4294967295, %s2531_s27 }
   0xb   : > { %p253_p7 = scmp.gt.s32.totalorder (!%p202_p3), %s1981_s28, 0  ;;  %s2120_s14 = sshll.u32 (!%p202_p3), %s2445_s18, 6 }
   0xc   : > { %s2553_s16 = sadd.s32 (!%p202_p3), 8, %s2531_s27  ;;  %p836_p9 = scmp.gt.s32.totalorder (!%p202_p3), %s2531_s27, 0 }
   0xd   : > { %p280_p8 = scmp.lt.s32.totalorder (!%p202_p3), %s2553_s16, 15  ;;  %p840_p10 = scmp.lt.s32.totalorder (!%p202_p3), %s2553_s16, 16 }
   0xe   : > { %v287_v0 = vld [vmem:[%s3378_s1] sm:$0x3]  ;;  %vm373_vm0 = vcmask 1041408   ;;  %s3416_s19 = smov (!%p234_p5, %s2449_s19), 1  ;;  %s3418_s28 = smov (!%p253_p7, %s1981_s28), 0  ;;  %vm342_vm1 = vcmask 31744  }
   0xf   : > { %v375_v1 = vsel %vm373_vm0, %v287_v0, 0  ;;  %s243_s29 = scalar_select %p242_p6, %s2531_s27, 15  ;;  %v2568_v11 = vld [vmem:[%s3379_s2] ss:$0 sm:$0xff]  ;;  %vm888_vm11 = vcmask 1040384   ;;  %vm949_vm12 = vcmask 1046528  }
  0x10   : > { %384 = vmatpush.bf16.msra.mxu0 %v375_v1  ;;  %2134 = vmatpush.bf16.msra.mxu1 %v375_v1  ;;  %s1978_s30 = sshll.u32 %s3416_s19, 5  ;;  %s2116_s6 = sshll.u32 %s3416_s19, 7 }
  0x11   : > { %s1977_s7 = sshll.u32 %s243_s29, 1  ;;  %s238_s11 = scalar_lea.vmem %s3377_s0, %s2116_s6 }
  0x12   : > { %s2536_s8 = sadd.s32 %s1978_s30, %s1977_s7  ;;  %s2117_s12 = sshll.u32 %s3418_s28, 3 }
  0x13   : > { %s257_s13 = scalar_lea.vmem %s238_s11, %s2117_s12  ;;  %s2543_s15 = scalar_lea.vmem %s238_s11, %s2120_s14 }
  0x14   : > { %v2118_v2 = vld [vmem:[%s257_s13] sm:$0xff]  ;;  %v2122_v4 = vld [vmem:[%s2543_s15 + $0x8] sm:$0xff]  ;;  %v2123_v5 = vld [vmem:[%s2543_s15 + $0x10] sm:$0xff]  ;;  %s281_s17 = scalar_select %p280_p8, %s2553_s16, 15 }
  0x15   : > { %2028 = vmatmul.msk.bf16.vlgmr.msra.gmra.mxu0 %vm342_vm1, %v2118_v2  ;;  %v2121_v3 = vld [vmem:[%s2543_s15] sm:$0xff]  ;;  %v2124_v6 = vld [vmem:[%s2543_s15 + $0x18] sm:$0xff]  ;;  %v2126_v9 = vld [vmem:[%s2543_s15 + $0x28] sm:$0xff]  ;;  %s837_s28 = scalar_select %p836_p9, 1, 0 }
  0x16   : > { %s2129_s18 = sshll.u32 %s281_s17, 3  ;;  %v2125_v7 = vld [vmem:[%s2543_s15 + $0x20] sm:$0xff]  ;;  %v2127_v10 = vld [vmem:[%s2543_s15 + $0x30] sm:$0xff]  ;;  %v2128_v12 = vld [vmem:[%s2543_s15 + $0x38] sm:$0xff]  ;;  %s2463_s27 = smov 4  }
  0x17   : > { %s284_s19 = scalar_lea.vmem %s238_s11, %s2129_s18  ;;  %v838_v46 = vstv %s837_s28  ;;  %s2464_s29 = smov 8  }
  0x18   : > { %v2130_v8 = vld [vmem:[%s284_s19] sm:$0xff]  ;;  %vm839_vm9 = vcmp.eq.s32.totalorder %v838_v46, 1  ;;  %s2818_s30 = scalar_select %p840_p10, 1, 0 }
  0x19   : > { %2037 = vmatmul.msk.bf16.vlgmr.msra.gmra.mxu1 %vm342_vm1, %v2130_v8  ;;  %s1979_s28 = sshll.u32 %s2536_s8, 2 }
  0x25   : > { %2029 = vmatmul.msk.bf16.gmra.mxu0 %vm342_vm1, %v2121_v3 }
  0x35   : > { %2030 = vmatmul.msk.bf16.gmra.mxu0 %vm342_vm1, %v2122_v4 }
  0x45   : > { %2031 = vmatmul.msk.bf16.gmra.mxu0 %vm342_vm1, %v2123_v5 }
  0x55   : > { %2032 = vmatmul.msk.bf16.gmra.mxu0 %vm342_vm1, %v2124_v6 }
  0x65   : > { %2033 = vmatmul.msk.bf16.gmra.mxu0 %vm342_vm1, %v2125_v7 }
  0x75   : > { %2034 = vmatmul.msk.bf16.gmra.mxu0 %vm342_vm1, %v2126_v9 }
  0x85   : > { %2035 = vmatmul.msk.bf16.gmra.mxu0 %vm342_vm1, %v2127_v10 }
  0x92   : > { %v386_v13 = vpop.f32.mrf.mxu0 }
  0x93   : > { %v387_v14 = vadd.f32 %v2568_v11, %v386_v13 }
  0x95   : > { %v2038_v15 = vmul.f32 -1.442695, %v387_v14  ;;  %2036 = vmatmul.msk.bf16.gmra.mxu0 %vm342_vm1, %v2128_v12 }
  0x97   : > { %2279 = vpow2.f32 %v2038_v15 }
  0x9a   : > { %v388_v16 = vpop.f32.mrf.mxu0 }
  0x9b   : > { %v389_v17 = vadd.f32 %v2568_v11, %v388_v16 }
  0x9d   : > { %v2280_v18 = vpop.eup %2279  ;;  %v2039_v19 = vmul.f32 -1.442695, %v389_v17 }
  0x9e   : > { %v496_v20 = vadd.f32 1.0, %v2280_v18 }
  0x9f   : > { %2281 = vpow2.f32 %v2039_v19 }
  0xa0   : > { %2283 = vrcp.f32 %v496_v20  ;;  %v527_v32 = vand.u32 2147483648, %v496_v20  ;;  %vm521_vm3 = vweird.f32 %v496_v20  ;;  %v525_v35 = vand.u32 2147483647, %v496_v20 }
  0xa2   : > { %v391_v21 = vpop.f32.mrf.mxu0  ;;  %v528_v41 = vor.u32 1.1754944e-38, %v527_v32  ;;  %vm526_vm5 = vcmp.eq.f32.partialorder %v525_v35, 8.507059e+37 }
  0xa3   : > { %v2575_v22 = vadd.f32 %v2568_v11, %v391_v21 }
  0xa5   : > { %v2282_v23 = vpop.eup %2281  ;;  %v2040_v24 = vmul.f32 -1.442695, %v2575_v22 }
  0xa6   : > { %v2284_v25 = vpop.eup %2283  ;;  %v497_v26 = vadd.f32 1.0, %v2282_v23 }
  0xa7   : > { %v517_v27 = vmul.f32 %v2284_v25, %v496_v20  ;;  %2285 = vpow2.f32 %v2040_v24  ;;  %vm522_vm2 = vweird.f32 %v2284_v25 }
  0xa8   : > { %2287 = vrcp.f32 %v497_v26  ;;  %vm523_vm4 = vmor %vm521_vm3, %vm522_vm2  ;;  %v542_v44 = vand.u32 2147483648, %v497_v26  ;;  %v540_v48 = vand.u32 2147483647, %v497_v26  ;;  %vm536_vm7 = vweird.f32 %v497_v26 }
  0xa9   : > { %v518_v28 = vsub.f32 1.0, %v517_v27 }
  0xaa   : > { %v393_v29 = vpop.f32.mrf.mxu0  ;;  %v543_v55 = vor.u32 1.1754944e-38, %v542_v44  ;;  %vm541_vm10 = vcmp.eq.f32.partialorder %v540_v48, 8.507059e+37 }
  0xab   : > { %v519_v30 = vmul.f32 %v2284_v25, %v518_v28  ;;  %v2580_v31 = vadd.f32 %v2568_v11, %v393_v29 }
  0xad   : > { %v2286_v33 = vpop.eup %2285  ;;  %v520_v34 = vadd.f32 %v2284_v25, %v519_v30  ;;  %v2041_v36 = vmul.f32 -1.442695, %v2580_v31 }
  0xae   : > { %v2288_v37 = vpop.eup %2287  ;;  %v2583_v38 = vadd.f32 1.0, %v2286_v33 }
  0xaf   : > { %v524_v39 = vsel %vm523_vm4, %v2284_v25, %v520_v34  ;;  %v532_v40 = vmul.f32 %v2288_v37, %v497_v26  ;;  %2289 = vpow2.f32 %v2041_v36  ;;  %vm537_vm6 = vweird.f32 %v2288_v37 }
  0xb0   : > { %2291 = vrcp.f32 %v2583_v38  ;;  %v529_v43 = vsel %vm526_vm5, %v528_v41, %v524_v39  ;;  %vm538_vm8 = vmor %vm536_vm7, %vm537_vm6  ;;  %vm551_vm14 = vweird.f32 %v2583_v38  ;;  %v557_v12 = vand.u32 2147483648, %v2583_v38 }
  0xb1   : > { %v533_v42 = vsub.f32 1.0, %v532_v40  ;;  %v816_v51 = vmul.f32 %v529_v43, %v387_v14  ;;  %v555_v15 = vand.u32 2147483647, %v2583_v38 }
  0xb2   : > { %v396_v45 = vpop.f32.mrf.mxu0  ;;  %v558_v23 = vor.u32 1.1754944e-38, %v557_v12 }
  0xb3   : > { %v534_v47 = vmul.f32 %v2288_v37, %v533_v42  ;;  %v2587_v49 = vadd.f32 %v2568_v11, %v396_v45  ;;  %v2594_v62 = vsel %vm839_vm9, %v816_v51, 0.0  ;;  %vm556_vm0 = vcmp.eq.f32.partialorder %v555_v15, 8.507059e+37 }
  0xb4   : > { %v889_v5 = vrot.slane %v2594_v62, 7 }
  0xb5   : > { %v2290_v50 = vpop.eup %2289  ;;  %v535_v52 = vadd.f32 %v2288_v37, %v534_v47  ;;  %v2042_v53 = vmul.f32 -1.442695, %v2587_v49 }
  0xb6   : > { %v2292_v54 = vpop.eup %2291  ;;  %v2590_v56 = vadd.f32 1.0, %v2290_v50 }
  0xb7   : > { %v539_v57 = vsel %vm538_vm8, %v2288_v37, %v535_v52  ;;  %v547_v58 = vmul.f32 %v2292_v54, %v2583_v38  ;;  %2293 = vpow2.f32 %v2042_v53  ;;  %vm552_vm13 = vweird.f32 %v2292_v54 }
  0xb8   : > { %v544_v59 = vsel %vm541_vm10, %v543_v55, %v539_v57  ;;  %2295 = vrcp.f32 %v2590_v56  ;;  %vm553_vm15 = vmor %vm551_vm14, %vm552_vm13  ;;  %v572_v24 = vand.u32 2147483648, %v2590_v56  ;;  %v570_v27 = vand.u32 2147483647, %v2590_v56 }
  0xb9   : > { %v817_v60 = vmul.f32 %v544_v59, %v389_v17  ;;  %v548_v61 = vsub.f32 1.0, %v547_v58  ;;  %v950_v17 = vrot.slane %v2594_v62, 1  ;;  %vm566_vm3 = vweird.f32 %v2590_v56 }
  0xba   : > { %v398_v63 = vpop.f32.mrf.mxu0  ;;  %v573_v35 = vor.u32 1.1754944e-38, %v572_v24  ;;  %vm571_vm5 = vcmp.eq.f32.partialorder %v570_v27, 8.507059e+37 }
  0xbb   : > { %v549_v0 = vmul.f32 %v2292_v54, %v548_v61  ;;  %v2597_v1 = vadd.f32 %v2568_v11, %v398_v63  ;;  %v849_v2 = vsel %vm839_vm9, %v817_v60, 0.0 }
  0xbc   : > { %v890_v3 = vrot.slane %v849_v2, 7  ;;  %v2177_v4 = vpack.i.bf16 %v849_v2, %v2594_v62  ;;  %v951_v9 = vrot.slane %v849_v2, 1 }
  0xbd   : > { %v2294_v6 = vpop.eup %2293  ;;  %v550_v7 = vadd.f32 %v2292_v54, %v549_v0  ;;  %v2043_v8 = vmul.f32 -1.442695, %v2597_v1 }
  0xbe   : > { %v2296_v10 = vpop.eup %2295  ;;  %v2604_v13 = vadd.f32 1.0, %v2294_v6  ;;  %2178 = vrot.lane.b32.xlu0 %v2177_v4, %s2463_s27  ;;  %v2610_v14 = vsel %vm888_vm11, %v889_v5, %v890_v3  ;;  %v952_v20 = vsel %vm949_vm12, %v950_v17, %v951_v9  ;;  %v990_v21 = vsel %vm949_vm12, %v951_v9, 0.0 }
  0xbf   : > { %v562_v16 = vmul.f32 %v2296_v10, %v2590_v56  ;;  %2297 = vpow2.f32 %v2043_v8  ;;  %v554_v18 = vsel %vm553_vm15, %v2292_v54, %v550_v7  ;;  %vm567_vm2 = vweird.f32 %v2296_v10 }
  0xc0   : > { %2299 = vrcp.f32 %v2604_v13  ;;  %v559_v28 = vsel %vm556_vm0, %v558_v23, %v554_v18  ;;  %v2182_v30 = vpack.i.bf16 %v990_v21, %v952_v20  ;;  %vm568_vm4 = vmor %vm566_vm3, %vm567_vm2  ;;  %v585_v54 = vand.u32 2147483647, %v2604_v13 }
  0xc1   : > { %v563_v19 = vsub.f32 1.0, %v562_v16  ;;  %v2627_v38 = vmul.f32 %v559_v28, %v2575_v22  ;;  %v587_v55 = vand.u32 2147483648, %v2604_v13  ;;  %vm581_vm7 = vweird.f32 %v2604_v13 }
  0xc2   : > { %v401_v25 = vpop.f32.mrf.mxu0  ;;  %vm586_vm9 = vcmp.eq.f32.partialorder %v585_v54, 8.507059e+37 }
  0xc3   : > { %v564_v26 = vmul.f32 %v2296_v10, %v563_v19  ;;  %v2621_v29 = vadd.f32 %v2568_v11, %v401_v25  ;;  %v892_v45 = vrot.slane %v2627_v38, 7  ;;  %v953_v57 = vrot.slane %v2627_v38, 1 }
  0xc4   : > { %v588_v3 = vor.u32 1.1754944e-38, %v587_v55 }
  0xc5   : > { %v2298_v32 = vpop.eup %2297  ;;  %v565_v33 = vadd.f32 %v2296_v10, %v564_v26  ;;  %v2044_v37 = vmul.f32 -1.442695, %v2621_v29 }
  0xc6   : > { %v2300_v34 = vpop.eup %2299  ;;  %v501_v36 = vadd.f32 1.0, %v2298_v32  ;;  %2183 = vrot.lane.b32.xlu0 %v2182_v30, %s2464_s29 }
  0xc7   : > { %v569_v39 = vsel %vm568_vm4, %v2296_v10, %v565_v33  ;;  %v577_v40 = vmul.f32 %v2300_v34, %v2604_v13  ;;  %vm582_vm6 = vweird.f32 %v2300_v34 }
  0xc8   : > { %v574_v41 = vsel %vm571_vm5, %v573_v35, %v569_v39  ;;  %2301 = vrcp.f32 %v501_v36  ;;  %vm2648_vm8 = vmor %vm581_vm7, %vm582_vm6  ;;  %v602_v4 = vand.u32 2147483648, %v501_v36  ;;  %v600_v8 = vand.u32 2147483647, %v501_v36 }
  0xc9   : > { %v819_v42 = vmul.f32 %v574_v41, %v2580_v31  ;;  %v578_v43 = vsub.f32 1.0, %v577_v40  ;;  %2303 = vpow2.f32 %v2044_v37  ;;  %vm596_vm13 = vweird.f32 %v501_v36 }
  0xca   : > { %v403_v44 = vpop.f32.mrf.mxu0  ;;  %v603_v17 = vor.u32 1.1754944e-38, %v602_v4  ;;  %vm601_vm15 = vcmp.eq.f32.partialorder %v600_v8, 8.507059e+37 }
  0xcb   : > { %v893_v46 = vrot.slane %v819_v42, 7  ;;  %v579_v47 = vmul.f32 %v2300_v34, %v578_v43  ;;  %v2633_v48 = vadd.f32 %v2568_v11, %v403_v44  ;;  %v2197_v22 = vpack.i.bf16 %v819_v42, %v2627_v38 }
  0xcc   : > { %v954_v52 = vrot.slane %v819_v42, 1 }
  0xcd   : > { %v580_v50 = vadd.f32 %v2300_v34, %v579_v47  ;;  %v2045_v51 = vmul.f32 -1.442695, %v2633_v48  ;;  %v2640_v31 = vsel %vm888_vm11, %v892_v45, %v893_v46  ;;  %2198 = vrot.lane.b32.xlu2 %v2197_v22, %s2463_s27 }
  0xce   : > { %v2302_v53 = vpop.eup %2301  ;;  %v955_v0 = vsel %vm949_vm12, %v953_v57, %v954_v52  ;;  %v991_v2 = vsel %vm949_vm12, %v954_v52, 0.0 }
  0xcf   : > { %v2304_v56 = vpop.eup %2303  ;;  %v592_v58 = vmul.f32 %v2302_v53, %v501_v36  ;;  %2305 = vpow2.f32 %v2045_v51  ;;  %v584_v61 = vsel %vm2648_vm8, %v2300_v34, %v580_v50  ;;  %vm597_vm10 = vweird.f32 %v2302_v53 }
  0xd0   : > { %v2652_v60 = vadd.f32 1.0, %v2304_v56  ;;  %v589_v10 = vsel %vm586_vm9, %v588_v3, %v584_v61  ;;  %v2202_v12 = vpack.i.bf16 %v991_v2, %v955_v0  ;;  %vm598_vm14 = vmor %vm596_vm13, %vm597_vm10 }
  0xd1   : > { %v593_v63 = vsub.f32 1.0, %v592_v58  ;;  %v2665_v19 = vmul.f32 %v589_v10, %v2587_v49 }
  0xd2   : > { %2307 = vrcp.f32 %v2652_v60  ;;  %v406_v6 = vpop.f32.mrf.mxu0  ;;  %vm611_vm2 = vweird.f32 %v2652_v60  ;;  %v615_v39 = vand.u32 2147483647, %v2652_v60  ;;  %v617_v40 = vand.u32 2147483648, %v2652_v60 }
  0xd3   : > { %v594_v7 = vmul.f32 %v2302_v53, %v593_v63  ;;  %v2660_v9 = vadd.f32 %v2568_v11, %v406_v6  ;;  %v895_v27 = vrot.slane %v2665_v19, 7  ;;  %v956_v42 = vrot.slane %v2665_v19, 1  ;;  %v431_v63 = vpop.f32.mrf.mxu1 }
  0xd4   : > { %v618_v51 = vor.u32 1.1754944e-38, %v617_v40  ;;  %vm616_vm4 = vcmp.eq.f32.partialorder %v615_v39, 8.507059e+37 }
  0xd5   : > { %v2306_v13 = vpop.eup %2305  ;;  %v595_v15 = vadd.f32 %v2302_v53, %v594_v7  ;;  %v2046_v16 = vmul.f32 -1.442695, %v2660_v9  ;;  %2203 = vrot.lane.b32.xlu2 %v2202_v12, %s2464_s29 }
  0xd6   : > { %v503_v18 = vadd.f32 1.0, %v2306_v13 }
  0xd7   : > { %v599_v20 = vsel %vm598_vm14, %v2302_v53, %v595_v15  ;;  %2309 = vpow2.f32 %v2046_v16 }
  0xd8   : > { %v2308_v21 = vpop.eup %2307  ;;  %v604_v23 = vsel %vm601_vm15, %v603_v17, %v599_v20  ;;  %2311 = vrcp.f32 %v503_v18  ;;  %v630_v52 = vand.u32 2147483647, %v503_v18  ;;  %v632_v53 = vand.u32 2147483648, %v503_v18 }
  0xd9   : > { %v821_v24 = vmul.f32 %v604_v23, %v2597_v1  ;;  %v607_v25 = vmul.f32 %v2308_v21, %v2652_v60  ;;  %vm612_vm0 = vweird.f32 %v2308_v21  ;;  %vm626_vm6 = vweird.f32 %v503_v18 }
  0xda   : > { %v408_v26 = vpop.f32.mrf.mxu0  ;;  %vm613_vm3 = vmor %vm611_vm2, %vm612_vm0  ;;  %vm631_vm8 = vcmp.eq.f32.partialorder %v630_v52, 8.507059e+37  ;;  %v633_v2 = vor.u32 1.1754944e-38, %v632_v53 }
  0xdb   : > { %v896_v28 = vrot.slane %v821_v24, 7  ;;  %v608_v30 = vsub.f32 1.0, %v607_v25  ;;  %v2671_v32 = vadd.f32 %v2568_v11, %v408_v26  ;;  %v2187_v49 = vpack.i.bf16 %v821_v24, %v2665_v19 }
  0xdc   : > { %v957_v36 = vrot.slane %v821_v24, 1 }
  0xdd   : > { %v2310_v33 = vpop.eup %2309  ;;  %v609_v34 = vmul.f32 %v2308_v21, %v608_v30  ;;  %v2047_v35 = vmul.f32 -1.442695, %v2671_v32  ;;  %v2678_v1 = vsel %vm888_vm11, %v895_v27, %v896_v28  ;;  %2188 = vrot.lane.b32.xlu1 %v2187_v49, %s2463_s27 }
  0xde   : > { %v2312_v37 = vpop.eup %2311  ;;  %v2683_v41 = vadd.f32 1.0, %v2310_v33  ;;  %v958_v22 = vsel %vm949_vm12, %v956_v42, %v957_v36  ;;  %v992_v50 = vsel %vm949_vm12, %v957_v36, 0.0 }
  0xdf   : > { %v610_v43 = vadd.f32 %v2308_v21, %v609_v34  ;;  %v622_v44 = vmul.f32 %v2312_v37, %v503_v18  ;;  %2313 = vpow2.f32 %v2047_v35  ;;  %vm627_vm5 = vweird.f32 %v2312_v37 }
  0xe0   : > { %2315 = vrcp.f32 %v2683_v41  ;;  %v2192_v58 = vpack.i.bf16 %v992_v50, %v958_v22  ;;  %vm628_vm7 = vmor %vm626_vm6, %vm627_vm5  ;;  %vm641_vm9 = vweird.f32 %v2683_v41  ;;  %v645_v13 = vand.u32 2147483647, %v2683_v41 }
  0xe1   : > { %v614_v46 = vsel %vm613_vm3, %v2308_v21, %v610_v43  ;;  %v623_v47 = vsub.f32 1.0, %v622_v44  ;;  %v647_v25 = vand.u32 2147483648, %v2683_v41  ;;  %v2725_v35 = vadd.f32 %v2568_v11, %v431_v63 }
  0xe2   : > { %v411_v54 = vpop.f32.mrf.mxu0  ;;  %v619_v57 = vsel %vm616_vm4, %v618_v51, %v614_v46  ;;  %vm646_vm14 = vcmp.eq.f32.partialorder %v645_v13, 8.507059e+37 }
  0xe3   : > { %v624_v55 = vmul.f32 %v2312_v37, %v623_v47  ;;  %v2692_v56 = vadd.f32 %v2568_v11, %v411_v54  ;;  %v2699_v4 = vmul.f32 %v619_v57, %v2621_v29  ;;  %v648_v40 = vor.u32 1.1754944e-38, %v647_v25 }
  0xe4   : > { %v2056_v47 = vmul.f32 -1.442695, %v2725_v35 }
  0xe5   : > { %v2314_v59 = vpop.eup %2313  ;;  %v625_v60 = vadd.f32 %v2312_v37, %v624_v55  ;;  %v2048_v61 = vmul.f32 -1.442695, %v2692_v56  ;;  %2193 = vrot.lane.b32.xlu1 %v2192_v58, %s2464_s29  ;;  %v898_v16 = vrot.slane %v2699_v4, 7  ;;  %v959_v20 = vrot.slane %v2699_v4, 1 }
  0xe6   : > { %v2316_v0 = vpop.eup %2315  ;;  %v2695_v3 = vadd.f32 1.0, %v2314_v59 }
  0xe7   : > { %v629_v6 = vsel %vm628_vm7, %v2312_v37, %v625_v60  ;;  %v637_v7 = vmul.f32 %v2316_v0, %v2683_v41  ;;  %2317 = vpow2.f32 %v2048_v61  ;;  %vm642_vm10 = vweird.f32 %v2316_v0  ;;  %v433_v37 = vpop.f32.mrf.mxu1 }
  0xe8   : > { %v634_v8 = vsel %vm631_vm8, %v633_v2, %v629_v6  ;;  %2319 = vrcp.f32 %v2695_v3  ;;  %vm643_vm13 = vmor %vm641_vm9, %vm642_vm10  ;;  %v662_v43 = vand.u32 2147483648, %v2695_v3  ;;  %v2734_v22 = vadd.f32 %v2568_v11, %v433_v37 }
  0xe9   : > { %v823_v10 = vmul.f32 %v634_v8, %v2633_v48  ;;  %v638_v12 = vsub.f32 1.0, %v637_v7  ;;  %v660_v51 = vand.u32 2147483647, %v2695_v3  ;;  %vm656_vm0 = vweird.f32 %v2695_v3 }
  0xea   : > { %v413_v15 = vpop.f32.mrf.mxu0  ;;  %v2057_v53 = vmul.f32 -1.442695, %v2734_v22  ;;  %v663_v57 = vor.u32 1.1754944e-38, %v662_v43 }
  0xeb   : > { %v899_v17 = vrot.slane %v823_v10, 7  ;;  %v639_v29 = vmul.f32 %v2316_v0, %v638_v12  ;;  %v2708_v18 = vadd.f32 %v2568_v11, %v413_v15  ;;  %v2207_v21 = vpack.i.bf16 %v823_v10, %v2699_v4 }
  0xec   : > { %v960_v23 = vrot.slane %v823_v10, 1  ;;  %vm661_vm3 = vcmp.eq.f32.partialorder %v660_v51, 8.507059e+37 }
  0xed   : > { %v2318_v48 = vpop.eup %2317  ;;  %v640_v24 = vadd.f32 %v2316_v0, %v639_v29  ;;  %v2049_v26 = vmul.f32 -1.442695, %v2708_v18  ;;  %v2717_v28 = vsel %vm888_vm11, %v898_v16, %v899_v17  ;;  %2208 = vrot.lane.b32.xlu0 %v2207_v21, %s2463_s27 }
  0xee   : > { %v2320_v30 = vpop.eup %2319  ;;  %v2719_v49 = vadd.f32 1.0, %v2318_v48  ;;  %v961_v33 = vsel %vm949_vm12, %v959_v20, %v960_v23  ;;  %v993_v34 = vsel %vm949_vm12, %v960_v23, 0.0 }
  0xef   : > { %v652_v36 = vmul.f32 %v2320_v30, %v2695_v3  ;;  %2321 = vpow2.f32 %v2049_v26  ;;  %v644_v39 = vsel %vm643_vm13, %v2316_v0, %v640_v24  ;;  %v2212_v44 = vpack.i.bf16 %v993_v34, %v961_v33 }
  0xf0   : > { %2323 = vrcp.f32 %v2719_v49  ;;  %v649_v41 = vsel %vm646_vm14, %v648_v40, %v644_v39  ;;  %vm657_vm15 = vweird.f32 %v2320_v30  ;;  %vm671_vm4 = vweird.f32 %v2719_v49 }
  0xf1   : > { %v653_v42 = vsub.f32 1.0, %v652_v36  ;;  %2213 = vrot.lane.b32.xlu1 %v2212_v44, %s2464_s29  ;;  %2325 = vpow2.f32 %v2056_v47  ;;  %v2744_v59 = vmul.f32 %v649_v41, %v2660_v9  ;;  %vm658_vm2 = vmor %vm656_vm0, %vm657_vm15  ;;  %v675_v8 = vand.u32 2147483647, %v2719_v49 }
  0xf2   : > { %v416_v46 = vpop.f32.mrf.mxu0  ;;  %2327 = vpow2.f32 %v2057_v53  ;;  %v677_v10 = vand.u32 2147483648, %v2719_v49 }
  0xf3   : > { %v654_v50 = vmul.f32 %v2320_v30, %v653_v42  ;;  %v2739_v52 = vadd.f32 %v2568_v11, %v416_v46  ;;  %v901_v9 = vrot.slane %v2744_v59, 7  ;;  %vm676_vm7 = vcmp.eq.f32.partialorder %v675_v8, 8.507059e+37 }
  0xf5   : > { %v2322_v54 = vpop.eup %2321  ;;  %v655_v55 = vadd.f32 %v2320_v30, %v654_v50  ;;  %v2050_v61 = vmul.f32 -1.442695, %v2739_v52 }
  0xf6   : > { %v2324_v58 = vpop.eup %2323  ;;  %v2746_v60 = vadd.f32 1.0, %v2322_v54 }
  0xf7   : > { %v659_v63 = vsel %vm658_vm2, %v2320_v30, %v655_v55  ;;  %v667_v0 = vmul.f32 %v2324_v58, %v2719_v49  ;;  %v2326_v7 = vpop.eup %2325  ;;  %vm672_vm5 = vweird.f32 %v2324_v58  ;;  %v678_v49 = vor.u32 1.1754944e-38, %v677_v10 }
  0xf8   : > { %v664_v2 = vsel %vm661_vm3, %v663_v57, %v659_v63  ;;  %2329 = vrcp.f32 %v2746_v60  ;;  %v2328_v29 = vpop.eup %2327  ;;  %v2761_v23 = vadd.f32 1.0, %v2326_v7  ;;  %vm2773_vm6 = vmor %vm671_vm4, %vm672_vm5  ;;  %v690_v42 = vand.u32 2147483647, %v2746_v60 }
  0xf9   : > { %v825_v3 = vmul.f32 %v664_v2, %v2671_v32  ;;  %v668_v6 = vsub.f32 1.0, %v667_v0  ;;  %2331 = vpow2.f32 %v2050_v61  ;;  %v962_v32 = vrot.slane %v2744_v59, 1 }
  0xfa   : > { %v418_v12 = vpop.f32.mrf.mxu0  ;;  %v2764_v25 = vadd.f32 1.0, %v2328_v29  ;;  %2333 = vrcp.f32 %v2761_v23  ;;  %v692_v41 = vand.u32 2147483648, %v2746_v60  ;;  %vm686_vm9 = vweird.f32 %v2746_v60 }
  0xfb   : > { %v902_v13 = vrot.slane %v825_v3, 7  ;;  %v669_v15 = vmul.f32 %v2324_v58, %v668_v6  ;;  %v2757_v17 = vadd.f32 %v2568_v11, %v418_v12  ;;  %v2217_v20 = vpack.i.bf16 %v825_v3, %v2744_v59 }
  0xfc   : > { %v963_v21 = vrot.slane %v825_v3, 1  ;;  %vm2795_vm10 = vcmp.eq.f32.partialorder %v690_v42, 8.507059e+37  ;;  %v693_v2 = vor.u32 1.1754944e-38, %v692_v41  ;;  %v795_v6 = vand.u32 2147483647, %v2761_v23 }
  0xfd   : > { %v670_v48 = vadd.f32 %v2324_v58, %v669_v15  ;;  %v2051_v24 = vmul.f32 -1.442695, %v2757_v17  ;;  %v2769_v26 = vsel %vm888_vm11, %v901_v9, %v902_v13  ;;  %2218 = vrot.lane.b32.xlu2 %v2217_v20, %s2463_s27  ;;  %v797_v10 = vand.u32 2147483648, %v2761_v23 }
  0xfe   : > { %v2330_v30 = vpop.eup %2329  ;;  %v964_v34 = vsel %vm949_vm12, %v962_v32, %v963_v21  ;;  %v994_v36 = vsel %vm949_vm12, %v963_v21, 0.0  ;;  %vm791_vm14 = vweird.f32 %v2761_v23  ;;  %vm2837_vm4 = vcmp.eq.f32.partialorder %v795_v6, 8.507059e+37 }
  0xff   : > { %v2332_v37 = vpop.eup %2331  ;;  %v674_v39 = vsel %vm2773_vm6, %v2324_v58, %v670_v48  ;;  %v682_v40 = vmul.f32 %v2330_v30, %v2746_v60  ;;  %2335 = vpow2.f32 %v2051_v24  ;;  %v2222_v44 = vpack.i.bf16 %v994_v36, %v964_v34 }
 0x100   : > { %v2785_v43 = vadd.f32 1.0, %v2332_v37  ;;  %2337 = vrcp.f32 %v2764_v25  ;;  %v679_v47 = vsel %vm676_vm7, %v678_v49, %v674_v39  ;;  %vm687_vm8 = vweird.f32 %v2330_v30  ;;  %v2334_v54 = vpop.eup %2333 }
 0x101   : > { %v683_v46 = vsub.f32 1.0, %v682_v40  ;;  %2223 = vrot.lane.b32.xlu0 %v2222_v44, %s2464_s29  ;;  %v2801_v58 = vmul.f32 %v679_v47, %v2692_v56  ;;  %v787_v0 = vmul.f32 %v2334_v54, %v2761_v23  ;;  %vm688_vm13 = vmor %vm686_vm9, %vm687_vm8  ;;  %vm792_vm15 = vweird.f32 %v2334_v54 }
 0x102   : > { %2339 = vrcp.f32 %v2785_v43  ;;  %v421_v50 = vpop.f32.mrf.mxu0  ;;  %v705_v3 = vand.u32 2147483647, %v2785_v43  ;;  %vm701_vm0 = vweird.f32 %v2785_v43  ;;  %v707_v32 = vand.u32 2147483648, %v2785_v43  ;;  %vm2833_vm3 = vmor %vm791_vm14, %vm792_vm15 }
 0x103   : > { %v684_v51 = vmul.f32 %v2330_v30, %v683_v46  ;;  %v2792_v53 = vadd.f32 %v2568_v11, %v421_v50  ;;  %v788_v56 = vsub.f32 1.0, %v787_v0  ;;  %v904_v15 = vrot.slane %v2801_v58, 7 }
 0x104   : > { %vm2827_vm2 = vcmp.eq.f32.partialorder %v705_v3, 8.507059e+37  ;;  %v842_v39 = vstv %s2818_s30  ;;  %vm806_vm6 = vweird.f32 %v2764_v25  ;;  %v812_v3 = vand.u32 2147483648, %v2764_v25  ;;  %s3184_s30 = scalar_lea.vmem %s3382_s5, %s1979_s28 }
 0x105   : > { %v2336_v57 = vpop.eup %2335  ;;  %v685_v61 = vadd.f32 %v2330_v30, %v684_v51  ;;  %v2052_v63 = vmul.f32 -1.442695, %v2792_v53  ;;  %v789_v23 = vmul.f32 %v2334_v54, %v788_v56 }
 0x106   : > { %v2806_v60 = vadd.f32 1.0, %v2336_v57  ;;  %v2809_v7 = vpop.eup %2337 }
 0x107   : > { %v689_v8 = vsel %vm688_vm13, %v2330_v30, %v685_v61  ;;  %2341 = vpow2.f32 %v2052_v63  ;;  %v802_v24 = vmul.f32 %v2809_v7, %v2764_v25  ;;  %v790_v37 = vadd.f32 %v2334_v54, %v789_v23 }
 0x108   : > { %v2340_v12 = vpop.eup %2339  ;;  %v694_v13 = vsel %vm2795_vm10, %v693_v2, %v689_v8  ;;  %2343 = vrcp.f32 %v2806_v60  ;;  %vm807_vm7 = vweird.f32 %v2809_v7  ;;  %v810_v63 = vand.u32 2147483647, %v2764_v25 }
 0x109   : > { %v697_v29 = vmul.f32 %v2340_v12, %v2785_v43  ;;  %v2825_v20 = vmul.f32 %v694_v13, %v2708_v18  ;;  %v798_v18 = vor.u32 1.1754944e-38, %v797_v10  ;;  %vm702_vm5 = vweird.f32 %v2340_v12  ;;  %vm2877_vm9 = vmor %vm806_vm6, %vm807_vm7 }
 0x10a   : > { %v423_v48 = vpop.f32.mrf.mxu0  ;;  %v803_v40 = vsub.f32 1.0, %v802_v24  ;;  %v794_v41 = vsel %vm2833_vm3, %v2334_v54, %v790_v37  ;;  %vm2862_vm8 = vmor %vm701_vm0, %vm702_vm5  ;;  %v708_v54 = vor.u32 1.1754944e-38, %v707_v32  ;;  %v720_v2 = vand.u32 2147483647, %v2806_v60 }
 0x10b   : > { %v698_v30 = vsub.f32 1.0, %v697_v29  ;;  %v2842_v36 = vadd.f32 %v2568_v11, %v423_v48  ;;  %v2227_v51 = vpack.i.bf16 %v2825_v20, %v2801_v58  ;;  %v799_v61 = vsel %vm2837_vm4, %v798_v18, %v794_v41 }
 0x10c   : > { %v804_v50 = vmul.f32 %v2809_v7, %v803_v40  ;;  %v722_v56 = vand.u32 2147483648, %v2806_v60  ;;  %v905_v10 = vrot.slane %v2825_v20, 7  ;;  %v834_v13 = vmul.f32 %v799_v61, %v2725_v35 }
 0x10d   : > { %v2342_v49 = vpop.eup %2341  ;;  %v699_v42 = vmul.f32 %v2340_v12, %v698_v30  ;;  %v2053_v44 = vmul.f32 -1.442695, %v2842_v36  ;;  %2228 = vrot.lane.b32.xlu1 %v2227_v51, %s2463_s27  ;;  %vm2883_vm10 = vcmp.eq.s32.totalorder %v842_v39, 1  ;;  %vm811_vm14 = vcmp.eq.f32.partialorder %v810_v63, 8.507059e+37 }
 0x10e   : > { %v2344_v46 = vpop.eup %2343  ;;  %v2848_v47 = vadd.f32 1.0, %v2342_v49  ;;  %v965_v25 = vrot.slane %v2801_v58, 1  ;;  %vm716_vm15 = vweird.f32 %v2806_v60  ;;  %v813_v24 = vor.u32 1.1754944e-38, %v812_v3 }
 0x10f   : > { %v700_v55 = vadd.f32 %v2340_v12, %v699_v42  ;;  %v712_v57 = vmul.f32 %v2344_v46, %v2806_v60  ;;  %vm717_vm13 = vweird.f32 %v2344_v46  ;;  %vm721_vm0 = vcmp.eq.f32.partialorder %v720_v2, 8.507059e+37 }
 0x110   : > { %2345 = vrcp.f32 %v2848_v47  ;;  %v723_v33 = vor.u32 1.1754944e-38, %v722_v56  ;;  %v966_v34 = vrot.slane %v2825_v20, 1  ;;  %v2903_v37 = vsel %vm2883_vm10, %v834_v13, 0.0  ;;  %v2132_v13 = vld [vmem:[%s3380_s3 + $0x8] sm:$0x30] }
 0x111   : > { %v704_v6 = vsel %vm2862_vm8, %v2340_v12, %v700_v55  ;;  %v713_v8 = vsub.f32 1.0, %v712_v57  ;;  %2347 = vpow2.f32 %v2053_v44  ;;  %v805_v12 = vadd.f32 %v2809_v7, %v804_v50 }
 0x112   : > { %v426_v32 = vpop.f32.mrf.mxu0  ;;  %v709_v23 = vsel %vm2827_vm2, %v708_v54, %v704_v6  ;;  %vm718_vm2 = vmor %vm716_vm15, %vm717_vm13  ;;  %v967_v41 = vsel %vm949_vm12, %v965_v25, %v966_v34  ;;  %v995_v50 = vsel %vm949_vm12, %v966_v34, 0.0  ;;  %v737_v0 = vand.u32 2147483648, %v2848_v47  ;;  %v2131_v25 = vld [vmem:[%s3380_s3] sm:$0x30] }
 0x113   : > { %v714_v48 = vmul.f32 %v2344_v46, %v713_v8  ;;  %v809_v35 = vsel %vm2877_vm9, %v2809_v7, %v805_v12  ;;  %v2899_v21 = vmul.f32 %v709_v23, %v2739_v52  ;;  %v2908_v7 = vsel %vm888_vm11, %v904_v15, %v905_v10  ;;  %v2062_v10 = vld [vmem:[%s3380_s3 + $0x8] sm:$0xf] }
 0x114   : > { %v814_v60 = vsel %vm811_vm14, %v813_v24, %v809_v35  ;;  %v2914_v52 = vadd.f32 %v2568_v11, %v426_v32  ;;  %v2232_v57 = vpack.i.bf16 %v995_v50, %v967_v41  ;;  %v916_v54 = vrot.slane %v2903_v37, 7 }
 0x115   : > { %v715_v30 = vadd.f32 %v2344_v46, %v714_v48  ;;  %v835_v49 = vmul.f32 %v814_v60, %v2734_v22  ;;  %v907_v22 = vrot.slane %v2899_v21, 7  ;;  %v968_v2 = vrot.slane %v2899_v21, 1  ;;  %v2074_v48 = vld [vmem:[%s3380_s3] sm:$0xf] }
 0x116   : > { %v2896_v18 = vpop.eup %2345  ;;  %2233 = vrot.lane.b32.xlu2 %v2232_v57, %s2464_s29  ;;  %v2054_v3 = vmul.f32 -1.442695, %v2914_v52  ;;  %v2063_v12 = vor.u32 %v2132_v13, %v2062_v10  ;;  %vm1266_vm3 = vcmask 1045504   ;;  %vm731_vm5 = vweird.f32 %v2848_v47 }
 0x117   : > { %v2348_v39 = vpop.eup %2347  ;;  %v719_v40 = vsel %vm718_vm2, %v2344_v46, %v715_v30  ;;  %v727_v20 = vmul.f32 %v2896_v18, %v2848_v47  ;;  %v735_v46 = vand.u32 2147483647, %v2848_v47  ;;  %vm732_vm4 = vweird.f32 %v2896_v18 }
 0x118   : > { %v724_v42 = vsel %vm721_vm0, %v723_v33, %v719_v40  ;;  %v2916_v44 = vadd.f32 1.0, %v2348_v39  ;;  %v1268_v33 = vsel %vm1266_vm3, %v2063_v12, 0  ;;  %vm2960_vm6 = vmor %vm731_vm5, %vm732_vm4  ;;  %v2075_v39 = vor.u32 %v2131_v25, %v2074_v48 }
 0x119   : > { %v829_v51 = vmul.f32 %v724_v42, %v2757_v17  ;;  %v728_v55 = vsub.f32 1.0, %v727_v20  ;;  %v2931_v17 = vsel %vm2883_vm10, %v835_v49, 0.0  ;;  %1277 = vmatpush.bf16.msrb.mxu1 %v1268_v33  ;;  %vm736_vm7 = vcmp.eq.f32.partialorder %v735_v46, 8.507059e+37 }
 0x11a   : > { %2349 = vrcp.f32 %v2916_v44  ;;  %v428_v61 = vpop.f32.mrf.mxu0  ;;  %v917_v24 = vrot.slane %v2931_v17, 7  ;;  %v738_v42 = vor.u32 1.1754944e-38, %v737_v0  ;;  %v752_v41 = vand.u32 2147483648, %v2916_v44 }
 0x11b   : > { %v729_v63 = vmul.f32 %v2896_v18, %v728_v55  ;;  %v2935_v6 = vadd.f32 %v2568_v11, %v428_v61  ;;  %v908_v8 = vrot.slane %v829_v51, 7  ;;  %v2237_v56 = vpack.i.bf16 %v829_v51, %v2899_v21 }
 0x11c   : > { %v969_v43 = vrot.slane %v829_v51, 1  ;;  %2351 = vpow2.f32 %v2054_v3  ;;  %v1333_v50 = vsel %vm1266_vm3, %v2075_v39, 0  ;;  %v2978_v51 = vsel %vm888_vm11, %v916_v54, %v917_v24 }
 0x11d   : > { %v2055_v29 = vmul.f32 -1.442695, %v2935_v6  ;;  %v730_v11 = vadd.f32 %v2896_v18, %v729_v63  ;;  %2238 = vrot.lane.b32.xlu0 %v2237_v56, %s2463_s27  ;;  %v2968_v40 = vsel %vm888_vm11, %v907_v22, %v908_v8  ;;  %v750_v57 = vand.u32 2147483647, %v2916_v44  ;;  %1342 = vmatpush.bf16.msra.mxu2 %v1333_v50 }
 0x11e   : > { %v970_v32 = vsel %vm949_vm12, %v968_v2, %v969_v43  ;;  %v996_v23 = vsel %vm949_vm12, %v969_v43, 0.0  ;;  %vm746_vm9 = vweird.f32 %v2916_v44  ;;  %v753_v0 = vor.u32 1.1754944e-38, %v752_v41 }
 0x11f   : > { %2353 = vpow2.f32 %v2055_v29  ;;  %v2242_v30 = vpack.i.bf16 %v996_v23, %v970_v32  ;;  %v734_v20 = vsel %vm2960_vm6, %v2896_v18, %v730_v11  ;;  %vm751_vm13 = vcmp.eq.f32.partialorder %v750_v57, 8.507059e+37 }
 0x120   : > { %v2350_v35 = vpop.eup %2349  ;;  %v739_v46 = vsel %vm736_vm7, %v738_v42, %v734_v20  ;;  %vm1150_vm15 = vcmask 64512   ;;  %vm1241_vm7 = vcmask 97280   ;;  %v2267_v62 = vpack.i.bf16 %v2931_v17, %v2903_v37 }
 0x121   : > { %v742_v34 = vmul.f32 %v2350_v35, %v2916_v44  ;;  %2243 = vrot.lane.b32.xlu1 %v2242_v30, %s2464_s29  ;;  %vm747_vm8 = vweird.f32 %v2350_v35  ;;  %v2985_v8 = vmul.f32 %v739_v46, %v2792_v53  ;;  %v940_v44 = vsel %vm888_vm11, 0.0, %v892_v45 }
 0x122   : > { %v2352_v49 = vpop.eup %2351  ;;  %vm748_vm10 = vmor %vm746_vm9, %vm747_vm8 }
 0x123   : > { %v743_v47 = vsub.f32 1.0, %v742_v34  ;;  %v512_v61 = vadd.f32 1.0, %v2352_v49  ;;  %v910_v12 = vrot.slane %v2985_v8, 7  ;;  %v971_v23 = vrot.slane %v2985_v8, 1 }
 0x125   : > { %v744_v55 = vmul.f32 %v2350_v35, %v743_v47  ;;  %v2354_v18 = vpop.eup %2353  ;;  %2355 = vrcp.f32 %v512_v61  ;;  %v765_v13 = vand.u32 2147483647, %v512_v61  ;;  %vm761_vm14 = vweird.f32 %v512_v61 }
 0x126   : > { %v2982_v2 = vadd.f32 1.0, %v2354_v18  ;;  %v767_v24 = vand.u32 2147483648, %v512_v61 }
 0x127   : > { %v745_v63 = vadd.f32 %v2350_v35, %v744_v55  ;;  %v2199_v3 = vpop.permute.xlu2 %2198  ;;  %vm3001_vm0 = vcmp.eq.f32.partialorder %v765_v13, 8.507059e+37 }
 0x128   : > { %2357 = vrcp.f32 %v2982_v2  ;;  %v2200_v32 = vunpack.i.l.bf16 %v2199_v3  ;;  %v2201_v25 = vunpack.i.h.bf16 %v2199_v3  ;;  %v768_v57 = vor.u32 1.1754944e-38, %v767_v24 }
 0x129   : > { %v749_v56 = vsel %vm748_vm10, %v2350_v35, %v745_v63  ;;  %v782_v3 = vand.u32 2147483648, %v2982_v2  ;;  %vm776_vm6 = vweird.f32 %v2982_v2 }
 0x12a   : > { %v754_v43 = vsel %vm751_vm13, %v753_v0, %v749_v56  ;;  %v1132_v47 = vsel %vm342_vm1, %v940_v44, %v2200_v32  ;;  %v1133_v50 = vsel %vm342_vm1, %v2640_v31, %v2201_v25  ;;  %v780_v31 = vand.u32 2147483647, %v2982_v2 }
 0x12b   : > { %v831_v10 = vmul.f32 %v754_v43, %v2842_v36  ;;  %v2356_v29 = vpop.eup %2355  ;;  %vm1856_vm13 = vcmask 27648  }
 0x12c   : > { %v757_v48 = vmul.f32 %v2356_v29, %v512_v61  ;;  %vm762_vm2 = vweird.f32 %v2356_v29  ;;  %v939_v61 = vsel %vm888_vm11, 0.0, %v889_v5  ;;  %vm781_vm9 = vcmp.eq.f32.partialorder %v780_v31, 8.507059e+37 }
 0x12d   : > { %v911_v11 = vrot.slane %v831_v10, 7  ;;  %v2247_v53 = vpack.i.bf16 %v831_v10, %v2985_v8  ;;  %v972_v35 = vrot.slane %v831_v10, 1  ;;  %vm763_vm4 = vmor %vm761_vm14, %vm762_vm2  ;;  %v977_v5 = vrot.slane %v2903_v37, 1 }
 0x12e   : > { %v2358_v45 = vpop.eup %2357  ;;  %v758_v36 = vsub.f32 1.0, %v757_v48 }
 0x12f   : > { %2248 = vrot.lane.b32.xlu2 %v2247_v53, %s2463_s27  ;;  %v2999_v38 = vsel %vm888_vm11, %v910_v12, %v911_v11  ;;  %v2204_v33 = vpop.permute.xlu2 %2203  ;;  %v973_v60 = vsel %vm949_vm12, %v971_v23, %v972_v35  ;;  %v997_v39 = vsel %vm949_vm12, %v972_v35, 0.0  ;;  %v772_v20 = vmul.f32 %v2358_v45, %v2982_v2 }
 0x130   : > { %v2179_v34 = vpop.permute.xlu0 %2178  ;;  %v2206_v49 = vunpack.i.h.bf16 %v2204_v33  ;;  %v2205_v42 = vunpack.i.l.bf16 %v2204_v33  ;;  %v759_v41 = vmul.f32 %v2356_v29, %v758_v36  ;;  %v2252_v55 = vpack.i.bf16 %v997_v39, %v973_v60 }
 0x131   : > { %v773_v18 = vsub.f32 1.0, %v772_v20  ;;  %vm777_vm5 = vweird.f32 %v2358_v45  ;;  %v2181_v13 = vunpack.i.h.bf16 %v2179_v34  ;;  %v2180_v53 = vunpack.i.l.bf16 %v2179_v34  ;;  %v2088_v20 = vld [vmem:[%s3380_s3 + $0x10] sm:$0xf] }
 0x132   : > { %v1153_v46 = vsel %vm1150_vm15, %v1132_v47, %v2205_v42  ;;  %v1154_v63 = vsel %vm1150_vm15, %v1133_v50, %v2206_v49  ;;  %v760_v0 = vadd.f32 %v2356_v29, %v759_v41  ;;  %2253 = vrot.lane.b32.xlu0 %v2252_v55, %s2464_s29  ;;  %vm778_vm8 = vmor %vm776_vm6, %vm777_vm5  ;;  %v783_v35 = vor.u32 1.1754944e-38, %v782_v3 }
 0x133   : > { %v1173_v56 = vpack.c.bf16 %v1153_v46, %v1153_v46  ;;  %v1174_v43 = vpack.c.bf16 %v1154_v63, %v1154_v63  ;;  %v774_v10 = vmul.f32 %v2358_v45, %v773_v18  ;;  %v1130_v60 = vsel %vm342_vm1, %v939_v61, %v2180_v53 }
 0x134   : > { %v764_v44 = vsel %vm763_vm4, %v2356_v29, %v760_v0  ;;  %v1131_v2 = vsel %vm342_vm1, %v2610_v14, %v2181_v13  ;;  %v2133_v14 = vld [vmem:[%s3380_s3 + $0x10] sm:$0x30]  ;;  %v978_v18 = vrot.slane %v2931_v17, 1 }
 0x135   : > { %v1212_v11 = vunpack.c.l.b16 %v1173_v56  ;;  %v1213_v32 = vunpack.c.l.b16 %v1174_v43  ;;  %v769_v23 = vsel %vm3001_vm0, %v768_v57, %v764_v44  ;;  %v775_v48 = vadd.f32 %v2358_v45, %v774_v10 }
 0x136   : > { %v3024_v25 = vmul.f32 %v769_v23, %v2914_v52  ;;  %v2089_v41 = vor.u32 %v2133_v14, %v2088_v20  ;;  %v979_v17 = vsel %vm949_vm12, %v977_v5, %v978_v18  ;;  %v999_v13 = vsel %vm949_vm12, %v978_v18, 0.0 }
 0x137   : > { %v1228_v24 = vpack.c.b16 %v1213_v32, %v1212_v11  ;;  %v779_v36 = vsel %vm778_vm8, %v2358_v45, %v775_v48  ;;  %v2272_v44 = vpack.i.bf16 %v999_v13, %v979_v17  ;;  %v941_v48 = vsel %vm888_vm11, 0.0, %v895_v27 }
 0x138   : > { %v2184_v29 = vpop.permute.xlu0 %2183  ;;  %v784_v34 = vsel %vm781_vm9, %v783_v35, %v779_v36  ;;  %v913_v47 = vrot.slane %v3024_v25, 7  ;;  %v1401_v0 = vsel %vm1266_vm3, %v2089_v41, 0 }
 0x139   : > { %v2186_v33 = vunpack.i.h.bf16 %v2184_v29  ;;  %v2185_v30 = vunpack.i.l.bf16 %v2184_v29  ;;  %2064 = vmatmul.msk.bf16.vlgmr.msrb.gmra.mxu1 %vm1241_vm7, %v1228_v24  ;;  %v833_v52 = vmul.f32 %v784_v34, %v2935_v6  ;;  %v974_v6 = vrot.slane %v3024_v25, 1  ;;  %1410 = vmatpush.bf16.msra.mxu3 %v1401_v0 }
 0x13a   : > { %2268 = vrot.lane.b32.xlu0 %v2267_v62, %s2463_s27 }
 0x13b   : > { %v1151_v45 = vsel %vm1150_vm15, %v1130_v60, %v2185_v30  ;;  %v1152_v39 = vsel %vm1150_vm15, %v1131_v2, %v2186_v33  ;;  %v914_v50 = vrot.slane %v833_v52, 7  ;;  %v2257_v55 = vpack.i.bf16 %v833_v52, %v3024_v25 }
 0x13c   : > { %v1171_v49 = vpack.c.bf16 %v1151_v45, %v1151_v45  ;;  %v1172_v42 = vpack.c.bf16 %v1152_v39, %v1152_v39  ;;  %v975_v57 = vrot.slane %v833_v52, 1 }
 0x13d   : > { %2258 = vrot.lane.b32.xlu1 %v2257_v55, %s2463_s27  ;;  %v3054_v43 = vsel %vm888_vm11, %v913_v47, %v914_v50 }
 0x13e   : > { %v1321_v46 = vunpack.c.l.b16 %v1171_v49  ;;  %v1322_v63 = vunpack.c.l.b16 %v1172_v42  ;;  %v976_v3 = vsel %vm949_vm12, %v974_v6, %v975_v57  ;;  %v998_v56 = vsel %vm949_vm12, %v975_v57, 0.0 }
 0x13f   : > { %v2262_v10 = vpack.i.bf16 %v998_v56, %v976_v3 }
 0x140   : > { %v1323_v31 = vpack.c.b16 %v1322_v63, %v1321_v46 }
 0x141   : > { %2263 = vrot.lane.b32.xlu2 %v2262_v10, %s2464_s29 }
 0x142   : > { %2076 = vmatmul.msk.bf16.vlgmr.msra.gmra.mxu2 %vm1241_vm7, %v1323_v31 }
 0x145   : > { %2273 = vrot.lane.b32.xlu1 %v2272_v44, %s2464_s29 }
 0x14f   : > { %v2189_v11 = vpop.permute.xlu1 %2188 }
 0x150   : > { %v2191_v32 = vunpack.i.h.bf16 %v2189_v11  ;;  %v2190_v53 = vunpack.i.l.bf16 %v2189_v11 }
 0x152   : > { %2077 = vmatmul.msk.bf16.gmra.mxu2 %vm1241_vm7, %v1228_v24  ;;  %v1134_v29 = vsel %vm342_vm1, %v941_v48, %v2190_v53  ;;  %v1135_v36 = vsel %vm342_vm1, %v2678_v1, %v2191_v32  ;;  %v942_v1 = vsel %vm888_vm11, 0.0, %v898_v16 }
 0x157   : > { %v2194_v23 = vpop.permute.xlu1 %2193  ;;  %v2219_v18 = vpop.permute.xlu2 %2218 }
 0x158   : > { %v2196_v61 = vunpack.i.h.bf16 %v2194_v23  ;;  %v2195_v35 = vunpack.i.l.bf16 %v2194_v23  ;;  %v2221_v4 = vunpack.i.h.bf16 %v2219_v18  ;;  %v2220_v46 = vunpack.i.l.bf16 %v2219_v18 }
 0x15a   : > { %v1155_v33 = vsel %vm1150_vm15, %v1134_v29, %v2195_v35  ;;  %v1156_v30 = vsel %vm1150_vm15, %v1135_v36, %v2196_v61  ;;  %v1139_v3 = vsel %vm342_vm1, %v2769_v26, %v2221_v4  ;;  %v944_v61 = vsel %vm888_vm11, 0.0, %v904_v15 }
 0x15b   : > { %v1175_v34 = vpack.c.bf16 %v1155_v33, %v1155_v33  ;;  %v1176_v24 = vpack.c.bf16 %v1156_v30, %v1156_v30  ;;  %v945_v15 = vsel %vm888_vm11, 0.0, %v907_v22 }
 0x15d   : > { %v1214_v60 = vunpack.c.l.b16 %v1175_v34  ;;  %v1215_v2 = vunpack.c.l.b16 %v1176_v24 }
 0x15f   : > { %v2209_v62 = vpop.permute.xlu0 %2208  ;;  %v1229_v5 = vpack.c.b16 %v1215_v2, %v1214_v60 }
 0x160   : > { %v2211_v19 = vunpack.i.h.bf16 %v2209_v62  ;;  %v2210_v27 = vunpack.i.l.bf16 %v2209_v62 }
 0x161   : > { %2065 = vmatmul.msk.bf16.gmra.mxu1 %vm1241_vm7, %v1229_v5  ;;  %2090 = vmatmul.msk.bf16.vlgmr.msra.gmra.mxu3 %vm1241_vm7, %v1229_v5 }
 0x162   : > { %2078 = vmatmul.msk.bf16.gmra.mxu2 %vm1241_vm7, %v1229_v5  ;;  %v1137_v20 = vsel %vm342_vm1, %v2717_v28, %v2211_v19  ;;  %v1136_v14 = vsel %vm342_vm1, %v942_v1, %v2210_v27  ;;  %v943_v28 = vsel %vm888_vm11, 0.0, %v901_v9 }
 0x163   : > { %v2214_v52 = vpop.permute.xlu1 %2213  ;;  %v1138_v56 = vsel %vm342_vm1, %v943_v28, %v2220_v46 }
 0x164   : > { %v2216_v45 = vunpack.i.h.bf16 %v2214_v52  ;;  %v2215_v39 = vunpack.i.l.bf16 %v2214_v52 }
 0x166   : > { %v1157_v49 = vsel %vm1150_vm15, %v1136_v14, %v2215_v39  ;;  %v1158_v42 = vsel %vm1150_vm15, %v1137_v20, %v2216_v45 }
 0x167   : > { %v1177_v41 = vpack.c.bf16 %v1157_v49, %v1157_v49  ;;  %v1178_v6 = vpack.c.bf16 %v1158_v42, %v1158_v42 }
 0x169   : > { %v1216_v50 = vunpack.c.l.b16 %v1177_v41  ;;  %v1217_v55 = vunpack.c.l.b16 %v1178_v6 }
 0x16b   : > { %v1230_v57 = vpack.c.b16 %v1217_v55, %v1216_v50  ;;  %v946_v50 = vsel %vm888_vm11, 0.0, %v910_v12 }
 0x170   : > { %v2234_v53 = vpop.permute.xlu2 %2233 }
 0x171   : > { %2066 = vmatmul.msk.bf16.gmra.mxu1 %vm1241_vm7, %v1230_v57  ;;  %2091 = vmatmul.msk.bf16.gmra.mxu3 %vm1241_vm7, %v1230_v57  ;;  %v2236_v26 = vunpack.i.h.bf16 %v2234_v53  ;;  %v2235_v48 = vunpack.i.l.bf16 %v2234_v53 }
 0x172   : > { %2079 = vmatmul.msk.bf16.gmra.mxu2 %vm1241_vm7, %v1230_v57 }
 0x173   : > { %v2224_v16 = vpop.permute.xlu0 %2223 }
 0x174   : > { %v2226_v63 = vunpack.i.h.bf16 %v2224_v16  ;;  %v2225_v0 = vunpack.i.l.bf16 %v2224_v16 }
 0x176   : > { %v1160_v10 = vsel %vm1150_vm15, %v1139_v3, %v2226_v63  ;;  %v1159_v31 = vsel %vm1150_vm15, %v1138_v56, %v2225_v0 }
 0x177   : > { %v1179_v17 = vpack.c.bf16 %v1159_v31, %v1159_v31  ;;  %v1180_v13 = vpack.c.bf16 %v1160_v10, %v1160_v10 }
 0x179   : > { %v1218_v44 = vunpack.c.l.b16 %v1179_v17  ;;  %v1219_v11 = vunpack.c.l.b16 %v1180_v13  ;;  %v947_v13 = vsel %vm888_vm11, 0.0, %v913_v47  ;;  %v948_v47 = vsel %vm888_vm11, 0.0, %v916_v54 }
 0x17b   : > { %v1231_v32 = vpack.c.b16 %v1219_v11, %v1218_v44 }
 0x17f   : > { %v2229_v59 = vpop.permute.xlu1 %2228 }
 0x180   : > { %v2231_v9 = vunpack.i.h.bf16 %v2229_v59  ;;  %v2230_v23 = vunpack.i.l.bf16 %v2229_v59 }
 0x181   : > { %2067 = vmatmul.msk.bf16.gmra.mxu1 %vm1241_vm7, %v1231_v32  ;;  %2092 = vmatmul.msk.bf16.gmra.mxu3 %vm1241_vm7, %v1231_v32 }
 0x182   : > { %2080 = vmatmul.msk.bf16.gmra.mxu2 %vm1241_vm7, %v1231_v32  ;;  %v1141_v35 = vsel %vm342_vm1, %v2908_v7, %v2231_v9  ;;  %v1140_v29 = vsel %vm342_vm1, %v944_v61, %v2230_v23 }
 0x183   : > { %v1161_v36 = vsel %vm1150_vm15, %v1140_v29, %v2235_v48  ;;  %v1162_v33 = vsel %vm1150_vm15, %v1141_v35, %v2236_v26 }
 0x184   : > { %v1181_v30 = vpack.c.bf16 %v1161_v36, %v1161_v36  ;;  %v1182_v34 = vpack.c.bf16 %v1162_v33, %v1162_v33 }
 0x186   : > { %v1220_v24 = vunpack.c.l.b16 %v1181_v30  ;;  %v1221_v60 = vunpack.c.l.b16 %v1182_v34 }
 0x188   : > { %v1232_v2 = vpack.c.b16 %v1221_v60, %v1220_v24 }
 0x189   : > { %v2249_v6 = vpop.permute.xlu2 %2248 }
 0x18a   : > { %v2251_v21 = vunpack.i.h.bf16 %v2249_v6  ;;  %v2250_v22 = vunpack.i.l.bf16 %v2249_v6 }
 0x18c   : > { %v1145_v18 = vsel %vm342_vm1, %v2999_v38, %v2251_v21  ;;  %v1144_v4 = vsel %vm342_vm1, %v946_v50, %v2250_v22 }
 0x18f   : > { %v2239_v62 = vpop.permute.xlu0 %2238 }
 0x190   : > { %v2241_v5 = vunpack.i.h.bf16 %v2239_v62  ;;  %v2240_v19 = vunpack.i.l.bf16 %v2239_v62 }
 0x191   : > { %2068 = vmatmul.msk.bf16.gmra.mxu1 %vm1241_vm7, %v1232_v2  ;;  %2093 = vmatmul.msk.bf16.gmra.mxu3 %vm1241_vm7, %v1232_v2 }
 0x192   : > { %2081 = vmatmul.msk.bf16.gmra.mxu2 %vm1241_vm7, %v1232_v2  ;;  %v1143_v52 = vsel %vm342_vm1, %v2968_v40, %v2241_v5  ;;  %v1142_v1 = vsel %vm342_vm1, %v945_v15, %v2240_v19 }
 0x193   : > { %v2244_v58 = vpop.permute.xlu1 %2243 }
 0x194   : > { %v2246_v7 = vunpack.i.h.bf16 %v2244_v58  ;;  %v2245_v27 = vunpack.i.l.bf16 %v2244_v58 }
 0x196   : > { %v1163_v45 = vsel %vm1150_vm15, %v1142_v1, %v2245_v27  ;;  %v1164_v39 = vsel %vm1150_vm15, %v1143_v52, %v2246_v7  ;;  %v3150_v1 = vld [vmem:[%s3381_s4] ss:$0 sm:$0xff] }
 0x197   : > { %v1183_v20 = vpack.c.bf16 %v1163_v45, %v1163_v45  ;;  %v1184_v14 = vpack.c.bf16 %v1164_v39, %v1164_v39 }
 0x199   : > { %v1222_v49 = vunpack.c.l.b16 %v1183_v20  ;;  %v1223_v42 = vunpack.c.l.b16 %v1184_v14 }
 0x19b   : > { %v1233_v41 = vpack.c.b16 %v1223_v42, %v1222_v49  ;;  %v2264_v10 = vpop.permute.xlu2 %2263 }
 0x19c   : > { %v2266_v38 = vunpack.i.h.bf16 %v2264_v10  ;;  %v2265_v17 = vunpack.i.l.bf16 %v2264_v10 }
 0x1a1   : > { %2069 = vmatmul.msk.bf16.gmra.mxu1 %vm1241_vm7, %v1233_v41  ;;  %2094 = vmatmul.msk.bf16.gmra.mxu3 %vm1241_vm7, %v1233_v41 }
 0x1a2   : > { %2082 = vmatmul.msk.bf16.gmra.mxu2 %vm1241_vm7, %v1233_v41 }
 0x1a4   : > { %v2254_v40 = vpop.permute.xlu0 %2253 }
 0x1a5   : > { %v2256_v55 = vunpack.i.h.bf16 %v2254_v40  ;;  %v2255_v57 = vunpack.i.l.bf16 %v2254_v40 }
 0x1a7   : > { %v1166_v46 = vsel %vm1150_vm15, %v1145_v18, %v2256_v55  ;;  %v1165_v16 = vsel %vm1150_vm15, %v1144_v4, %v2255_v57 }
 0x1a8   : > { %v1185_v28 = vpack.c.bf16 %v1165_v16, %v1165_v16  ;;  %v1186_v63 = vpack.c.bf16 %v1166_v46, %v1166_v46 }
 0x1aa   : > { %v1224_v0 = vunpack.c.l.b16 %v1185_v28  ;;  %v1225_v3 = vunpack.c.l.b16 %v1186_v63 }
 0x1ac   : > { %v1234_v56 = vpack.c.b16 %v1225_v3, %v1224_v0  ;;  %v2269_v44 = vpop.permute.xlu0 %2268 }
 0x1ad   : > { %v2271_v26 = vunpack.i.h.bf16 %v2269_v44  ;;  %v2270_v48 = vunpack.i.l.bf16 %v2269_v44 }
 0x1af   : > { %v2259_v8 = vpop.permute.xlu1 %2258  ;;  %v1149_v33 = vsel %vm342_vm1, %v2978_v51, %v2271_v26  ;;  %v1148_v30 = vsel %vm342_vm1, %v948_v47, %v2270_v48 }
 0x1b0   : > { %v2261_v31 = vunpack.i.h.bf16 %v2259_v8  ;;  %v2260_v12 = vunpack.i.l.bf16 %v2259_v8 }
 0x1b1   : > { %2070 = vmatmul.msk.bf16.gmra.mxu1 %vm1241_vm7, %v1234_v56  ;;  %2095 = vmatmul.msk.bf16.gmra.mxu3 %vm1241_vm7, %v1234_v56 }
 0x1b2   : > { %2083 = vmatmul.msk.bf16.gmra.mxu2 %vm1241_vm7, %v1234_v56  ;;  %v1147_v11 = vsel %vm342_vm1, %v3054_v43, %v2261_v31  ;;  %v1146_v32 = vsel %vm342_vm1, %v947_v13, %v2260_v12 }
 0x1b3   : > { %v1167_v53 = vsel %vm1150_vm15, %v1146_v32, %v2265_v17  ;;  %v1168_v59 = vsel %vm1150_vm15, %v1147_v11, %v2266_v38  ;;  %v263_v11 = vld [vmem:[%s2543_s15] sm:$0xff]  }
 0x1b4   : > { %v1187_v9 = vpack.c.bf16 %v1167_v53, %v1167_v53  ;;  %v1188_v23 = vpack.c.bf16 %v1168_v59, %v1168_v59 }
 0x1b6   : > { %v1226_v61 = vunpack.c.l.b16 %v1187_v9  ;;  %v1227_v25 = vunpack.c.l.b16 %v1188_v23  ;;  %v1279_v54 = vpop.f32.mrf.mxu1 }
 0x1b7   : > { %v2274_v35 = vpop.permute.xlu1 %2273 }
 0x1b8   : > { %v2276_v29 = vunpack.i.h.bf16 %v2274_v35  ;;  %v2275_v36 = vunpack.i.l.bf16 %v2274_v35  ;;  %v1235_v43 = vpack.c.b16 %v1227_v25, %v1226_v61  ;;  %v1808_v35 = vunpack.c.l.bf16 %v263_v11 }
 0x1ba   : > { %v1169_v34 = vsel %vm1150_vm15, %v1148_v30, %v2275_v36  ;;  %v1170_v24 = vsel %vm1150_vm15, %v1149_v33, %v2276_v29 }
 0x1bb   : > { %v1189_v60 = vpack.c.bf16 %v1169_v34, %v1169_v34  ;;  %v1190_v2 = vpack.c.bf16 %v1170_v24, %v1170_v24 }
 0x1bd   : > { %v1389_v62 = vunpack.c.l.b16 %v1189_v60  ;;  %v1390_v5 = vunpack.c.l.b16 %v1190_v2 }
 0x1be   : > { %v1281_v51 = vpop.f32.mrf.mxu1 }
 0x1bf   : > { %v1391_v19 = vpack.c.b16 %v1390_v5, %v1389_v62 }
 0x1c1   : > { %2071 = vmatmul.msk.bf16.gmra.mxu1 %vm1241_vm7, %v1235_v43  ;;  %2096 = vmatmul.msk.bf16.gmra.mxu3 %vm1241_vm7, %v1235_v43 }
 0x1c5   : > { %v1344_v37 = vpop.f32.mrf.mxu2 }
 0x1c6   : > { %v1345_v52 = vadd.f32 %v1344_v37, %v1279_v54 }
 0x1cd   : > { %v1346_v58 = vpop.f32.mrf.mxu2 }
 0x1ce   : > { %v1347_v42 = vadd.f32 %v1346_v58, %v1281_v51 }
 0x1d1   : > { %2097 = vmatmul.msk.bf16.gmra.mxu3 %vm1241_vm7, %v1391_v19 }
 0x1d5   : > { %v1349_v15 = vpop.f32.mrf.mxu2 }
 0x1dd   : > { %v1351_v27 = vpop.f32.mrf.mxu2 }
 0x1de   : > { %v1284_v7 = vpop.f32.mrf.mxu1 }
 0x1df   : > { %v1350_v18 = vadd.f32 %v1349_v15, %v1284_v7 }
 0x1e4   : > { %v1412_v45 = vpop.f32.mrf.mxu3 }
 0x1e5   : > { %v1452_v39 = vadd.f32 %v1412_v45, %v1345_v52  ;;  %v1354_v41 = vpop.f32.mrf.mxu2 }
 0x1e6   : > { %v1286_v20 = vpop.f32.mrf.mxu1 }
 0x1e7   : > { %v1472_v14 = vadd.f32 %v3150_v1, %v1452_v39  ;;  %v1352_v31 = vadd.f32 %v1351_v27, %v1286_v20  ;;  %v1809_v39 = vunpack.c.h.bf16 %v263_v11 }
 0x1e9   : > { %v2098_v49 = vmul.f32 -1.442695, %v1472_v14 }
 0x1eb   : > { %2359 = vpow2.f32 %v2098_v49 }
 0x1ec   : > { %v1414_v6 = vpop.f32.mrf.mxu3 }
 0x1ed   : > { %v1453_v21 = vadd.f32 %v1414_v6, %v1347_v42  ;;  %v3157_v46 = vpop.f32.mrf.mxu2 }
 0x1ee   : > { %v1289_v22 = vpop.f32.mrf.mxu1 }
 0x1ef   : > { %v3154_v40 = vadd.f32 %v3150_v1, %v1453_v21  ;;  %v1355_v47 = vadd.f32 %v1354_v41, %v1289_v22 }
 0x1f1   : > { %v2360_v50 = vpop.eup %2359  ;;  %v2099_v55 = vmul.f32 -1.442695, %v3154_v40 }
 0x1f2   : > { %v1536_v57 = vadd.f32 1.0, %v2360_v50 }
 0x1f3   : > { %2361 = vpow2.f32 %v2099_v55 }
 0x1f4   : > { %2363 = vrcp.f32 %v1536_v57  ;;  %v1417_v4 = vpop.f32.mrf.mxu3  ;;  %v1563_v13 = vand.u32 2147483648, %v1536_v57  ;;  %v1561_v53 = vand.u32 2147483647, %v1536_v57  ;;  %vm1557_vm11 = vweird.f32 %v1536_v57 }
 0x1f5   : > { %v1454_v16 = vadd.f32 %v1417_v4, %v1350_v18  ;;  %v3166_v59 = vpop.f32.mrf.mxu2  ;;  %v265_v4 = vld [vmem:[%s2543_s15 + $0x8] sm:$0xff]  }
 0x1f6   : > { %v1291_v28 = vpop.f32.mrf.mxu1  ;;  %v1564_v25 = vor.u32 1.1754944e-38, %v1563_v13  ;;  %vm1562_vm3 = vcmp.eq.f32.partialorder %v1561_v53, 8.507059e+37 }
 0x1f7   : > { %v3160_v63 = vadd.f32 %v3150_v1, %v1454_v16  ;;  %v1357_v20 = vadd.f32 %v3157_v46, %v1291_v28 }
 0x1f9   : > { %v2362_v0 = vpop.eup %2361  ;;  %v2100_v3 = vmul.f32 -1.442695, %v3160_v63 }
 0x1fa   : > { %v2364_v56 = vpop.eup %2363  ;;  %v1537_v10 = vadd.f32 1.0, %v2362_v0 }
 0x1fb   : > { %v1553_v8 = vmul.f32 %v2364_v56, %v1536_v57  ;;  %2365 = vpow2.f32 %v2100_v3  ;;  %vm1558_vm1 = vweird.f32 %v2364_v56 }
 0x1fc   : > { %2367 = vrcp.f32 %v1537_v10  ;;  %v1419_v12 = vpop.f32.mrf.mxu3  ;;  %vm1559_vm12 = vmor %vm1557_vm11, %vm1558_vm1  ;;  %v1576_v2 = vand.u32 2147483647, %v1537_v10  ;;  %v1578_v62 = vand.u32 2147483648, %v1537_v10  ;;  %vm1572_vm14 = vweird.f32 %v1537_v10 }
 0x1fd   : > { %v1554_v38 = vsub.f32 1.0, %v1553_v8  ;;  %v1455_v17 = vadd.f32 %v1419_v12, %v1352_v31  ;;  %v3186_v7 = vpop.f32.mrf.mxu2  ;;  %v1810_v31 = vunpack.c.l.bf16 %v265_v4 }
 0x1fe   : > { %v3163_v44 = vpop.f32.mrf.mxu1  ;;  %v1579_v45 = vor.u32 1.1754944e-38, %v1578_v62  ;;  %vm1577_vm0 = vcmp.eq.f32.partialorder %v1576_v2, 8.507059e+37 }
 0x1ff   : > { %v1555_v32 = vmul.f32 %v2364_v56, %v1554_v38  ;;  %v3169_v9 = vadd.f32 %v3150_v1, %v1455_v17  ;;  %v1360_v12 = vadd.f32 %v3166_v59, %v3163_v44 }
 0x201   : > { %v2366_v23 = vpop.eup %2365  ;;  %v1556_v26 = vadd.f32 %v2364_v56, %v1555_v32  ;;  %v2101_v48 = vmul.f32 -1.442695, %v3169_v9 }
 0x202   : > { %v2368_v61 = vpop.eup %2367  ;;  %v3172_v29 = vadd.f32 1.0, %v2366_v23 }
 0x203   : > { %v1560_v36 = vsel %vm1559_vm12, %v2364_v56, %v1556_v26  ;;  %v1568_v43 = vmul.f32 %v2368_v61, %v1537_v10  ;;  %2369 = vpow2.f32 %v2101_v48  ;;  %vm1573_vm10 = vweird.f32 %v2368_v61 }
 0x204   : > { %v1565_v33 = vsel %vm1562_vm3, %v1564_v25, %v1560_v36  ;;  %2371 = vrcp.f32 %v3172_v29  ;;  %v1422_v30 = vpop.f32.mrf.mxu3  ;;  %vm1574_vm15 = vmor %vm1572_vm14, %vm1573_vm10  ;;  %v1591_v55 = vand.u32 2147483647, %v3172_v29  ;;  %v1593_v57 = vand.u32 2147483648, %v3172_v29 }
 0x205   : > { %v1792_v34 = vmul.f32 %v1565_v33, %v1472_v14  ;;  %v1569_v24 = vsub.f32 1.0, %v1568_v43  ;;  %v1456_v60 = vadd.f32 %v1422_v30, %v1355_v47  ;;  %vm1587_vm4 = vweird.f32 %v3172_v29  ;;  %v1364_v11 = vpop.f32.mrf.mxu2 }
 0x206   : > { %v3179_v54 = vpop.f32.mrf.mxu1  ;;  %v1594_v8 = vor.u32 1.1754944e-38, %v1593_v57  ;;  %vm1592_vm6 = vcmp.eq.f32.partialorder %v1591_v55, 8.507059e+37  ;;  %v1811_v30 = vunpack.c.h.bf16 %v265_v4 }
 0x207   : > { %v1824_v5 = vadd.f32 %v1808_v35, %v1792_v34  ;;  %v1570_v19 = vmul.f32 %v2368_v61, %v1569_v24  ;;  %v3177_v37 = vadd.f32 %v3150_v1, %v1456_v60  ;;  %v1362_v34 = vadd.f32 %v3186_v7, %v3179_v54 }
 0x209   : > { %v2370_v58 = vpop.eup %2369  ;;  %v1840_v51 = vpack.c.bf16 %v1824_v5, %v1824_v5  ;;  %v1571_v15 = vadd.f32 %v2368_v61, %v1570_v19  ;;  %v2102_v27 = vmul.f32 -1.442695, %v3177_v37 }
 0x20a   : > { %v2372_v52 = vpop.eup %2371  ;;  %v3190_v14 = vadd.f32 1.0, %v2370_v58 }
 0x20b   : > { %1857 = vst.msk [vmem:[%s3184_s30] sm:$0xf] %vm1856_vm13, %v1840_v51  ;;  %v1575_v49 = vsel %vm1574_vm15, %v2368_v61, %v1571_v15  ;;  %v1583_v42 = vmul.f32 %v2372_v52, %v3172_v29  ;;  %2373 = vpow2.f32 %v2102_v27  ;;  %vm1588_vm2 = vweird.f32 %v2372_v52 }
 0x20c   : > { %v1580_v41 = vsel %vm1577_vm0, %v1579_v45, %v1575_v49  ;;  %2375 = vrcp.f32 %v3190_v14  ;;  %v1424_v6 = vpop.f32.mrf.mxu3  ;;  %vm1589_vm5 = vmor %vm1587_vm4, %vm1588_vm2  ;;  %v1606_v44 = vand.u32 2147483647, %v3190_v14  ;;  %v1608_v59 = vand.u32 2147483648, %v3190_v14  ;;  %v267_v45 = vld [vmem:[%s2543_s15 + $0x10] sm:$0xff]  }
 0x20d   : > { %v1793_v21 = vmul.f32 %v1580_v41, %v3154_v40  ;;  %v1584_v22 = vsub.f32 1.0, %v1583_v42  ;;  %v1457_v50 = vadd.f32 %v1424_v6, %v1357_v20  ;;  %vm1602_vm8 = vweird.f32 %v3190_v14  ;;  %v1366_v15 = vpop.f32.mrf.mxu2 }
 0x20e   : > { %v3205_v56 = vpop.f32.mrf.mxu1  ;;  %v1609_v33 = vor.u32 1.1754944e-38, %v1608_v59  ;;  %vm1607_vm1 = vcmp.eq.f32.partialorder %v1606_v44, 8.507059e+37 }
 0x20f   : > { %v1825_v18 = vadd.f32 %v1809_v39, %v1793_v21  ;;  %v1585_v46 = vmul.f32 %v2372_v52, %v1584_v22  ;;  %v3201_v16 = vadd.f32 %v3150_v1, %v1457_v50  ;;  %v1812_v21 = vunpack.c.l.bf16 %v267_v45 }
 0x210   : > { %v1365_v22 = vadd.f32 %v1364_v11, %v3205_v56 }
 0x211   : > { %v2374_v28 = vpop.eup %2373  ;;  %v1841_v0 = vpack.c.bf16 %v1825_v18, %v1825_v18  ;;  %v1586_v3 = vadd.f32 %v2372_v52, %v1585_v46  ;;  %v2103_v40 = vmul.f32 -1.442695, %v3201_v16 }
 0x212   : > { %v2376_v10 = vpop.eup %2375  ;;  %v3209_v38 = vadd.f32 1.0, %v2374_v28 }
 0x213   : > { %1858 = vst.msk [vmem:[%s3184_s30 + $0x4] sm:$0xf] %vm1856_vm13, %v1841_v0  ;;  %v1590_v17 = vsel %vm1589_vm5, %v2372_v52, %v1586_v3  ;;  %v1598_v13 = vmul.f32 %v2376_v10, %v3190_v14  ;;  %2377 = vpow2.f32 %v2103_v40  ;;  %vm1603_vm7 = vweird.f32 %v2376_v10 }
 0x214   : > { %v1595_v32 = vsel %vm1592_vm6, %v1594_v8, %v1590_v17  ;;  %2379 = vrcp.f32 %v3209_v38  ;;  %v1427_v53 = vpop.f32.mrf.mxu3  ;;  %vm1604_vm9 = vmor %vm1602_vm8, %vm1603_vm7  ;;  %v1621_v7 = vand.u32 2147483647, %v3209_v38  ;;  %v1623_v27 = vand.u32 2147483648, %v3209_v38 }
 0x215   : > { %v1794_v23 = vmul.f32 %v1595_v32, %v3160_v63  ;;  %v1599_v26 = vsub.f32 1.0, %v1598_v13  ;;  %v1458_v48 = vadd.f32 %v1427_v53, %v1360_v12  ;;  %vm1617_vm12 = vweird.f32 %v3209_v38 }
 0x216   : > { %v1301_v62 = vpop.f32.mrf.mxu1  ;;  %v1624_v6 = vor.u32 1.1754944e-38, %v1623_v27  ;;  %vm1622_vm10 = vcmp.eq.f32.partialorder %v1621_v7, 8.507059e+37  ;;  %v1813_v53 = vunpack.c.h.bf16 %v267_v45 }
 0x217   : > { %v1826_v61 = vadd.f32 %v1810_v31, %v1794_v23  ;;  %v1600_v25 = vmul.f32 %v2376_v10, %v1599_v26  ;;  %v3219_v35 = vadd.f32 %v3150_v1, %v1458_v48  ;;  %v1369_v31 = vpop.f32.mrf.mxu2  ;;  %v1367_v23 = vadd.f32 %v1366_v15, %v1301_v62 }
 0x219   : > { %v2378_v47 = vpop.eup %2377  ;;  %v1842_v29 = vpack.c.bf16 %v1826_v61, %v1826_v61  ;;  %v1601_v36 = vadd.f32 %v2376_v10, %v1600_v25  ;;  %v2104_v63 = vmul.f32 -1.442695, %v3219_v35 }
 0x21a   : > { %v2380_v43 = vpop.eup %2379  ;;  %v3225_v24 = vadd.f32 1.0, %v2378_v47 }
 0x21b   : > { %1859 = vst.msk [vmem:[%s3184_s30 + $0x8] sm:$0xf] %vm1856_vm13, %v1842_v29  ;;  %v1605_v60 = vsel %vm1604_vm9, %v2376_v10, %v1601_v36  ;;  %v1613_v2 = vmul.f32 %v2380_v43, %v3209_v38  ;;  %2381 = vpow2.f32 %v2104_v63  ;;  %vm1618_vm11 = vweird.f32 %v2380_v43 }
 0x21c   : > { %v1610_v5 = vsel %vm1607_vm1, %v1609_v33, %v1605_v60  ;;  %2383 = vrcp.f32 %v3225_v24  ;;  %v1429_v19 = vpop.f32.mrf.mxu3  ;;  %vm1619_vm3 = vmor %vm1617_vm12, %vm1618_vm11  ;;  %v1636_v40 = vand.u32 2147483647, %v3225_v24  ;;  %v1638_v56 = vand.u32 2147483648, %v3225_v24  ;;  %v269_v33 = vld [vmem:[%s2543_s15 + $0x18] sm:$0xff]  }
 0x21d   : > { %v1795_v58 = vmul.f32 %v1610_v5, %v3169_v9  ;;  %v1614_v51 = vsub.f32 1.0, %v1613_v2  ;;  %v1459_v54 = vadd.f32 %v1429_v19, %v1362_v34  ;;  %vm1632_vm15 = vweird.f32 %v3225_v24 }
 0x21e   : > { %v1304_v0 = vpop.f32.mrf.mxu1  ;;  %v1639_v32 = vor.u32 1.1754944e-38, %v1638_v56  ;;  %vm1637_vm2 = vcmp.eq.f32.partialorder %v1636_v40, 8.507059e+37 }
 0x21f   : > { %v1827_v52 = vadd.f32 %v1811_v30, %v1795_v58  ;;  %v1615_v39 = vmul.f32 %v2380_v43, %v1614_v51  ;;  %v3236_v20 = vadd.f32 %v3150_v1, %v1459_v54  ;;  %v1814_v51 = vunpack.c.l.bf16 %v269_v33 }
 0x220   : > { %v1370_v15 = vadd.f32 %v1369_v31, %v1304_v0 }
 0x221   : > { %v2382_v14 = vpop.eup %2381  ;;  %v1843_v49 = vpack.c.bf16 %v1827_v52, %v1827_v52  ;;  %v1616_v42 = vadd.f32 %v2380_v43, %v1615_v39  ;;  %v2105_v9 = vmul.f32 -1.442695, %v3236_v20 }
 0x222   : > { %v2384_v41 = vpop.eup %2383  ;;  %v3241_v50 = vadd.f32 1.0, %v2382_v14 }
 0x223   : > { %1860 = vst.msk [vmem:[%s3184_s30 + $0xc] sm:$0xf] %vm1856_vm13, %v1843_v49  ;;  %v1620_v55 = vsel %vm1619_vm3, %v2380_v43, %v1616_v42  ;;  %v1628_v57 = vmul.f32 %v2384_v41, %v3225_v24  ;;  %2385 = vpow2.f32 %v2105_v9  ;;  %vm1633_vm14 = vweird.f32 %v2384_v41 }
 0x224   : > { %v1625_v18 = vsel %vm1622_vm10, %v1624_v6, %v1620_v55  ;;  %2387 = vrcp.f32 %v3241_v50  ;;  %v1432_v4 = vpop.f32.mrf.mxu3  ;;  %vm1634_vm0 = vmor %vm1632_vm15, %vm1633_vm14  ;;  %v1651_v36 = vand.u32 2147483647, %v3241_v50  ;;  %v1653_v63 = vand.u32 2147483648, %v3241_v50 }
 0x225   : > { %v1796_v46 = vmul.f32 %v1625_v18, %v3177_v37  ;;  %v1629_v28 = vsub.f32 1.0, %v1628_v57  ;;  %v1460_v3 = vadd.f32 %v1432_v4, %v1365_v22  ;;  %vm1647_vm5 = vweird.f32 %v3241_v50 }
 0x226   : > { %v1306_v34 = vpop.f32.mrf.mxu1  ;;  %v1654_v58 = vor.u32 1.1754944e-38, %v1653_v63  ;;  %vm1652_vm7 = vcmp.eq.f32.partialorder %v1651_v36, 8.507059e+37 }
 0x227   : > { %v1828_v10 = vadd.f32 %v1812_v21, %v1796_v46  ;;  %v1630_v8 = vmul.f32 %v2384_v41, %v1629_v28  ;;  %v3251_v12 = vadd.f32 %v3150_v1, %v1460_v3  ;;  %v1815_v46 = vunpack.c.h.bf16 %v269_v33 }
 0x229   : > { %v2386_v38 = vpop.eup %2385  ;;  %v1844_v17 = vpack.c.bf16 %v1828_v10, %v1828_v10  ;;  %v1631_v13 = vadd.f32 %v2384_v41, %v1630_v8  ;;  %v2106_v37 = vmul.f32 -1.442695, %v3251_v12 }
 0x22a   : > { %v2388_v11 = vpop.eup %2387  ;;  %v3255_v26 = vadd.f32 1.0, %v2386_v38 }
 0x22b   : > { %1861 = vst.msk [vmem:[%s3184_s30 + $0x10] sm:$0xf] %vm1856_vm13, %v1844_v17  ;;  %v1635_v48 = vsel %vm1634_vm0, %v2384_v41, %v1631_v13  ;;  %v1643_v44 = vmul.f32 %v2388_v11, %v3241_v50  ;;  %2389 = vpow2.f32 %v2106_v37  ;;  %vm1648_vm4 = vweird.f32 %v2388_v11 }
 0x22c   : > { %v1640_v59 = vsel %vm1637_vm2, %v1639_v32, %v1635_v48  ;;  %2391 = vrcp.f32 %v3255_v26  ;;  %v1434_v61 = vpop.f32.mrf.mxu3  ;;  %vm1649_vm6 = vmor %vm1647_vm5, %vm1648_vm4  ;;  %v1666_v42 = vand.u32 2147483647, %v3255_v26  ;;  %v1668_v9 = vand.u32 2147483648, %v3255_v26  ;;  %v271_v32 = vld [vmem:[%s2543_s15 + $0x20] sm:$0xff]  }
 0x22d   : > { %v1797_v25 = vmul.f32 %v1640_v59, %v3201_v16  ;;  %v1644_v47 = vsub.f32 1.0, %v1643_v44  ;;  %v1461_v29 = vadd.f32 %v1434_v61, %v1367_v23  ;;  %v1371_v16 = vpop.f32.mrf.mxu2  ;;  %vm1662_vm9 = vweird.f32 %v3255_v26 }
 0x22e   : > { %v1309_v57 = vpop.f32.mrf.mxu1  ;;  %v1669_v4 = vor.u32 1.1754944e-38, %v1668_v9  ;;  %v1372_v28 = vadd.f32 %v1371_v16, %v1306_v34  ;;  %vm1667_vm11 = vcmp.eq.f32.partialorder %v1666_v42, 8.507059e+37 }
 0x22f   : > { %v1829_v43 = vadd.f32 %v1813_v53, %v1797_v25  ;;  %v1645_v30 = vmul.f32 %v2388_v11, %v1644_v47  ;;  %v3266_v24 = vadd.f32 %v3150_v1, %v1461_v29  ;;  %v1816_v25 = vunpack.c.l.bf16 %v271_v32 }
 0x231   : > { %v2390_v60 = vpop.eup %2389  ;;  %v1845_v2 = vpack.c.bf16 %v1829_v43, %v1829_v43  ;;  %v1646_v62 = vadd.f32 %v2388_v11, %v1645_v30  ;;  %v2107_v5 = vmul.f32 -1.442695, %v3266_v24 }
 0x232   : > { %v2392_v19 = vpop.eup %2391  ;;  %v3270_v54 = vadd.f32 1.0, %v2390_v60 }
 0x233   : > { %1862 = vst.msk [vmem:[%s3184_s30 + $0x14] sm:$0xf] %vm1856_vm13, %v1845_v2  ;;  %v1650_v7 = vsel %vm1649_vm6, %v2388_v11, %v1646_v62  ;;  %v1658_v27 = vmul.f32 %v2392_v19, %v3255_v26  ;;  %2393 = vpow2.f32 %v2107_v5  ;;  %vm1663_vm8 = vweird.f32 %v2392_v19 }
 0x234   : > { %v1655_v52 = vsel %vm1652_vm7, %v1654_v58, %v1650_v7  ;;  %2395 = vrcp.f32 %v3270_v54  ;;  %v1437_v45 = vpop.f32.mrf.mxu3  ;;  %vm1664_vm1 = vmor %vm1662_vm9, %vm1663_vm8  ;;  %v1681_v13 = vand.u32 2147483647, %v3270_v54  ;;  %v1683_v37 = vand.u32 2147483648, %v3270_v54 }
 0x235   : > { %v1798_v39 = vmul.f32 %v1655_v52, %v3219_v35  ;;  %v1659_v14 = vsub.f32 1.0, %v1658_v27  ;;  %v1462_v49 = vadd.f32 %v1437_v45, %v1370_v15  ;;  %v1374_v56 = vpop.f32.mrf.mxu2  ;;  %vm1677_vm3 = vweird.f32 %v3270_v54 }
 0x236   : > { %v1684_v61 = vor.u32 1.1754944e-38, %v1683_v37  ;;  %v1375_v47 = vadd.f32 %v1374_v56, %v1309_v57  ;;  %vm1682_vm14 = vcmp.eq.f32.partialorder %v1681_v13, 8.507059e+37  ;;  %v1311_v43 = vpop.f32.mrf.mxu1  ;;  %v1817_v45 = vunpack.c.h.bf16 %v271_v32 }
 0x237   : > { %v1830_v41 = vadd.f32 %v1814_v51, %v1798_v39  ;;  %v1660_v6 = vmul.f32 %v2392_v19, %v1659_v14  ;;  %v3280_v21 = vadd.f32 %v3150_v1, %v1462_v49 }
 0x239   : > { %v2394_v22 = vpop.eup %2393  ;;  %v1846_v50 = vpack.c.bf16 %v1830_v41, %v1830_v41  ;;  %v1661_v55 = vadd.f32 %v2392_v19, %v1660_v6  ;;  %v2108_v35 = vmul.f32 -1.442695, %v3280_v21 }
 0x23a   : > { %v2396_v18 = vpop.eup %2395  ;;  %v3284_v0 = vadd.f32 1.0, %v2394_v22 }
 0x23b   : > { %1863 = vst.msk [vmem:[%s3184_s30 + $0x18] sm:$0xf] %vm1856_vm13, %v1846_v50  ;;  %v1665_v3 = vsel %vm1664_vm1, %v2392_v19, %v1661_v55  ;;  %v1673_v40 = vmul.f32 %v2396_v18, %v3270_v54  ;;  %2397 = vpow2.f32 %v2108_v35  ;;  %vm1678_vm12 = vweird.f32 %v2396_v18 }
 0x23c   : > { %v1670_v10 = vsel %vm1667_vm11, %v1669_v4, %v1665_v3  ;;  %2399 = vrcp.f32 %v3284_v0  ;;  %v1439_v8 = vpop.f32.mrf.mxu3  ;;  %vm1679_vm10 = vmor %vm1677_vm3, %vm1678_vm12  ;;  %v1696_v16 = vand.u32 2147483647, %v3284_v0  ;;  %v1698_v5 = vand.u32 2147483648, %v3284_v0  ;;  %v273_v4 = vld [vmem:[%s2543_s15 + $0x28] sm:$0xff]  }
 0x23d   : > { %v1799_v31 = vmul.f32 %v1670_v10, %v3236_v20  ;;  %v1674_v38 = vsub.f32 1.0, %v1673_v40  ;;  %v1463_v17 = vadd.f32 %v1439_v8, %v1372_v28  ;;  %v1376_v2 = vpop.f32.mrf.mxu2  ;;  %vm1692_vm0 = vweird.f32 %v3284_v0 }
 0x23e   : > { %v1699_v52 = vor.u32 1.1754944e-38, %v1698_v5  ;;  %v1377_v39 = vadd.f32 %v1376_v2, %v1311_v43  ;;  %vm1697_vm4 = vcmp.eq.f32.partialorder %v1696_v16, 8.507059e+37  ;;  %v1314_v50 = vpop.f32.mrf.mxu1 }
 0x23f   : > { %v1831_v11 = vadd.f32 %v1815_v46, %v1799_v31  ;;  %v1675_v53 = vmul.f32 %v2396_v18, %v1674_v38  ;;  %v3295_v23 = vadd.f32 %v3150_v1, %v1463_v17  ;;  %v1818_v31 = vunpack.c.l.bf16 %v273_v4 }
 0x241   : > { %v2398_v26 = vpop.eup %2397  ;;  %v1847_v48 = vpack.c.bf16 %v1831_v11, %v1831_v11  ;;  %v1676_v44 = vadd.f32 %v2396_v18, %v1675_v53  ;;  %v2109_v20 = vmul.f32 -1.442695, %v3295_v23 }
 0x242   : > { %v2400_v59 = vpop.eup %2399  ;;  %v3299_v29 = vadd.f32 1.0, %v2398_v26 }
 0x243   : > { %1864 = vst.msk [vmem:[%s3184_s30 + $0x1c] sm:$0xf] %vm1856_vm13, %v1847_v48  ;;  %v1680_v36 = vsel %vm1679_vm10, %v2396_v18, %v1676_v44  ;;  %v1688_v63 = vmul.f32 %v2400_v59, %v3284_v0  ;;  %2401 = vpow2.f32 %v2109_v20  ;;  %vm1693_vm15 = vweird.f32 %v2400_v59 }
 0x244   : > { %v1685_v33 = vsel %vm1682_vm14, %v1684_v61, %v1680_v36  ;;  %2403 = vrcp.f32 %v3299_v29  ;;  %v1442_v30 = vpop.f32.mrf.mxu3  ;;  %vm1694_vm2 = vmor %vm1692_vm0, %vm1693_vm15  ;;  %v1711_v57 = vand.u32 2147483647, %v3299_v29  ;;  %v1713_v35 = vand.u32 2147483648, %v3299_v29 }
 0x245   : > { %v1800_v34 = vmul.f32 %v1685_v33, %v3251_v12  ;;  %v1689_v60 = vsub.f32 1.0, %v1688_v63  ;;  %v1464_v62 = vadd.f32 %v1442_v30, %v1375_v47  ;;  %v1379_v28 = vpop.f32.mrf.mxu2  ;;  %vm1707_vm6 = vweird.f32 %v3299_v29 }
 0x246   : > { %v1714_v8 = vor.u32 1.1754944e-38, %v1713_v35  ;;  %v1380_v38 = vadd.f32 %v1379_v28, %v1314_v50  ;;  %vm1712_vm8 = vcmp.eq.f32.partialorder %v1711_v57, 8.507059e+37 }
 0x247   : > { %v1832_v19 = vadd.f32 %v1816_v25, %v1800_v34  ;;  %v1690_v58 = vmul.f32 %v2400_v59, %v1689_v60  ;;  %v3309_v51 = vadd.f32 %v3150_v1, %v1464_v62  ;;  %v1316_v25 = vpop.f32.mrf.mxu1  ;;  %v1819_v34 = vunpack.c.h.bf16 %v273_v4 }
 0x249   : > { %v2402_v15 = vpop.eup %2401  ;;  %v1848_v54 = vpack.c.bf16 %v1832_v19, %v1832_v19  ;;  %v1691_v7 = vadd.f32 %v2400_v59, %v1690_v58  ;;  %v2110_v12 = vmul.f32 -1.442695, %v3309_v51 }
 0x24a   : > { %v2404_v27 = vpop.eup %2403  ;;  %v3313_v14 = vadd.f32 1.0, %v2402_v15 }
 0x24b   : > { %1865 = vst.msk [vmem:[%s3184_s30 + $0x20] sm:$0xf] %vm1856_vm13, %v1848_v54  ;;  %v1695_v49 = vsel %vm1694_vm2, %v2400_v59, %v1691_v7  ;;  %v1703_v42 = vmul.f32 %v2404_v27, %v3299_v29  ;;  %2405 = vpow2.f32 %v2110_v12  ;;  %vm1708_vm5 = vweird.f32 %v2404_v27 }
 0x24c   : > { %v1700_v9 = vsel %vm1697_vm4, %v1699_v52, %v1695_v49  ;;  %2407 = vrcp.f32 %v3313_v14  ;;  %v1444_v41 = vpop.f32.mrf.mxu3  ;;  %vm1709_vm7 = vmor %vm1707_vm6, %vm1708_vm5  ;;  %v1726_v44 = vand.u32 2147483647, %v3313_v14  ;;  %v1728_v20 = vand.u32 2147483648, %v3313_v14  ;;  %v275_v52 = vld [vmem:[%s2543_s15 + $0x30] sm:$0xff]  }
 0x24d   : > { %v1801_v6 = vmul.f32 %v1700_v9, %v3266_v24  ;;  %v1704_v22 = vsub.f32 1.0, %v1703_v42  ;;  %v1465_v55 = vadd.f32 %v1444_v41, %v1377_v39  ;;  %vm1722_vm1 = vweird.f32 %v3313_v14 }
 0x24e   : > { %v1729_v30 = vor.u32 1.1754944e-38, %v1728_v20  ;;  %vm1727_vm12 = vcmp.eq.f32.partialorder %v1726_v44, 8.507059e+37 }
 0x24f   : > { %v1833_v18 = vadd.f32 %v1817_v45, %v1801_v6  ;;  %v1705_v46 = vmul.f32 %v2404_v27, %v1704_v22  ;;  %v3324_v0 = vadd.f32 %v3150_v1, %v1465_v55  ;;  %v1820_v6 = vunpack.c.l.bf16 %v275_v52 }
 0x251   : > { %v2406_v3 = vpop.eup %2405  ;;  %v1849_v40 = vpack.c.bf16 %v1833_v18, %v1833_v18  ;;  %v1706_v56 = vadd.f32 %v2404_v27, %v1705_v46  ;;  %v2111_v24 = vmul.f32 -1.442695, %v3324_v0 }
 0x252   : > { %v2408_v10 = vpop.eup %2407  ;;  %v1548_v17 = vadd.f32 1.0, %v2406_v3 }
 0x253   : > { %1866 = vst.msk [vmem:[%s3184_s30 + $0x24] sm:$0xf] %vm1856_vm13, %v1849_v40  ;;  %v1710_v13 = vsel %vm1709_vm7, %v2404_v27, %v1706_v56  ;;  %v1718_v37 = vmul.f32 %v2408_v10, %v3313_v14  ;;  %2409 = vpow2.f32 %v2111_v24  ;;  %vm1723_vm9 = vweird.f32 %v2408_v10 }
 0x254   : > { %v1715_v11 = vsel %vm1712_vm8, %v1714_v8, %v1710_v13  ;;  %2411 = vrcp.f32 %v1548_v17  ;;  %v1447_v32 = vpop.f32.mrf.mxu3  ;;  %vm1724_vm11 = vmor %vm1722_vm1, %vm1723_vm9  ;;  %v1741_v7 = vand.u32 2147483647, %v1548_v17  ;;  %v1743_v12 = vand.u32 2147483648, %v1548_v17 }
 0x255   : > { %v1802_v53 = vmul.f32 %v1715_v11, %v3280_v21  ;;  %v1719_v26 = vsub.f32 1.0, %v1718_v37  ;;  %v1466_v48 = vadd.f32 %v1447_v32, %v1380_v38  ;;  %v1381_v21 = vpop.f32.mrf.mxu2  ;;  %vm1737_vm10 = vweird.f32 %v1548_v17 }
 0x256   : > { %v1382_v60 = vadd.f32 %v1381_v21, %v1316_v25  ;;  %vm1742_vm15 = vcmp.eq.f32.partialorder %v1741_v7, 8.507059e+37 }
 0x257   : > { %v1834_v59 = vadd.f32 %v1818_v31, %v1802_v53  ;;  %v1720_v61 = vmul.f32 %v2408_v10, %v1719_v26  ;;  %v3335_v47 = vadd.f32 %v3150_v1, %v1466_v48  ;;  %v277_v48 = vld [vmem:[%s2543_s15 + $0x38] sm:$0xff]  }
 0x259   : > { %v2410_v29 = vpop.eup %2409  ;;  %v1850_v36 = vpack.c.bf16 %v1834_v59, %v1834_v59  ;;  %v1721_v63 = vadd.f32 %v2408_v10, %v1720_v61  ;;  %v2112_v43 = vmul.f32 -1.442695, %v3335_v47 }
 0x25a   : > { %v2412_v33 = vpop.eup %2411  ;;  %v1549_v2 = vadd.f32 1.0, %v2410_v29  ;;  %v1822_v29 = vunpack.c.l.bf16 %v277_v48 }
 0x25b   : > { %1867 = vst.msk [vmem:[%s3184_s30 + $0x28] sm:$0xf] %vm1856_vm13, %v1850_v36  ;;  %v1725_v62 = vsel %vm1724_vm11, %v2408_v10, %v1721_v63  ;;  %v1733_v16 = vmul.f32 %v2412_v33, %v1548_v17  ;;  %2413 = vpow2.f32 %v2112_v43  ;;  %vm1738_vm3 = vweird.f32 %v2412_v33 }
 0x25c   : > { %v1730_v5 = vsel %vm1727_vm12, %v1729_v30, %v1725_v62  ;;  %2415 = vrcp.f32 %v1549_v2  ;;  %v1449_v19 = vpop.f32.mrf.mxu3  ;;  %vm1739_vm14 = vmor %vm1737_vm10, %vm1738_vm3  ;;  %v1758_v18 = vand.u32 2147483648, %v1549_v2  ;;  %v1756_v28 = vand.u32 2147483647, %v1549_v2 }
 0x25d   : > { %v1803_v58 = vmul.f32 %v1730_v5, %v3295_v23  ;;  %v1734_v15 = vsub.f32 1.0, %v1733_v16  ;;  %v1467_v54 = vadd.f32 %v1449_v19, %v1382_v60  ;;  %v1744_v23 = vor.u32 1.1754944e-38, %v1743_v12 }
 0x25e   : > { %vm1752_vm2 = vweird.f32 %v1549_v2  ;;  %v1759_v10 = vor.u32 1.1754944e-38, %v1758_v18  ;;  %vm1757_vm5 = vcmp.eq.f32.partialorder %v1756_v28, 8.507059e+37  ;;  %v1823_v5 = vunpack.c.h.bf16 %v277_v48 }
 0x25f   : > { %v1835_v27 = vadd.f32 %v1819_v34, %v1803_v58  ;;  %v1735_v45 = vmul.f32 %v2412_v33, %v1734_v15  ;;  %v3344_v39 = vadd.f32 %v3150_v1, %v1467_v54 }
 0x261   : > { %v2414_v14 = vpop.eup %2413  ;;  %v1851_v49 = vpack.c.bf16 %v1835_v27, %v1835_v27  ;;  %v1736_v42 = vadd.f32 %v2412_v33, %v1735_v45  ;;  %v2113_v9 = vmul.f32 -1.442695, %v3344_v39 }
 0x262   : > { %v2416_v41 = vpop.eup %2415  ;;  %v1550_v22 = vadd.f32 1.0, %v2414_v14 }
 0x263   : > { %1868 = vst.msk [vmem:[%s3184_s30 + $0x2c] sm:$0xf] %vm1856_vm13, %v1851_v49  ;;  %v1740_v50 = vsel %vm1739_vm14, %v2412_v33, %v1736_v42  ;;  %v1748_v55 = vmul.f32 %v2416_v41, %v1549_v2  ;;  %2417 = vpow2.f32 %v2113_v9  ;;  %vm1753_vm0 = vweird.f32 %v2416_v41 }
 0x264   : > { %v1745_v57 = vsel %vm1742_vm15, %v1744_v23, %v1740_v50  ;;  %2419 = vrcp.f32 %v1550_v22  ;;  %vm1754_vm4 = vmor %vm1752_vm2, %vm1753_vm0  ;;  %v1773_v11 = vand.u32 2147483648, %v1550_v22  ;;  %v1771_v26 = vand.u32 2147483647, %v1550_v22 }
 0x265   : > { %v1804_v1 = vmul.f32 %v1745_v57, %v3309_v51  ;;  %v1749_v35 = vsub.f32 1.0, %v1748_v55  ;;  %v1821_v51 = vunpack.c.h.bf16 %v275_v52  ;;  %vm1767_vm7 = vweird.f32 %v1550_v22 }
 0x266   : > { %v1774_v61 = vor.u32 1.1754944e-38, %v1773_v11  ;;  %vm1772_vm9 = vcmp.eq.f32.partialorder %v1771_v26, 8.507059e+37 }
 0x267   : > { %v1836_v4 = vadd.f32 %v1820_v6, %v1804_v1  ;;  %v1750_v46 = vmul.f32 %v2416_v41, %v1749_v35 }
 0x269   : > { %v2418_v3 = vpop.eup %2417  ;;  %v1852_v40 = vpack.c.bf16 %v1836_v4, %v1836_v4  ;;  %v1751_v56 = vadd.f32 %v2416_v41, %v1750_v46 }
 0x26a   : > { %v2420_v24 = vpop.eup %2419  ;;  %v1551_v8 = vadd.f32 1.0, %v2418_v3 }
 0x26b   : > { %1869 = vst.msk [vmem:[%s3184_s30 + $0x30] sm:$0xf] %vm1856_vm13, %v1852_v40  ;;  %v1755_v31 = vsel %vm1754_vm4, %v2416_v41, %v1751_v56  ;;  %v1763_v38 = vmul.f32 %v2420_v24, %v1550_v22  ;;  %vm1768_vm6 = vweird.f32 %v2420_v24 }
 0x26c   : > { %v1760_v17 = vsel %vm1757_vm5, %v1759_v10, %v1755_v31  ;;  %2421 = vrcp.f32 %v1551_v8  ;;  %vm1769_vm8 = vmor %vm1767_vm7, %vm1768_vm6  ;;  %v1788_v43 = vand.u32 2147483648, %v1551_v8  ;;  %v1786_v34 = vand.u32 2147483647, %v1551_v8 }
 0x26d   : > { %v1805_v13 = vmul.f32 %v1760_v17, %v3324_v0  ;;  %v1764_v37 = vsub.f32 1.0, %v1763_v38  ;;  %vm1782_vm11 = vweird.f32 %v1551_v8 }
 0x26e   : > { %v1789_v62 = vor.u32 1.1754944e-38, %v1788_v43  ;;  %vm1787_vm3 = vcmp.eq.f32.partialorder %v1786_v34, 8.507059e+37 }
 0x26f   : > { %v1837_v32 = vadd.f32 %v1821_v51, %v1805_v13  ;;  %v1765_v53 = vmul.f32 %v2420_v24, %v1764_v37 }
 0x271   : > { %v1853_v44 = vpack.c.bf16 %v1837_v32, %v1837_v32  ;;  %v1766_v20 = vadd.f32 %v2420_v24, %v1765_v53 }
 0x272   : > { %v2422_v59 = vpop.eup %2421 }
 0x273   : > { %1870 = vst.msk [vmem:[%s3184_s30 + $0x34] sm:$0xf] %vm1856_vm13, %v1853_v44  ;;  %v1770_v25 = vsel %vm1769_vm8, %v2420_v24, %v1766_v20  ;;  %v1778_v0 = vmul.f32 %v2422_v59, %v1551_v8  ;;  %vm1783_vm1 = vweird.f32 %v2422_v59 }
 0x274   : > { %v1775_v36 = vsel %vm1772_vm9, %v1774_v61, %v1770_v25  ;;  %vm1784_vm12 = vmor %vm1782_vm11, %vm1783_vm1 }
 0x275   : > { %v1806_v63 = vmul.f32 %v1775_v36, %v3335_v47  ;;  %v1779_v21 = vsub.f32 1.0, %v1778_v0 }
 0x277   : > { %v1838_v33 = vadd.f32 %v1822_v29, %v1806_v63  ;;  %v1780_v30 = vmul.f32 %v2422_v59, %v1779_v21 }
 0x279   : > { %v1854_v60 = vpack.c.bf16 %v1838_v33, %v1838_v33  ;;  %v1781_v2 = vadd.f32 %v2422_v59, %v1780_v30 }
 0x27b   : > { %1871 = vst.msk [vmem:[%s3184_s30 + $0x38] sm:$0xf] %vm1856_vm13, %v1854_v60  ;;  %v1785_v16 = vsel %vm1784_vm12, %v2422_v59, %v1781_v2 }
 0x27c   : > { %v1790_v19 = vsel %vm1787_vm3, %v1789_v62, %v1785_v16 }
 0x27d   : > { %v1807_v47 = vmul.f32 %v1790_v19, %v3344_v39 }
 0x27f   : > { %v1839_v58 = vadd.f32 %v1823_v5, %v1807_v47 }
 0x281   : > { %v1855_v15 = vpack.c.bf16 %v1839_v58, %v1839_v58 }
 0x283   : > { %1872 = vst.msk [vmem:[%s3184_s30 + $0x3c] sm:$0xf] %vm1856_vm13, %v1855_v15 }
 0x284 PF: > { %s15_s22 = sadd.s32 1, %s2461_s22   ;;  %s3405_s18 = smov %s2453_s20 }
 0x285   : > { %p12_p11 = scmp.ge.s32.totalorder %s15_s22, 6   ;;  %s3406_s19 = smov %s2457_s21 }
 0x286   : > { %s3407_s20 = smov %s3410_s23  ;;  %s3408_s21 = smov %s3414_s24 }
 0x287   :  { %14 = sbr.rel (!%p12_p11) target bundleno = 3 (0x3), region = 75 }

</bundles_post_ra>
